<compile_context>
chip_gen: v7x
topology: tpu7x:2x2x1
jax: 0.10.0
libtpu: 0.0.40
codegen_flags: <defaults>
</compile_context>

<pallas_src>
import functools

import numpy as np
import jax
import jax.numpy as jnp
from jax.experimental import pallas as pl
from jax.experimental.pallas import tpu as pltpu

EPS = 1e-4  # matches pixel_norm default eps


# --------------------------------------------------------------------------
# Pallas kernel: one grid step = one batch element.
# --------------------------------------------------------------------------
def cosine_attention_kernel(x_ref, wqkv_ref, wout_ref, o_ref,
                            y_scratch, vaug_scratch, *,
                            num_heads, head_dim, strip):
    # x_ref:        (C, HW)      input feature map for this batch element
    # wqkv_ref:     (3C, C)      bf16 qkv 1x1-conv weight, rows ordered
    #                            [all-q | all-k | all-v], head-major per group
    # wout_ref:     (C, C)       bf16 output 1x1-conv weight
    # o_ref:        (C, HW)      output
    # y_scratch:    (C, HW)      f32 per-head attention outputs
    # vaug_scratch: (hd+1, HW)   f32 augmented v (last row = ones -> denom)
    HW = x_ref.shape[1]
    inv_sqrt_hd = np.float32(1.0 / np.sqrt(head_dim))
    inv_sqrt2 = np.float32(1.0 / np.sqrt(2.0))

    x_bf = x_ref[...].astype(jnp.bfloat16)       # MXU operand

    # qkv projection: (3C, C) @ (C, HW) -> (3C, HW), bf16 operands / f32 acc.
    qkv = jax.lax.dot_general(
        wqkv_ref[...], x_bf, (((1,), (0,)), ((), ())),
        preferred_element_type=jnp.float32)

    # pixel_norm over head_dim for all 3*num_heads groups, as a
    # reciprocal-multiply:  x * 1/(eps + ||x|| / sqrt(head_dim)).
    g = 3 * num_heads
    qkv3 = qkv.reshape(g, head_dim, HW)
    ss = jnp.sum(qkv3 * qkv3, axis=1, keepdims=True)               # (g, 1, HW)
    inv = pl.reciprocal(EPS + jnp.sqrt(ss) * inv_sqrt_hd, approx=True)
    # q group: fold the attention 1/sqrt(head_dim) scale into the norm factor.
    q_n = (qkv3[:num_heads] * (inv[:num_heads] * inv_sqrt_hd)
           ).astype(jnp.bfloat16)                                   # (nh, hd, HW)
    kv_n = (qkv3[num_heads:] * inv[num_heads:]
            ).astype(jnp.bfloat16)                                  # (2nh, hd, HW)

    # Ones row of the augmented-v block (denominator row); written once.
    vaug_scratch[head_dim:head_dim + 1, :] = jnp.ones((1, HW), jnp.float32)

    for hh in range(num_heads):
        q = q_n[hh]                                 # (hd, HW), incl. 1/sqrt(hd)
        k = kv_n[hh]                                # (hd, HW)
        # augmented v: rows [0:hd] = v, row hd stays = ones
        vaug_scratch[0:head_dim, :] = kv_n[num_heads + hh].astype(jnp.float32)
        v_aug = vaug_scratch[...].astype(jnp.bfloat16)              # (hd+1, HW)

        # Strip-tiled softmax-attention over the key axis; accumulator row
        # `head_dim` collects the softmax denominator for free (ones-row).
        acc = jnp.zeros((head_dim + 1, HW), jnp.float32)
        for s0 in range(0, HW, strip):
            k_s = k[:, s0:s0 + strip]                               # (hd, S)
            v_s = v_aug[:, s0:s0 + strip]                           # (hd+1, S)
            # transposed scores for this key strip:
            #   s_t[kpos, qpos] = sum_d k[d,kpos] * q[d,qpos] / sqrt(hd)
            s_t = jax.lax.dot_general(
                k_s, q, (((0,), (0,)), ((), ())),
                preferred_element_type=jnp.float32)                 # (S, HW)
            # bf16 exp; no max-subtraction needed (|s_t| <= sqrt(head_dim)
            # thanks to pixel_norm, exp stays tiny and finite).
            e = jnp.exp(s_t.astype(jnp.bfloat16))                   # (S, HW)
            acc = acc + jax.lax.dot_general(
                v_s, e, (((1,), (0,)), ((), ())),
                preferred_element_type=jnp.float32)                 # (hd+1, HW)

        # Deferred softmax normalization on the small (hd, HW) output; the
        # denominator is the last accumulator row (ones-row fusion).
        inv_denom = pl.reciprocal(acc[head_dim:head_dim + 1, :], approx=True)
        y_scratch[hh * head_dim:(hh + 1) * head_dim, :] = (
            acc[0:head_dim, :] * inv_denom)

    # output 1x1 conv: (C, C) @ (C, HW)
    out = jax.lax.dot_general(
        wout_ref[...], y_scratch[...].astype(jnp.bfloat16),
        (((1,), (0,)), ((), ())), preferred_element_type=jnp.float32)

    # mp_add(x, y, t=0.5) == (x + y) / sqrt(2); re-read x from VMEM here.
    o_ref[...] = ((x_ref[...].astype(jnp.float32) + out) * inv_sqrt2
                  ).astype(o_ref.dtype)


# --------------------------------------------------------------------------
# Glue: weight normalization (magnitude-preserving Conv2d) + pallas_call.
# --------------------------------------------------------------------------
def _prep_conv_weight(wt):
    """normalize(w) / sqrt(fan_in) for a (O, I, kh, kw) weight (eval mode)."""
    f32 = wt.astype(jnp.float32)
    fan_in = wt.shape[1] * wt.shape[2] * wt.shape[3]
    n = EPS + jnp.sqrt(jnp.sum(f32 * f32, axis=(1, 2, 3), keepdims=True)) \
        * np.float32(np.sqrt(1.0 / fan_in))
    return (f32 / n) / np.float32(np.sqrt(fan_in))


def _vmem_limit_bytes(c, hw, strip, head_dim):
    est = (
        4 * c * hw * 4                       # x / out blocks, double-buffered
        + 2 * (3 * c * c + c * c) * 2        # bf16 weights, double-buffered
        + 3 * c * hw * (4 + 2)               # qkv (f32) + normalized qkv (bf16)
        + strip * hw * (4 + 2)               # one strip: scores f32 + exp bf16
        + c * hw * 4                         # y scratch (f32)
        + (head_dim + 8) * hw * (4 + 4)      # v_aug scratch + f32 accumulator
    )
    try:
        info = pltpu.get_tpu_info()
        cap = int(getattr(info, "vmem_capacity_bytes", 64 << 20))
    except Exception:  # pragma: no cover - conservative fallback
        cap = 64 << 20
    # Leave headroom below physical VMEM (esp. v7x's 64 MiB per TC).
    cap = max(cap - (12 << 20), 16 << 20)
    return int(min(max(2 * est, 32 << 20), cap))


def cosine_attention_pallas(x_nchw, w_qkv, w_out, num_heads):
    b, c, h, w = x_nchw.shape
    hd = c // num_heads
    HW = h * w
    # Key-axis strip size for the softmax chain (>=64 to keep MXU contraction
    # depth reasonable; fall back to a single strip if HW isn't lane-aligned).
    strip = 128 if HW % 128 == 0 else HW

    wqkv_n = _prep_conv_weight(w_qkv)[:, :, 0, 0]   # (3C, C)
    wout_n = _prep_conv_weight(w_out)[:, :, 0, 0]   # (C, C)

    # PyTorch views the 3C qkv channels as (heads, hd, 3); reorder rows so the
    # kernel sees [all-q | all-k | all-v], each head-major:
    #   kernel row (s*C + head*hd + d)  <-  original channel (head*3*hd + d*3 + s)
    perm = np.array(
        [head * 3 * hd + d * 3 + s
         for s in range(3) for head in range(num_heads) for d in range(hd)],
        dtype=np.int32)
    wqkv_k = wqkv_n[perm, :].astype(jnp.bfloat16)    # (3C, C) bf16 MXU operand
    wout_k = wout_n.astype(jnp.bfloat16)             # (C, C)  bf16 MXU operand

    x_flat = x_nchw.reshape(b, c, HW)                # (B, C, HW)

    kernel = functools.partial(cosine_attention_kernel,
                               num_heads=num_heads, head_dim=hd, strip=strip)

    # TODO(synk): for B == 1 on v7x, add the head axis to the grid
    # (grid=(B, num_heads), both "parallel") so both TensorCores stay busy.
    out = pl.pallas_call(
        kernel,
        out_shape=jax.ShapeDtypeStruct((b, c, HW), x_nchw.dtype),
        grid_spec=pltpu.PrefetchScalarGridSpec(
            num_scalar_prefetch=0,
            grid=(b,),
            in_specs=[
                pl.BlockSpec((None, c, HW), lambda i: (i, 0, 0)),
                pl.BlockSpec((3 * c, c), lambda i: (0, 0)),
                pl.BlockSpec((c, c), lambda i: (0, 0)),
            ],
            out_specs=pl.BlockSpec((None, c, HW), lambda i: (i, 0, 0)),
            scratch_shapes=[
                pltpu.VMEM((c, HW), jnp.float32),        # per-head outputs
                pltpu.VMEM((hd + 1, HW), jnp.float32),   # augmented v (+ ones)
            ],
        ),
        compiler_params=pltpu.CompilerParams(
            dimension_semantics=("parallel",),        # batch blocks are disjoint
            vmem_limit_bytes=_vmem_limit_bytes(c, HW, strip, hd),
        ),
    )(x_flat, wqkv_k, wout_k)

    return out.reshape(b, c, h, w)


# --------------------------------------------------------------------------
# Pure-JAX reference (mirrors the PyTorch module exactly, f32) for validation.
# --------------------------------------------------------------------------
def cosine_attention_ref(x, w_qkv, w_out, num_heads):
    b, c, h, w = x.shape
    hd = c // num_heads
    wq = _prep_conv_weight(w_qkv)[:, :, 0, 0]
    wo = _prep_conv_weight(w_out)[:, :, 0, 0]

    qkv = jnp.einsum('oi,bihw->bohw', wq, x)                   # 1x1 conv
    qkv = qkv.reshape(b, num_heads, hd, 3, h * w)
    n = EPS + jnp.sqrt(jnp.sum(qkv * qkv, axis=2, keepdims=True)) \
        * np.float32(np.sqrt(1.0 / hd))
    qkv = qkv / n
    q = jnp.transpose(qkv[:, :, :, 0, :], (0, 1, 3, 2))        # (b, nh, hw, hd)
    k = jnp.transpose(qkv[:, :, :, 1, :], (0, 1, 3, 2))
    v = jnp.transpose(qkv[:, :, :, 2, :], (0, 1, 3, 2))
    s = jnp.einsum('bnqd,bnkd->bnqk', q, k) * np.float32(1.0 / np.sqrt(hd))
    p = jax.nn.softmax(s, axis=-1)
    y = jnp.einsum('bnqk,bnkd->bnqd', p, v)
    y = jnp.transpose(y, (0, 1, 3, 2)).reshape(b, c, h, w)
    y = jnp.einsum('oi,bihw->bohw', wo, y)                     # 1x1 conv
    return (x + y) * np.float32(1.0 / np.sqrt(2.0))            # mp_add(x, y, 0.5)


# --------------------------------------------------------------------------
if __name__ == "__main__":
    # HW = 256: lane-dense last dim (multiple of 128), head_dim = 8.
    B, C, H, W = 2, 32, 16, 16
    NUM_HEADS = 4

    key = jax.random.PRNGKey(0)
    kx, kq, ko = jax.random.split(key, 3)
    x = jax.random.normal(kx, (B, C, H, W), jnp.float32)
    w_qkv = jax.random.normal(kq, (3 * C, C, 1, 1), jnp.float32)   # qkv_conv weight
    w_out = jax.random.normal(ko, (C, C, 1, 1), jnp.float32)       # out_conv weight

    out = jax.block_until_ready(cosine_attention_pallas(x, w_qkv, w_out, NUM_HEADS))
    ref = jax.block_until_ready(cosine_attention_ref(x, w_qkv, w_out, NUM_HEADS))

    # bf16 MXU operands / bf16 exp / approx reciprocals (vs. the pure-f32
    # reference) widen the tolerance.
    np.testing.assert_allclose(np.asarray(out), np.asarray(ref),
                               rtol=5e-2, atol=8e-2)
    print("KERNEL_OK")
</pallas_src>

<mosaic_0001>
module attributes {stable_mosaic.version = 11 : i64} {
  func.func @cosine_attention_kernel(%arg0: i32, %arg1: memref<1x32x256xf32, #tpu.memory_space<vmem>>, %arg2: memref<96x32xbf16, #tpu.memory_space<vmem>>, %arg3: memref<32x32xbf16, #tpu.memory_space<vmem>>, %arg4: memref<1x32x256xf32, #tpu.memory_space<vmem>>, %arg5: memref<32x256xf32, #tpu.memory_space<vmem>>, %arg6: memref<9x256xf32, #tpu.memory_space<vmem>>) attributes {dimension_semantics = [#tpu.dimension_semantics<parallel>], iteration_bounds = array<i64: 2>, scalar_prefetch = 0 : i64, scratch_operands = 2 : i64, tpu.core_type = #tpu.core_type<tc>, window_params = [{transform_indices = @transform_0, window_bounds = array<i64: 1, 32, 256>}, {pipeline_mode = #tpu.pipeline_mode<synchronous>, transform_indices = @transform_1, window_bounds = array<i64: 96, 32>}, {pipeline_mode = #tpu.pipeline_mode<synchronous>, transform_indices = @transform_2, window_bounds = array<i64: 32, 32>}, {transform_indices = @transform_3, window_bounds = array<i64: 1, 32, 256>}]} {
    %c0 = arith.constant 0 : index
    %c0_0 = arith.constant 0 : index
    %c0_1 = arith.constant 0 : index
    %0 = vector.load %arg1[%c0, %c0_0, %c0_1] : memref<1x32x256xf32, #tpu.memory_space<vmem>>, vector<1x32x256xf32>
    %1 = vector.shape_cast %0 : vector<1x32x256xf32> to vector<32x256xf32>
    %2 = arith.truncf %1 : vector<32x256xf32> to vector<32x256xbf16>
    %c0_2 = arith.constant 0 : index
    %c0_3 = arith.constant 0 : index
    %3 = vector.load %arg2[%c0_2, %c0_3] : memref<96x32xbf16, #tpu.memory_space<vmem>>, vector<96x32xbf16>
    %cst = arith.constant dense<0.000000e+00> : vector<96x256xf32>
    %4 = tpu.matmul %3, %2, %cst {dimension_numbers = #tpu.dot_dimension_numbers<[1], [0], [0], [1], [0, 0, 1, 1], [], []>} : vector<96x32xbf16>, vector<32x256xbf16>, vector<96x256xf32> -> vector<96x256xf32>
    %5 = vector.shape_cast %4 : vector<96x256xf32> to vector<12x8x256xf32>
    %6 = arith.mulf %5, %5 : vector<12x8x256xf32>
    %cst_4 = arith.constant dense<0.000000e+00> : vector<12x256xf32>
    %7 = vector.multi_reduction <add>, %6, %cst_4 [1] : vector<12x8x256xf32> to vector<12x256xf32>
    %8 = vector.shape_cast %7 : vector<12x256xf32> to vector<12x1x256xf32>
    %9 = math.sqrt %8 : vector<12x1x256xf32>
    %cst_5 = arith.constant 0.353553385 : f32
    %10 = vector.broadcast %cst_5 : f32 to vector<12x1x256xf32>
    %11 = arith.mulf %9, %10 : vector<12x1x256xf32>
    %cst_6 = arith.constant 9.99999974E-5 : f32
    %12 = vector.broadcast %cst_6 : f32 to vector<12x1x256xf32>
    %13 = arith.addf %12, %11 : vector<12x1x256xf32>
    %14 = tpu.reciprocal %13 {approx = true} : vector<12x1x256xf32> -> vector<12x1x256xf32>
    %15 = vector.extract_strided_slice %5 {offsets = [0, 0, 0], sizes = [4, 8, 256], strides = [1, 1, 1]} : vector<12x8x256xf32> to vector<4x8x256xf32>
    %16 = vector.extract_strided_slice %14 {offsets = [0, 0, 0], sizes = [4, 1, 256], strides = [1, 1, 1]} : vector<12x1x256xf32> to vector<4x1x256xf32>
    %cst_7 = arith.constant 0.353553385 : f32
    %17 = vector.broadcast %cst_7 : f32 to vector<4x1x256xf32>
    %18 = arith.mulf %16, %17 : vector<4x1x256xf32>
    %19 = vector.broadcast %18 : vector<4x1x256xf32> to vector<4x8x256xf32>
    %20 = arith.mulf %15, %19 : vector<4x8x256xf32>
    %21 = arith.truncf %20 : vector<4x8x256xf32> to vector<4x8x256xbf16>
    %22 = vector.extract_strided_slice %5 {offsets = [4, 0, 0], sizes = [8, 8, 256], strides = [1, 1, 1]} : vector<12x8x256xf32> to vector<8x8x256xf32>
    %23 = vector.extract_strided_slice %14 {offsets = [4, 0, 0], sizes = [8, 1, 256], strides = [1, 1, 1]} : vector<12x1x256xf32> to vector<8x1x256xf32>
    %24 = vector.broadcast %23 : vector<8x1x256xf32> to vector<8x8x256xf32>
    %25 = arith.mulf %22, %24 : vector<8x8x256xf32>
    %26 = arith.truncf %25 : vector<8x8x256xf32> to vector<8x8x256xbf16>
    %cst_8 = arith.constant 1.000000e+00 : f32
    %27 = vector.broadcast %cst_8 : f32 to vector<1x256xf32>
    %c8 = arith.constant 8 : index
    %c0_9 = arith.constant 0 : index
    %28 = vector.load %arg6[%c8, %c0_9] : memref<9x256xf32, #tpu.memory_space<vmem>>, vector<1x256xf32>
    tpu.vector_store %arg6[%c8, %c0_9], %27 {strides = array<i32>} : memref<9x256xf32, #tpu.memory_space<vmem>>, vector<1x256xf32>,
    %29 = vector.extract_strided_slice %21 {offsets = [0, 0, 0], sizes = [1, 8, 256], strides = [1, 1, 1]} : vector<4x8x256xbf16> to vector<1x8x256xbf16>
    %30 = vector.shape_cast %29 : vector<1x8x256xbf16> to vector<8x256xbf16>
    %31 = vector.extract_strided_slice %26 {offsets = [0, 0, 0], sizes = [1, 8, 256], strides = [1, 1, 1]} : vector<8x8x256xbf16> to vector<1x8x256xbf16>
    %32 = vector.shape_cast %31 : vector<1x8x256xbf16> to vector<8x256xbf16>
    %33 = vector.extract_strided_slice %26 {offsets = [4, 0, 0], sizes = [1, 8, 256], strides = [1, 1, 1]} : vector<8x8x256xbf16> to vector<1x8x256xbf16>
    %34 = vector.shape_cast %33 : vector<1x8x256xbf16> to vector<8x256xbf16>
    %35 = arith.extf %34 : vector<8x256xbf16> to vector<8x256xf32>
    %c0_10 = arith.constant 0 : index
    %c0_11 = arith.constant 0 : index
    %36 = vector.load %arg6[%c0_10, %c0_11] : memref<9x256xf32, #tpu.memory_space<vmem>>, vector<8x256xf32>
    tpu.vector_store %arg6[%c0_10, %c0_11], %35 {strides = array<i32>} : memref<9x256xf32, #tpu.memory_space<vmem>>, vector<8x256xf32>,
    %c0_12 = arith.constant 0 : index
    %c0_13 = arith.constant 0 : index
    %37 = vector.load %arg6[%c0_12, %c0_13] : memref<9x256xf32, #tpu.memory_space<vmem>>, vector<9x256xf32>
    %38 = arith.truncf %37 : vector<9x256xf32> to vector<9x256xbf16>
    %cst_14 = arith.constant 0.000000e+00 : f32
    %39 = vector.broadcast %cst_14 : f32 to vector<9x256xf32>
    %40 = vector.extract_strided_slice %32 {offsets = [0, 0], sizes = [8, 128], strides = [1, 1]} : vector<8x256xbf16> to vector<8x128xbf16>
    %41 = vector.extract_strided_slice %38 {offsets = [0, 0], sizes = [9, 128], strides = [1, 1]} : vector<9x256xbf16> to vector<9x128xbf16>
    %cst_15 = arith.constant dense<0.000000e+00> : vector<128x256xf32>
    %42 = tpu.matmul %40, %30, %cst_15 {dimension_numbers = #tpu.dot_dimension_numbers<[0], [0], [1], [1], [0, 1, 1, 1], [], []>} : vector<8x128xbf16>, vector<8x256xbf16>, vector<128x256xf32> -> vector<128x256xf32>
    %43 = arith.truncf %42 : vector<128x256xf32> to vector<128x256xbf16>
    %44 = math.exp %43 : vector<128x256xbf16>
    %cst_16 = arith.constant dense<0.000000e+00> : vector<9x256xf32>
    %45 = tpu.matmul %41, %44, %cst_16 {dimension_numbers = #tpu.dot_dimension_numbers<[1], [0], [0], [1], [0, 0, 1, 1], [], []>} : vector<9x128xbf16>, vector<128x256xbf16>, vector<9x256xf32> -> vector<9x256xf32>
    %46 = arith.addf %39, %45 : vector<9x256xf32>
    %47 = vector.extract_strided_slice %32 {offsets = [0, 128], sizes = [8, 128], strides = [1, 1]} : vector<8x256xbf16> to vector<8x128xbf16>
    %48 = vector.extract_strided_slice %38 {offsets = [0, 128], sizes = [9, 128], strides = [1, 1]} : vector<9x256xbf16> to vector<9x128xbf16>
    %cst_17 = arith.constant dense<0.000000e+00> : vector<128x256xf32>
    %49 = tpu.matmul %47, %30, %cst_17 {dimension_numbers = #tpu.dot_dimension_numbers<[0], [0], [1], [1], [0, 1, 1, 1], [], []>} : vector<8x128xbf16>, vector<8x256xbf16>, vector<128x256xf32> -> vector<128x256xf32>
    %50 = arith.truncf %49 : vector<128x256xf32> to vector<128x256xbf16>
    %51 = math.exp %50 : vector<128x256xbf16>
    %cst_18 = arith.constant dense<0.000000e+00> : vector<9x256xf32>
    %52 = tpu.matmul %48, %51, %cst_18 {dimension_numbers = #tpu.dot_dimension_numbers<[1], [0], [0], [1], [0, 0, 1, 1], [], []>} : vector<9x128xbf16>, vector<128x256xbf16>, vector<9x256xf32> -> vector<9x256xf32>
    %53 = arith.addf %46, %52 : vector<9x256xf32>
    %54 = vector.extract_strided_slice %53 {offsets = [8, 0], sizes = [1, 256], strides = [1, 1]} : vector<9x256xf32> to vector<1x256xf32>
    %55 = tpu.reciprocal %54 {approx = true} : vector<1x256xf32> -> vector<1x256xf32>
    %56 = vector.extract_strided_slice %53 {offsets = [0, 0], sizes = [8, 256], strides = [1, 1]} : vector<9x256xf32> to vector<8x256xf32>
    %57 = vector.broadcast %55 : vector<1x256xf32> to vector<8x256xf32>
    %58 = arith.mulf %56, %57 : vector<8x256xf32>
    %c0_19 = arith.constant 0 : index
    %c0_20 = arith.constant 0 : index
    %59 = vector.load %arg5[%c0_19, %c0_20] : memref<32x256xf32, #tpu.memory_space<vmem>>, vector<8x256xf32>
    tpu.vector_store %arg5[%c0_19, %c0_20], %58 {strides = array<i32>} : memref<32x256xf32, #tpu.memory_space<vmem>>, vector<8x256xf32>,
    %60 = vector.extract_strided_slice %21 {offsets = [1, 0, 0], sizes = [1, 8, 256], strides = [1, 1, 1]} : vector<4x8x256xbf16> to vector<1x8x256xbf16>
    %61 = vector.shape_cast %60 : vector<1x8x256xbf16> to vector<8x256xbf16>
    %62 = vector.extract_strided_slice %26 {offsets = [1, 0, 0], sizes = [1, 8, 256], strides = [1, 1, 1]} : vector<8x8x256xbf16> to vector<1x8x256xbf16>
    %63 = vector.shape_cast %62 : vector<1x8x256xbf16> to vector<8x256xbf16>
    %64 = vector.extract_strided_slice %26 {offsets = [5, 0, 0], sizes = [1, 8, 256], strides = [1, 1, 1]} : vector<8x8x256xbf16> to vector<1x8x256xbf16>
    %65 = vector.shape_cast %64 : vector<1x8x256xbf16> to vector<8x256xbf16>
    %66 = arith.extf %65 : vector<8x256xbf16> to vector<8x256xf32>
    %c0_21 = arith.constant 0 : index
    %c0_22 = arith.constant 0 : index
    %67 = vector.load %arg6[%c0_21, %c0_22] : memref<9x256xf32, #tpu.memory_space<vmem>>, vector<8x256xf32>
    tpu.vector_store %arg6[%c0_21, %c0_22], %66 {strides = array<i32>} : memref<9x256xf32, #tpu.memory_space<vmem>>, vector<8x256xf32>,
    %c0_23 = arith.constant 0 : index
    %c0_24 = arith.constant 0 : index
    %68 = vector.load %arg6[%c0_23, %c0_24] : memref<9x256xf32, #tpu.memory_space<vmem>>, vector<9x256xf32>
    %69 = arith.truncf %68 : vector<9x256xf32> to vector<9x256xbf16>
    %cst_25 = arith.constant 0.000000e+00 : f32
    %70 = vector.broadcast %cst_25 : f32 to vector<9x256xf32>
    %71 = vector.extract_strided_slice %63 {offsets = [0, 0], sizes = [8, 128], strides = [1, 1]} : vector<8x256xbf16> to vector<8x128xbf16>
    %72 = vector.extract_strided_slice %69 {offsets = [0, 0], sizes = [9, 128], strides = [1, 1]} : vector<9x256xbf16> to vector<9x128xbf16>
    %cst_26 = arith.constant dense<0.000000e+00> : vector<128x256xf32>
    %73 = tpu.matmul %71, %61, %cst_26 {dimension_numbers = #tpu.dot_dimension_numbers<[0], [0], [1], [1], [0, 1, 1, 1], [], []>} : vector<8x128xbf16>, vector<8x256xbf16>, vector<128x256xf32> -> vector<128x256xf32>
    %74 = arith.truncf %73 : vector<128x256xf32> to vector<128x256xbf16>
    %75 = math.exp %74 : vector<128x256xbf16>
    %cst_27 = arith.constant dense<0.000000e+00> : vector<9x256xf32>
    %76 = tpu.matmul %72, %75, %cst_27 {dimension_numbers = #tpu.dot_dimension_numbers<[1], [0], [0], [1], [0, 0, 1, 1], [], []>} : vector<9x128xbf16>, vector<128x256xbf16>, vector<9x256xf32> -> vector<9x256xf32>
    %77 = arith.addf %70, %76 : vector<9x256xf32>
    %78 = vector.extract_strided_slice %63 {offsets = [0, 128], sizes = [8, 128], strides = [1, 1]} : vector<8x256xbf16> to vector<8x128xbf16>
    %79 = vector.extract_strided_slice %69 {offsets = [0, 128], sizes = [9, 128], strides = [1, 1]} : vector<9x256xbf16> to vector<9x128xbf16>
    %cst_28 = arith.constant dense<0.000000e+00> : vector<128x256xf32>
    %80 = tpu.matmul %78, %61, %cst_28 {dimension_numbers = #tpu.dot_dimension_numbers<[0], [0], [1], [1], [0, 1, 1, 1], [], []>} : vector<8x128xbf16>, vector<8x256xbf16>, vector<128x256xf32> -> vector<128x256xf32>
    %81 = arith.truncf %80 : vector<128x256xf32> to vector<128x256xbf16>
    %82 = math.exp %81 : vector<128x256xbf16>
    %cst_29 = arith.constant dense<0.000000e+00> : vector<9x256xf32>
    %83 = tpu.matmul %79, %82, %cst_29 {dimension_numbers = #tpu.dot_dimension_numbers<[1], [0], [0], [1], [0, 0, 1, 1], [], []>} : vector<9x128xbf16>, vector<128x256xbf16>, vector<9x256xf32> -> vector<9x256xf32>
    %84 = arith.addf %77, %83 : vector<9x256xf32>
    %85 = vector.extract_strided_slice %84 {offsets = [8, 0], sizes = [1, 256], strides = [1, 1]} : vector<9x256xf32> to vector<1x256xf32>
    %86 = tpu.reciprocal %85 {approx = true} : vector<1x256xf32> -> vector<1x256xf32>
    %87 = vector.extract_strided_slice %84 {offsets = [0, 0], sizes = [8, 256], strides = [1, 1]} : vector<9x256xf32> to vector<8x256xf32>
    %88 = vector.broadcast %86 : vector<1x256xf32> to vector<8x256xf32>
    %89 = arith.mulf %87, %88 : vector<8x256xf32>
    %c8_30 = arith.constant 8 : index
    %c0_31 = arith.constant 0 : index
    %90 = vector.load %arg5[%c8_30, %c0_31] : memref<32x256xf32, #tpu.memory_space<vmem>>, vector<8x256xf32>
    tpu.vector_store %arg5[%c8_30, %c0_31], %89 {strides = array<i32>} : memref<32x256xf32, #tpu.memory_space<vmem>>, vector<8x256xf32>,
    %91 = vector.extract_strided_slice %21 {offsets = [2, 0, 0], sizes = [1, 8, 256], strides = [1, 1, 1]} : vector<4x8x256xbf16> to vector<1x8x256xbf16>
    %92 = vector.shape_cast %91 : vector<1x8x256xbf16> to vector<8x256xbf16>
    %93 = vector.extract_strided_slice %26 {offsets = [2, 0, 0], sizes = [1, 8, 256], strides = [1, 1, 1]} : vector<8x8x256xbf16> to vector<1x8x256xbf16>
    %94 = vector.shape_cast %93 : vector<1x8x256xbf16> to vector<8x256xbf16>
    %95 = vector.extract_strided_slice %26 {offsets = [6, 0, 0], sizes = [1, 8, 256], strides = [1, 1, 1]} : vector<8x8x256xbf16> to vector<1x8x256xbf16>
    %96 = vector.shape_cast %95 : vector<1x8x256xbf16> to vector<8x256xbf16>
    %97 = arith.extf %96 : vector<8x256xbf16> to vector<8x256xf32>
    %c0_32 = arith.constant 0 : index
    %c0_33 = arith.constant 0 : index
    %98 = vector.load %arg6[%c0_32, %c0_33] : memref<9x256xf32, #tpu.memory_space<vmem>>, vector<8x256xf32>
    tpu.vector_store %arg6[%c0_32, %c0_33], %97 {strides = array<i32>} : memref<9x256xf32, #tpu.memory_space<vmem>>, vector<8x256xf32>,
    %c0_34 = arith.constant 0 : index
    %c0_35 = arith.constant 0 : index
    %99 = vector.load %arg6[%c0_34, %c0_35] : memref<9x256xf32, #tpu.memory_space<vmem>>, vector<9x256xf32>
    %100 = arith.truncf %99 : vector<9x256xf32> to vector<9x256xbf16>
    %cst_36 = arith.constant 0.000000e+00 : f32
    %101 = vector.broadcast %cst_36 : f32 to vector<9x256xf32>
    %102 = vector.extract_strided_slice %94 {offsets = [0, 0], sizes = [8, 128], strides = [1, 1]} : vector<8x256xbf16> to vector<8x128xbf16>
    %103 = vector.extract_strided_slice %100 {offsets = [0, 0], sizes = [9, 128], strides = [1, 1]} : vector<9x256xbf16> to vector<9x128xbf16>
    %cst_37 = arith.constant dense<0.000000e+00> : vector<128x256xf32>
    %104 = tpu.matmul %102, %92, %cst_37 {dimension_numbers = #tpu.dot_dimension_numbers<[0], [0], [1], [1], [0, 1, 1, 1], [], []>} : vector<8x128xbf16>, vector<8x256xbf16>, vector<128x256xf32> -> vector<128x256xf32>
    %105 = arith.truncf %104 : vector<128x256xf32> to vector<128x256xbf16>
    %106 = math.exp %105 : vector<128x256xbf16>
    %cst_38 = arith.constant dense<0.000000e+00> : vector<9x256xf32>
    %107 = tpu.matmul %103, %106, %cst_38 {dimension_numbers = #tpu.dot_dimension_numbers<[1], [0], [0], [1], [0, 0, 1, 1], [], []>} : vector<9x128xbf16>, vector<128x256xbf16>, vector<9x256xf32> -> vector<9x256xf32>
    %108 = arith.addf %101, %107 : vector<9x256xf32>
    %109 = vector.extract_strided_slice %94 {offsets = [0, 128], sizes = [8, 128], strides = [1, 1]} : vector<8x256xbf16> to vector<8x128xbf16>
    %110 = vector.extract_strided_slice %100 {offsets = [0, 128], sizes = [9, 128], strides = [1, 1]} : vector<9x256xbf16> to vector<9x128xbf16>
    %cst_39 = arith.constant dense<0.000000e+00> : vector<128x256xf32>
    %111 = tpu.matmul %109, %92, %cst_39 {dimension_numbers = #tpu.dot_dimension_numbers<[0], [0], [1], [1], [0, 1, 1, 1], [], []>} : vector<8x128xbf16>, vector<8x256xbf16>, vector<128x256xf32> -> vector<128x256xf32>
    %112 = arith.truncf %111 : vector<128x256xf32> to vector<128x256xbf16>
    %113 = math.exp %112 : vector<128x256xbf16>
    %cst_40 = arith.constant dense<0.000000e+00> : vector<9x256xf32>
    %114 = tpu.matmul %110, %113, %cst_40 {dimension_numbers = #tpu.dot_dimension_numbers<[1], [0], [0], [1], [0, 0, 1, 1], [], []>} : vector<9x128xbf16>, vector<128x256xbf16>, vector<9x256xf32> -> vector<9x256xf32>
    %115 = arith.addf %108, %114 : vector<9x256xf32>
    %116 = vector.extract_strided_slice %115 {offsets = [8, 0], sizes = [1, 256], strides = [1, 1]} : vector<9x256xf32> to vector<1x256xf32>
    %117 = tpu.reciprocal %116 {approx = true} : vector<1x256xf32> -> vector<1x256xf32>
    %118 = vector.extract_strided_slice %115 {offsets = [0, 0], sizes = [8, 256], strides = [1, 1]} : vector<9x256xf32> to vector<8x256xf32>
    %119 = vector.broadcast %117 : vector<1x256xf32> to vector<8x256xf32>
    %120 = arith.mulf %118, %119 : vector<8x256xf32>
    %c16 = arith.constant 16 : index
    %c0_41 = arith.constant 0 : index
    %121 = vector.load %arg5[%c16, %c0_41] : memref<32x256xf32, #tpu.memory_space<vmem>>, vector<8x256xf32>
    tpu.vector_store %arg5[%c16, %c0_41], %120 {strides = array<i32>} : memref<32x256xf32, #tpu.memory_space<vmem>>, vector<8x256xf32>,
    %122 = vector.extract_strided_slice %21 {offsets = [3, 0, 0], sizes = [1, 8, 256], strides = [1, 1, 1]} : vector<4x8x256xbf16> to vector<1x8x256xbf16>
    %123 = vector.shape_cast %122 : vector<1x8x256xbf16> to vector<8x256xbf16>
    %124 = vector.extract_strided_slice %26 {offsets = [3, 0, 0], sizes = [1, 8, 256], strides = [1, 1, 1]} : vector<8x8x256xbf16> to vector<1x8x256xbf16>
    %125 = vector.shape_cast %124 : vector<1x8x256xbf16> to vector<8x256xbf16>
    %126 = vector.extract_strided_slice %26 {offsets = [7, 0, 0], sizes = [1, 8, 256], strides = [1, 1, 1]} : vector<8x8x256xbf16> to vector<1x8x256xbf16>
    %127 = vector.shape_cast %126 : vector<1x8x256xbf16> to vector<8x256xbf16>
    %128 = arith.extf %127 : vector<8x256xbf16> to vector<8x256xf32>
    %c0_42 = arith.constant 0 : index
    %c0_43 = arith.constant 0 : index
    %129 = vector.load %arg6[%c0_42, %c0_43] : memref<9x256xf32, #tpu.memory_space<vmem>>, vector<8x256xf32>
    tpu.vector_store %arg6[%c0_42, %c0_43], %128 {strides = array<i32>} : memref<9x256xf32, #tpu.memory_space<vmem>>, vector<8x256xf32>,
    %c0_44 = arith.constant 0 : index
    %c0_45 = arith.constant 0 : index
    %130 = vector.load %arg6[%c0_44, %c0_45] : memref<9x256xf32, #tpu.memory_space<vmem>>, vector<9x256xf32>
    %131 = arith.truncf %130 : vector<9x256xf32> to vector<9x256xbf16>
    %cst_46 = arith.constant 0.000000e+00 : f32
    %132 = vector.broadcast %cst_46 : f32 to vector<9x256xf32>
    %133 = vector.extract_strided_slice %125 {offsets = [0, 0], sizes = [8, 128], strides = [1, 1]} : vector<8x256xbf16> to vector<8x128xbf16>
    %134 = vector.extract_strided_slice %131 {offsets = [0, 0], sizes = [9, 128], strides = [1, 1]} : vector<9x256xbf16> to vector<9x128xbf16>
    %cst_47 = arith.constant dense<0.000000e+00> : vector<128x256xf32>
    %135 = tpu.matmul %133, %123, %cst_47 {dimension_numbers = #tpu.dot_dimension_numbers<[0], [0], [1], [1], [0, 1, 1, 1], [], []>} : vector<8x128xbf16>, vector<8x256xbf16>, vector<128x256xf32> -> vector<128x256xf32>
    %136 = arith.truncf %135 : vector<128x256xf32> to vector<128x256xbf16>
    %137 = math.exp %136 : vector<128x256xbf16>
    %cst_48 = arith.constant dense<0.000000e+00> : vector<9x256xf32>
    %138 = tpu.matmul %134, %137, %cst_48 {dimension_numbers = #tpu.dot_dimension_numbers<[1], [0], [0], [1], [0, 0, 1, 1], [], []>} : vector<9x128xbf16>, vector<128x256xbf16>, vector<9x256xf32> -> vector<9x256xf32>
    %139 = arith.addf %132, %138 : vector<9x256xf32>
    %140 = vector.extract_strided_slice %125 {offsets = [0, 128], sizes = [8, 128], strides = [1, 1]} : vector<8x256xbf16> to vector<8x128xbf16>
    %141 = vector.extract_strided_slice %131 {offsets = [0, 128], sizes = [9, 128], strides = [1, 1]} : vector<9x256xbf16> to vector<9x128xbf16>
    %cst_49 = arith.constant dense<0.000000e+00> : vector<128x256xf32>
    %142 = tpu.matmul %140, %123, %cst_49 {dimension_numbers = #tpu.dot_dimension_numbers<[0], [0], [1], [1], [0, 1, 1, 1], [], []>} : vector<8x128xbf16>, vector<8x256xbf16>, vector<128x256xf32> -> vector<128x256xf32>
    %143 = arith.truncf %142 : vector<128x256xf32> to vector<128x256xbf16>
    %144 = math.exp %143 : vector<128x256xbf16>
    %cst_50 = arith.constant dense<0.000000e+00> : vector<9x256xf32>
    %145 = tpu.matmul %141, %144, %cst_50 {dimension_numbers = #tpu.dot_dimension_numbers<[1], [0], [0], [1], [0, 0, 1, 1], [], []>} : vector<9x128xbf16>, vector<128x256xbf16>, vector<9x256xf32> -> vector<9x256xf32>
    %146 = arith.addf %139, %145 : vector<9x256xf32>
    %147 = vector.extract_strided_slice %146 {offsets = [8, 0], sizes = [1, 256], strides = [1, 1]} : vector<9x256xf32> to vector<1x256xf32>
    %148 = tpu.reciprocal %147 {approx = true} : vector<1x256xf32> -> vector<1x256xf32>
    %149 = vector.extract_strided_slice %146 {offsets = [0, 0], sizes = [8, 256], strides = [1, 1]} : vector<9x256xf32> to vector<8x256xf32>
    %150 = vector.broadcast %148 : vector<1x256xf32> to vector<8x256xf32>
    %151 = arith.mulf %149, %150 : vector<8x256xf32>
    %c24 = arith.constant 24 : index
    %c0_51 = arith.constant 0 : index
    %152 = vector.load %arg5[%c24, %c0_51] : memref<32x256xf32, #tpu.memory_space<vmem>>, vector<8x256xf32>
    tpu.vector_store %arg5[%c24, %c0_51], %151 {strides = array<i32>} : memref<32x256xf32, #tpu.memory_space<vmem>>, vector<8x256xf32>,
    %c0_52 = arith.constant 0 : index
    %c0_53 = arith.constant 0 : index
    %153 = vector.load %arg3[%c0_52, %c0_53] : memref<32x32xbf16, #tpu.memory_space<vmem>>, vector<32x32xbf16>
    %c0_54 = arith.constant 0 : index
    %c0_55 = arith.constant 0 : index
    %154 = vector.load %arg5[%c0_54, %c0_55] : memref<32x256xf32, #tpu.memory_space<vmem>>, vector<32x256xf32>
    %155 = arith.truncf %154 : vector<32x256xf32> to vector<32x256xbf16>
    %cst_56 = arith.constant dense<0.000000e+00> : vector<32x256xf32>
    %156 = tpu.matmul %153, %155, %cst_56 {dimension_numbers = #tpu.dot_dimension_numbers<[1], [0], [0], [1], [0, 0, 1, 1], [], []>} : vector<32x32xbf16>, vector<32x256xbf16>, vector<32x256xf32> -> vector<32x256xf32>
    %c0_57 = arith.constant 0 : index
    %c0_58 = arith.constant 0 : index
    %c0_59 = arith.constant 0 : index
    %157 = vector.load %arg1[%c0_57, %c0_58, %c0_59] : memref<1x32x256xf32, #tpu.memory_space<vmem>>, vector<1x32x256xf32>
    %158 = vector.shape_cast %157 : vector<1x32x256xf32> to vector<32x256xf32>
    %159 = arith.addf %158, %156 : vector<32x256xf32>
    %cst_60 = arith.constant 0.707106769 : f32
    %160 = vector.broadcast %cst_60 : f32 to vector<32x256xf32>
    %161 = arith.mulf %159, %160 : vector<32x256xf32>
    %c0_61 = arith.constant 0 : index
    %c0_62 = arith.constant 0 : index
    %c0_63 = arith.constant 0 : index
    %162 = vector.load %arg4[%c0_61, %c0_62, %c0_63] : memref<1x32x256xf32, #tpu.memory_space<vmem>>, vector<1x32x256xf32>
    %163 = vector.shape_cast %162 : vector<1x32x256xf32> to vector<32x256xf32>
    %164 = vector.shape_cast %161 : vector<32x256xf32> to vector<1x32x256xf32>
    tpu.vector_store %arg4[%c0_61, %c0_62, %c0_63], %164 {strides = array<i32>} : memref<1x32x256xf32, #tpu.memory_space<vmem>>, vector<1x32x256xf32>,
    return
  }
  func.func @transform_0(%arg0: i32) -> (i32, i32, i32) {
    %c0_i32 = arith.constant 0 : i32
    %c0_i32_0 = arith.constant 0 : i32
    %c0_i32_1 = arith.constant 0 : i32
    return %arg0, %c0_i32, %c0_i32_0 : i32, i32, i32
  }
  func.func @transform_1(%arg0: i32) -> (i32, i32) {
    %c0_i32 = arith.constant 0 : i32
    %c0_i32_0 = arith.constant 0 : i32
    %c0_i32_1 = arith.constant 0 : i32
    return %c0_i32, %c0_i32_0 : i32, i32
  }
  func.func @transform_2(%arg0: i32) -> (i32, i32) {
    %c0_i32 = arith.constant 0 : i32
    %c0_i32_0 = arith.constant 0 : i32
    %c0_i32_1 = arith.constant 0 : i32
    return %c0_i32, %c0_i32_0 : i32, i32
  }
  func.func @transform_3(%arg0: i32) -> (i32, i32, i32) {
    %c0_i32 = arith.constant 0 : i32
    %c0_i32_0 = arith.constant 0 : i32
    %c0_i32_1 = arith.constant 0 : i32
    return %arg0, %c0_i32, %c0_i32_0 : i32, i32, i32
  }
}

</mosaic_0001>

<bundles_post_ra>
// kernel: tpu_custom_call.1
= control target key start
LH: loop header
LB: loop body
LE: loop exit
PB: predicated region body
PF: predicated region fallthrough
CT: control target
= control target key end

     0   :  { %8 = vsyncpa [#allocation5], 0  ;;  %s4626_s0 = inlined_call_operand.hbm [shape: f32[2,32,256], index: 0, kind: input, shape index: {}]   ;;  %s4627_s1 = inlined_call_operand.vmem [shape: bf16[96,32], index: 1, kind: input, shape index: {}]   ;;  %s4628_s2 = inlined_call_operand.vmem [shape: bf16[32,32], index: 2, kind: input, shape index: {}]   ;;  %s4629_s3 = inlined_call_operand.hbm [shape: f32[2,32,256], index: 3, kind: output, shape index: {}]  }
   0x1   :  { %10 = vsyncpa [#allocation5 + $0x1], 0 }
   0x2   :  { %11 = vsyncpa [#allocation6], 0 }
   0x3   :  { %13 = vsyncpa [#allocation6 + $0x1], 0  ;;  %s3907_s12 = smov 0   ;;  %s3909_s13 = smov 0  }
   0x4   :  { %s3911_s14 = smov 0   ;;  %s3913_s15 = smov 0  }
   0x5 LB: > { %s3928_s16 = sadd.s32 4294967295, %s3877_s15   ;;  %s3233_s17 = sadd.s32 4294967294, %s3877_s15   ;;  %s3877_s15 = sphi %s3913_s15, %s4642_s15   ;;  %s3873_s14 = sphi %s3911_s14, %s4641_s14   ;;  %s3869_s13 = sphi %s3909_s13, %s4640_s13   ;;  %s3865_s12 = sphi %s3907_s12, %s4639_s12  }
   0x6   : > { %s3932_s18 = sadd.s32 1, %s3877_s15   ;;  %s26_s19 = sadd.s32 1, %s3873_s14 }
   0x7   : > { %s23_s20 = ssub.s32 %s3877_s15, %s3932_s18  ;;  %p33_p0 = scmp.ne.s32.totalorder %s3873_s14, %s3869_s13 }
   0x8   : > { %p24_p1 = scmp.eq.s32.totalorder %s23_s20, 0  ;;  %p34_p2 = scmp.eq.s32.totalorder %s3877_s15, 0 }
   0x9   : > { %p39_p3 = scmp.ne.s32.totalorder %s3869_s13, %s3865_s12  ;;  %p40_p4 = scmp.eq.s32.totalorder %s3928_s16, 0 }
   0xa   : > { %s3944_s21 = scalar_select %p24_p1, %s3873_s14, %s26_s19  }
   0xb   : > { %p3946_p5 = por %p34_p2, %p33_p0  ;;  %p3950_p6 = por %p40_p4, %p39_p3 }
   0xc   : > { %p105_p7 = scmp.eq.s32.totalorder %s3928_s16, 1  ;;  %p111_p8 = scmp.eq.s32.totalorder %s3233_s17, 1 }
   0xd   : > { %p3365_p10 = scmp.lt.s32.totalorder %s3877_s15, 2  ;;  %s137_s26 = sand.u32 1, %s3873_s14  }
   0xe   : > { %p3957_p11 = por %p105_p7, %p33_p0  ;;  %p3961_p12 = por %p111_p8, %p39_p3 }
   0xf   : > { %s3335_s27 = sshll.u32 %s3877_s15, 10  ;;  %s3236_s28 = sshll.u32 %s137_s26, 6 }
  0x10   : > { %s4633_s24 = scalar_select %p3957_p11, 1, 0 }
  0x11   : > { %s4634_s25 = scalar_select %p3961_p12, 1, 0 }
  0x12   : > { %s3970_s4 = scalar_lea.hbm %s4626_s0, %s3335_s27  ;;  %s141_s5 = scalar_lea.vmem [#allocation4], %s3236_s28 }
  0x13   : > { %s148_s6 = sshll.u32 %s141_s5, 4  ;;  %p3974_p13 = pnand %p3365_p10, %p3946_p5  ;;  %s3978_s6 = int_to_ptr.vmem [resolvable:$true] %s148_s6 }
  0x14   : > { %s3980_s8 = scalar_lea.sflag [#allocation5], %s137_s26  ;;  %s3781_s9 = scalar_lea.hbm %s3970_s4, 1024 }
  0x15   : > { %p3782_p0 = scmp.ne.s32.totalorder %s3970_s4, %s3781_s9  ;;  %p3783_p1 = pneg %p3974_p13 }
  0x16   : > { %s3786_s17 = scalar_lea.hbm %s4626_s0, 2048  ;;  %p3787_p4 = scmp.lt.u32.totalorder %s3970_s4, %s4626_s0 }
  0x17   : > { %p3784_p2 = pnand %p3783_p1, %p3782_p0  ;;  %p3788_p5 = scmp.lt.u32.totalorder %s3786_s17, %s3781_s9 }
  0x18   : > { %p3790_p8 = scmp.lt.u32.totalorder %s3781_s9, %s3970_s4 }
  0x19   : > { %p3785_p3 = pneg %p3784_p2  ;;  %p3789_p7 = por %p3788_p5, %p3787_p4 }
  0x1b   : > { %p3791_p10 = por %p3790_p8, %p3789_p7 }
  0x1d   : > { %p3792_p9 = pnand %p3791_p10, %p3785_p3 }
  0x1f   : > { %3795 = shalt.err (!%p3792_p9)
}
  0x20   : > { %s3796_s22 = scalar_lea.vmem %s3978_s6, 1024  ;;  %s3879_s26 = smov [#allocation4]  }
  0x21   : > { %p3797_p0 = scmp.ne.s32.totalorder %s3978_s6, %s3796_s22  ;;  %s3801_s27 = sshll.u32 %s3879_s26, 4  ;;  %s3802_s27 = int_to_ptr.vmem [resolvable:$false] %s3801_s27 }
  0x22   : > { %s3803_s28 = scalar_lea.vmem %s3802_s27, 2048  ;;  %p3804_p11 = scmp.lt.s32.totalorder %s3978_s6, %s3802_s27 }
  0x23   : > { %p3799_p2 = pnand %p3797_p0, %p3783_p1  ;;  %p3805_p4 = scmp.lt.s32.totalorder %s3803_s28, %s3796_s22 }
  0x25   : > { %p3800_p12 = pneg %p3799_p2  ;;  %p3806_p5 = por %p3805_p4, %p3804_p11 }
  0x27   : > { %p3807_p7 = pnand %p3806_p5, %p3800_p12 }
  0x29   : > { %3810 = shalt.err (!%p3807_p7)
}
  0x2a   : > { %s3880_s29 = smov 256   ;;  %s3881_s30 = smov 16  }
  0x2b   : > { %3360 = dma.hbm_to_vmem [thread:$0]  (!%p3974_p13), %s3970_s4, 1024, %s3978_s6, %s3980_s8, %s3880_s29, %s3880_s29, %s3881_s30  }
  0x2c   : > { %p3239_p9 = scmp.ge.s32.totalorder %s3877_s15, 1  ;;  %p156_p1 = scmp.lt.s32.totalorder %s3877_s15, 3 }
  0x2e   : > { %p157_p3 = pnand %p3239_p9, %p156_p1 }
  0x2f   : > { %s4011_s5 = sand.u32 (!%p157_p3), 1, %s3869_s13  }
  0x30   : > { %160 = sbr.rel (%p157_p3) target bundleno = 2152 (0x868), region = 32  ;;  %s3240_s9 = sshll.u32 (!%p157_p3), %s4011_s5, 6 }
  0x31   : > { %s163_s10 = scalar_lea.sflag (!%p157_p3), [#allocation5], %s4011_s5  ;;  %s4017_s11 = scalar_lea.vmem (!%p157_p3), [#allocation4], %s3240_s9 }
  0x37   : > { %3856 = dma.done.wait (%p3950_p6), %s163_s10, 1024  }
  0x38   : > { %3858 = vsyncadd (%p3950_p6), %s163_s10, 4294966272  ;;  %v3882_v0 = vmov 0   ;;  %v191_v1 = vld [vmem:[%s4017_s11 + $0x8] sm:$0xff]  ;;  %v193_v2 = vld [vmem:[%s4017_s11 + $0x18] sm:$0xff]  ;;  %vm244_vm0 = vcmask 261120   ;;  %vm878_vm5 = vcmask 1043456  }
  0x39   : > { %295 = vmatprep.mubr.bf16.mxu0 %v3882_v0  ;;  %917 = vmatprep.mubr.bf16.mxu1 %v3882_v0  ;;  %v190_v3 = vld [vmem:[%s4017_s11] sm:$0xff]  ;;  %v199_v4 = vpack.c.bf16 %v193_v2, %v191_v1  ;;  %v192_v5 = vld [vmem:[%s4017_s11 + $0x10] sm:$0xff]  ;;  %v195_v6 = vld [vmem:[%s4017_s11 + $0x28] sm:$0xff]  ;;  %vm853_vm14 = vcmask 64512   ;;  %s188_s4 = scalar_lea.vmem [#allocation7], %s3240_s9  ;;  %s3336_s7 = sshll.u32 %s3928_s16, 10 }
  0x3a   : > { %v197_v7 = vld [vmem:[%s4017_s11 + $0x38] sm:$0xff]  ;;  %v198_v8 = vpack.c.bf16 %v192_v5, %v190_v3  ;;  %v194_v10 = vld [vmem:[%s4017_s11 + $0x20] sm:$0xff]  ;;  %v196_v11 = vld [vmem:[%s4017_s11 + $0x30] sm:$0xff]  ;;  %s3160_s6 = sshll.u32 %s188_s4, 4  ;;  %s3147_s16 = scalar_lea.sflag [#allocation6], %s4011_s5  ;;  %s4577_s6 = int_to_ptr.vmem [resolvable:$true] %s3160_s6 }
  0x3b   : > { %v201_v9 = vpack.c.bf16 %v197_v7, %v195_v6  ;;  %263 = vmatprep.subr.bf16.mxu0 %v199_v4  ;;  %v200_v12 = vpack.c.bf16 %v196_v11, %v194_v10  ;;  %v3405_v13 = vld [vmem:[%s4627_s1] sm:$0xff]   ;;  %v3406_v14 = vld [vmem:[%s4627_s1 + $0x8] sm:$0xff]   ;;  %v3407_v15 = vld [vmem:[%s4627_s1 + $0x10] sm:$0xff]   ;;  %s3811_s17 = scalar_lea.vmem %s4577_s6, 1024  ;;  %p4636_p11 = scmp.ne.s32.totalorder %s4633_s24, 0 }
  0x3c   : > { %264 = vmatpush1.bf16.msra.mxu0 %v198_v8  ;;  %v3408_v16 = vld [vmem:[%s4627_s1 + $0x18] sm:$0xff]   ;;  %v3409_v17 = vld [vmem:[%s4627_s1 + $0x20] sm:$0xff]   ;;  %v3410_v18 = vld [vmem:[%s4627_s1 + $0x28] sm:$0xff]   ;;  %p3812_p6 = scmp.ne.s32.totalorder %s4577_s6, %s3811_s17  ;;  %s3884_s19 = smov [#allocation7]  }
  0x3d   : > { %265 = vmatprep.subr.bf16.mxu0 %v201_v9  ;;  %s3815_s20 = sshll.u32 %s3884_s19, 4  ;;  %s3816_s20 = int_to_ptr.vmem [resolvable:$false] %s3815_s20 }
  0x3e   : > { %p3813_p12 = pnand %p3812_p6, %p4636_p11  ;;  %s3817_s22 = scalar_lea.vmem %s3816_s20, 2048 }
  0x3f   : > { %p3818_p8 = scmp.lt.s32.totalorder %s4577_s6, %s3816_s20  ;;  %p3819_p10 = scmp.lt.s32.totalorder %s3817_s22, %s3811_s17 }
  0x40   : > { %266 = vmatpush1.bf16.msra.mxu0 %v200_v12  ;;  %p3814_p13 = pneg %p3813_p12 }
  0x41   : > { %p3820_p0 = por %p3819_p10, %p3818_p8 }
  0x43   : > { %3248 = vmatmul.mubr.msk.bf16.vlgmr.msra.gmra.mrb[0].mxu0 %vm244_vm0, %v3405_v13  ;;  %p3821_p2 = pnand %p3820_p0, %p3814_p13 }
  0x44   : > { %305 = vmatprep.mubr.bf16.mxu0 %v3882_v0 }
  0x4b   : > { %3249 = vmatmul.mubr.msk.bf16.gmra.mrb[4].mxu0 %vm244_vm0, %v3406_v14 }
  0x4c   : > { %315 = vmatprep.mubr.bf16.mxu0 %v3882_v0 }
  0x53   : > { %3250 = vmatmul.mubr.msk.bf16.gmra.mrb[8].mxu0 %vm244_vm0, %v3407_v15 }
  0x54   : > { %325 = vmatprep.mubr.bf16.mxu0 %v3882_v0 }
  0x5b   : > { %3251 = vmatmul.mubr.msk.bf16.gmra.mrb[12].mxu0 %vm244_vm0, %v3408_v16 }
  0x5c   : > { %335 = vmatprep.mubr.bf16.mxu0 %v3882_v0 }
  0x63   : > { %3252 = vmatmul.mubr.msk.bf16.gmra.mrb[16].mxu0 %vm244_vm0, %v3409_v17 }
  0x64   : > { %345 = vmatprep.mubr.bf16.mxu0 %v3882_v0 }
  0x6b   : > { %3253 = vmatmul.mubr.msk.bf16.gmra.mrb[20].mxu0 %vm244_vm0, %v3410_v18 }
  0x6c   : > { %1134 = vmatprep.mubr.bf16.mxu0 %v3882_v0 }
 0x116   : > { %v4063_v19 = vpop.f32.mrb[0].mxu0 }
 0x117   : > { %v356_v20 = vmul.f32 %v4063_v19, %v4063_v19  ;;  %v4067_v21 = vpop.f32.mrb[1].mxu0 }
 0x118   : > { %v357_v22 = vmul.f32 %v4067_v21, %v4067_v21  ;;  %v4071_v23 = vpop.f32.mrb[2].mxu0 }
 0x119   : > { %v380_v24 = vrot.slane %v356_v20, 4  ;;  %v4073_v25 = vpop.f32.mrb[3].mxu0 }
 0x11a   : > { %v386_v26 = vrot.slane %v357_v22, 4 }
 0x11b   : > { %v381_v27 = vadd.f32 %v380_v24, %v356_v20 }
 0x11c   : > { %v387_v28 = vadd.f32 %v386_v26, %v357_v22 }
 0x11d   : > { %v382_v29 = vrot.slane %v381_v27, 2 }
 0x11e   : > { %v388_v30 = vrot.slane %v387_v28, 2  ;;  %v4075_v31 = vpop.f32.mrb[4].mxu0 }
 0x11f   : > { %v383_v32 = vadd.f32 %v382_v29, %v381_v27  ;;  %v4077_v33 = vpop.f32.mrb[5].mxu0 }
 0x120   : > { %v389_v34 = vadd.f32 %v388_v30, %v387_v28  ;;  %v4079_v35 = vpop.f32.mrb[6].mxu0 }
 0x121   : > { %v384_v36 = vrot.slane %v383_v32, 1  ;;  %v4081_v37 = vpop.f32.mrb[7].mxu0 }
 0x122   : > { %v390_v38 = vrot.slane %v389_v34, 1 }
 0x123   : > { %v385_v39 = vadd.f32 %v384_v36, %v383_v32 }
 0x124   : > { %v391_v40 = vadd.f32 %v390_v38, %v389_v34 }
 0x125   : > { %3413 = vrsqrt.f32 %v385_v39  ;;  %vm526_vm1 = vcmp.eq.f32.partialorder %v385_v39, inf  ;;  %vm528_vm2 = vcmp.eq.f32.partialorder %v385_v39, 0.0  ;;  %v529_v50 = vand.u32 2147483648, %v385_v39 }
 0x126   : > { %3415 = vrsqrt.f32 %v391_v40  ;;  %v4083_v41 = vpop.f32.mrb[8].mxu0  ;;  %vm533_vm3 = vcmp.eq.f32.partialorder %v391_v40, inf  ;;  %v536_v53 = vand.u32 2147483648, %v391_v40  ;;  %vm535_vm4 = vcmp.eq.f32.partialorder %v391_v40, 0.0 }
 0x127   : > { %v4085_v42 = vpop.f32.mrb[9].mxu0  ;;  %v364_v54 = vmul.f32 %v4083_v41, %v4083_v41 }
 0x128   : > { %v4087_v43 = vpop.f32.mrb[10].mxu0  ;;  %v365_v45 = vmul.f32 %v4085_v42, %v4085_v42 }
 0x129   : > { %v4089_v44 = vpop.f32.mrb[11].mxu0  ;;  %v428_v63 = vrot.slane %v364_v54, 4  ;;  %v366_v8 = vmul.f32 %v4087_v43, %v4087_v43 }
 0x12a   : > { %v434_v47 = vrot.slane %v365_v45, 4  ;;  %v367_v60 = vmul.f32 %v4089_v44, %v4089_v44 }
 0x12b   : > { %v429_v4 = vadd.f32 %v428_v63, %v364_v54  ;;  %v440_v12 = vrot.slane %v366_v8, 4 }
 0x12c   : > { %v435_v57 = vadd.f32 %v434_v47, %v365_v45  ;;  %v446_v3 = vrot.slane %v367_v60, 4 }
 0x12d   : > { %v430_v9 = vrot.slane %v429_v4, 2  ;;  %v441_v22 = vadd.f32 %v440_v12, %v366_v8 }
 0x12e   : > { %v436_v2 = vrot.slane %v435_v57, 2  ;;  %v447_v6 = vadd.f32 %v446_v3, %v367_v60 }
 0x12f   : > { %v3414_v46 = vpop.eup %3413  ;;  %v431_v14 = vadd.f32 %v430_v9, %v429_v4  ;;  %v442_v30 = vrot.slane %v441_v22, 2 }
 0x130   : > { %v3416_v48 = vpop.eup %3415  ;;  %v525_v49 = vmul.f32 %v3414_v46, %v385_v39  ;;  %v437_v5 = vadd.f32 %v436_v2, %v435_v57  ;;  %v448_v11 = vrot.slane %v447_v6, 2 }
 0x131   : > { %v532_v51 = vmul.f32 %v3416_v48, %v391_v40  ;;  %v432_v26 = vrot.slane %v431_v14, 1 }
 0x132   : > { %v527_v52 = vsel %vm526_vm1, %v385_v39, %v525_v49  ;;  %v438_v7 = vrot.slane %v437_v5, 1  ;;  %v449_v18 = vadd.f32 %v448_v11, %v447_v6 }
 0x133   : > { %v530_v55 = vsel %vm528_vm2, %v529_v50, %v527_v52  ;;  %v534_v56 = vsel %vm533_vm3, %v391_v40, %v532_v51  ;;  %v433_v32 = vadd.f32 %v432_v26, %v431_v14 }
 0x134   : > { %v692_v58 = vmul.f32 0.35355338, %v530_v55  ;;  %v537_v59 = vsel %vm535_vm4, %v536_v53, %v534_v56  ;;  %v439_v10 = vadd.f32 %v438_v7, %v437_v5  ;;  %v450_v28 = vrot.slane %v449_v18, 1 }
 0x135   : > { %v693_v61 = vmul.f32 0.35355338, %v537_v59  ;;  %vm582_vm10 = vcmp.eq.f32.partialorder %v433_v32, inf  ;;  %vm584_vm11 = vcmp.eq.f32.partialorder %v433_v32, 0.0 }
 0x136   : > { %v716_v62 = vadd.f32 0.0001, %v692_v58  ;;  %v451_v34 = vadd.f32 %v450_v28, %v449_v18  ;;  %vm589_vm6 = vcmp.eq.f32.partialorder %v439_v10, inf  ;;  %v592_v39 = vand.u32 2147483648, %v439_v10 }
 0x137   : > { %v717_v1 = vadd.f32 0.0001, %v693_v61  ;;  %vm591_vm7 = vcmp.eq.f32.partialorder %v439_v10, 0.0 }
 0x138   : > { %3417 = vrcp.f32 %v716_v62  ;;  %vm603_vm8 = vcmp.eq.f32.partialorder %v451_v34, inf  ;;  %v606_v53 = vand.u32 2147483648, %v451_v34  ;;  %vm605_vm9 = vcmp.eq.f32.partialorder %v451_v34, 0.0 }
 0x139   : > { %3419 = vrcp.f32 %v717_v1  ;;  %v585_v62 = vand.u32 2147483648, %v433_v32 }
 0x13a   : > { %3421 = vrsqrt.f32 %v439_v10 }
 0x13b   : > { %3423 = vrsqrt.f32 %v451_v34 }
 0x13c   : > { %3425 = vrsqrt.f32 %v433_v32 }
 0x142   : > { %v3418_v13 = vpop.eup %3417 }
 0x143   : > { %v3420_v15 = vpop.eup %3419  ;;  %v764_v16 = vmul.f32 0.35355338, %v3418_v13 }
 0x144   : > { %v765_v17 = vmul.f32 0.35355338, %v3420_v15  ;;  %v3422_v38 = vpop.eup %3421 }
 0x145   : > { %v772_v20 = vmul.f32 %v764_v16, %v4063_v19  ;;  %v588_v19 = vmul.f32 %v3422_v38, %v439_v10  ;;  %v3424_v50 = vpop.eup %3423 }
 0x146   : > { %v773_v24 = vmul.f32 %v765_v17, %v4067_v21  ;;  %v443_v21 = vadd.f32 %v442_v30, %v441_v22  ;;  %v602_v51 = vmul.f32 %v3424_v50, %v451_v34  ;;  %v3426_v52 = vpop.eup %3425 }
 0x147   : > { %v780_v27 = vpack.c.bf16 %v772_v20, %v772_v20  ;;  %v590_v40 = vsel %vm589_vm6, %v439_v10, %v588_v19  ;;  %v581_v56 = vmul.f32 %v3426_v52, %v433_v32 }
 0x148   : > { %v781_v29 = vpack.c.bf16 %v773_v24, %v773_v24  ;;  %v593_v45 = vsel %vm591_vm7, %v592_v39, %v590_v40  ;;  %v444_v47 = vrot.slane %v443_v21, 1  ;;  %v604_v54 = vsel %vm603_vm8, %v451_v34, %v602_v51 }
 0x149   : > { %v880_v36 = vsel %vm878_vm5, %v780_v27, 0  ;;  %v701_v46 = vmul.f32 0.35355338, %v593_v45  ;;  %v607_v55 = vsel %vm605_vm9, %v606_v53, %v604_v54  ;;  %v583_v60 = vsel %vm582_vm10, %v433_v32, %v581_v56 }
 0x14a   : > { %3254 = vmatprep.subr.msk.bf16.mxu1 %vm878_vm5, %v781_v29  ;;  %3263 = vmatprep.subr.msk.bf16.mxu0 %vm878_vm5, %v781_v29  ;;  %v445_v49 = vadd.f32 %v444_v47, %v443_v21  ;;  %v703_v57 = vmul.f32 0.35355338, %v607_v55  ;;  %v586_v1 = vsel %vm584_vm11, %v585_v62, %v583_v60 }
 0x14b   : > { %886 = vmatpush1.bf16.msra.mxu1 %v880_v36  ;;  %1103 = vmatpush1.bf16.msra.mxu0 %v880_v36  ;;  %v725_v48 = vadd.f32 0.0001, %v701_v46  ;;  %v700_v3 = vmul.f32 0.35355338, %v586_v1 }
 0x14c   : > { %v727_v58 = vadd.f32 0.0001, %v703_v57  ;;  %vm596_vm12 = vcmp.eq.f32.partialorder %v445_v49, inf  ;;  %v599_v9 = vand.u32 2147483648, %v445_v49  ;;  %vm598_vm13 = vcmp.eq.f32.partialorder %v445_v49, 0.0 }
 0x14d   : > { %3427 = vrcp.f32 %v725_v48  ;;  %v724_v6 = vadd.f32 0.0001, %v700_v3 }
 0x14e   : > { %3429 = vrsqrt.f32 %v445_v49 }
 0x14f   : > { %3431 = vrcp.f32 %v727_v58 }
 0x150   : > { %3433 = vrcp.f32 %v724_v6 }
 0x157   : > { %v3428_v59 = vpop.eup %3427 }
 0x158   : > { %v789_v61 = vmul.f32 %v3428_v59, %v4085_v42  ;;  %v3430_v2 = vpop.eup %3429 }
 0x159   : > { %v595_v4 = vmul.f32 %v3430_v2, %v445_v49  ;;  %v3432_v5 = vpop.eup %3431 }
 0x15a   : > { %v805_v63 = vpack.c.bf16 %v789_v61, %v789_v61  ;;  %v791_v8 = vmul.f32 %v3432_v5, %v4089_v44  ;;  %v3434_v13 = vpop.eup %3433  ;;  %v4108_v44 = vpop.f32.mrb[12].mxu0 }
 0x15b   : > { %v597_v7 = vsel %vm596_vm12, %v445_v49, %v595_v4  ;;  %v788_v14 = vmul.f32 %v3434_v13, %v4083_v41  ;;  %v368_v20 = vmul.f32 %v4108_v44, %v4108_v44  ;;  %v4112_v22 = vpop.f32.mrb[13].mxu0 }
 0x15c   : > { %1062 = vxpose.xlu0.c.b16.start.end [1/1] (short) %v805_v63, 128  ;;  %v807_v10 = vpack.c.bf16 %v791_v8, %v791_v8  ;;  %v600_v42 = vsel %vm598_vm13, %v599_v9, %v597_v7  ;;  %v369_v24 = vmul.f32 %v4112_v22, %v4112_v22  ;;  %v4116_v26 = vpop.f32.mrb[14].mxu0 }
 0x15d   : > { %v702_v11 = vmul.f32 0.35355338, %v600_v42  ;;  %v804_v15 = vpack.c.bf16 %v788_v14, %v788_v14  ;;  %v452_v41 = vrot.slane %v368_v20, 4  ;;  %v4118_v27 = vpop.f32.mrb[15].mxu0  ;;  %v370_v29 = vmul.f32 %v4116_v26, %v4116_v26 }
 0x15e   : > { %1612 = vxpose.xlu1.c.b16.start.end [1/1] (short) %v807_v10, 128  ;;  %v458_v28 = vrot.slane %v369_v24, 4  ;;  %v371_v30 = vmul.f32 %v4118_v27, %v4118_v27  ;;  %v4126_v19 = vpop.f32.mrb[16].mxu0 }
 0x15f   : > { %v726_v12 = vadd.f32 0.0001, %v702_v11  ;;  %v464_v39 = vrot.slane %v370_v29, 4  ;;  %v4128_v45 = vpop.f32.mrb[17].mxu0 }
 0x160   : > { %v459_v34 = vadd.f32 %v458_v28, %v369_v24  ;;  %v470_v40 = vrot.slane %v371_v30, 4  ;;  %v4130_v48 = vpop.f32.mrb[18].mxu0 }
 0x161   : > { %3435 = vrcp.f32 %v726_v12  ;;  %v4132_v50 = vpop.f32.mrb[19].mxu0  ;;  %v465_v53 = vadd.f32 %v464_v39, %v370_v29 }
 0x162   : > { %v460_v38 = vrot.slane %v459_v34, 2  ;;  %v471_v54 = vadd.f32 %v470_v40, %v371_v30  ;;  %v4138_v12 = vpop.f32.mrb[20].mxu0 }
 0x163   : > { %v466_v57 = vrot.slane %v465_v53, 2 }
 0x164   : > { %v461_v47 = vadd.f32 %v460_v38, %v459_v34  ;;  %v472_v58 = vrot.slane %v471_v54, 2 }
 0x165   : > { %v467_v60 = vadd.f32 %v466_v57, %v465_v53 }
 0x166   : > { %v462_v51 = vrot.slane %v461_v47, 1  ;;  %v473_v61 = vadd.f32 %v472_v58, %v471_v54 }
 0x167   : > { %v468_v2 = vrot.slane %v467_v60, 1 }
 0x168   : > { %v463_v56 = vadd.f32 %v462_v51, %v461_v47  ;;  %v474_v3 = vrot.slane %v473_v61, 1 }
 0x169   : > { %v469_v11 = vadd.f32 %v468_v2, %v467_v60 }
 0x16a   : > { %vm617_vm2 = vcmp.eq.f32.partialorder %v463_v56, inf  ;;  %v620_v7 = vand.u32 2147483648, %v463_v56  ;;  %vm619_vm3 = vcmp.eq.f32.partialorder %v463_v56, 0.0 }
 0x16b   : > { %v3436_v16 = vpop.eup %3435  ;;  %vm624_vm4 = vcmp.eq.f32.partialorder %v469_v11, inf  ;;  %vm626_vm7 = vcmp.eq.f32.partialorder %v469_v11, 0.0  ;;  %v627_v57 = vand.u32 2147483648, %v469_v11 }
 0x16c   : > { %v790_v17 = vmul.f32 %v3436_v16, %v4087_v43  ;;  %v453_v43 = vadd.f32 %v452_v41, %v368_v20  ;;  %v475_v16 = vadd.f32 %v474_v3, %v473_v61 }
 0x16e   : > { %v806_v18 = vpack.c.bf16 %v790_v17, %v790_v17  ;;  %v454_v36 = vrot.slane %v453_v43, 2  ;;  %v4142_v17 = vpop.f32.mrb[21].mxu0  ;;  %vm631_vm6 = vcmp.eq.f32.partialorder %v475_v16, inf  ;;  %vm633_vm8 = vcmp.eq.f32.partialorder %v475_v16, 0.0 }
 0x16f   : > { %v4145_v20 = vpop.f32.mrb[22].mxu0 }
 0x170   : > { %v455_v21 = vadd.f32 %v454_v36, %v453_v43  ;;  %v4148_v41 = vpop.f32.mrb[23].mxu0  ;;  %v378_v29 = vmul.f32 %v4145_v20, %v4145_v20 }
 0x171   : > { %v379_v30 = vmul.f32 %v4148_v41, %v4148_v41 }
 0x172   : > { %v456_v49 = vrot.slane %v455_v21, 1  ;;  %v512_v34 = vrot.slane %v378_v29, 4 }
 0x173   : > { %v518_v36 = vrot.slane %v379_v30, 4 }
 0x174   : > { %v457_v52 = vadd.f32 %v456_v49, %v455_v21  ;;  %v513_v38 = vadd.f32 %v512_v34, %v378_v29 }
 0x175   : > { %v519_v21 = vadd.f32 %v518_v36, %v379_v30 }
 0x176   : > { %3437 = vrsqrt.f32 %v457_v52  ;;  %vm610_vm15 = vcmp.eq.f32.partialorder %v457_v52, inf  ;;  %v613_v1 = vand.u32 2147483648, %v457_v52  ;;  %vm612_vm1 = vcmp.eq.f32.partialorder %v457_v52, 0.0 }
 0x177   : > { %3439 = vrsqrt.f32 %v463_v56  ;;  %v520_v53 = vrot.slane %v519_v21, 2 }
 0x178   : > { %3441 = vrsqrt.f32 %v469_v11 }
 0x179   : > { %837 = vxpose.xlu0.c.b16.start.end [1/1] (short) %v804_v15, 128  ;;  %3443 = vrsqrt.f32 %v475_v16  ;;  %v521_v61 = vadd.f32 %v520_v53, %v519_v21 }
 0x17b   : > { %1389 = vxpose.xlu1.c.b16.start.end [1/1] (short) %v806_v18, 128  ;;  %v522_v2 = vrot.slane %v521_v61, 1 }
 0x180   : > { %v3438_v63 = vpop.eup %3437 }
 0x181   : > { %v3440_v4 = vpop.eup %3439  ;;  %v609_v6 = vmul.f32 %v3438_v63, %v457_v52 }
 0x182   : > { %v616_v8 = vmul.f32 %v3440_v4, %v463_v56  ;;  %v3442_v39 = vpop.eup %3441 }
 0x183   : > { %v611_v9 = vsel %vm610_vm15, %v457_v52, %v609_v6  ;;  %v3444_v40 = vpop.eup %3443  ;;  %v623_v51 = vmul.f32 %v3442_v39, %v469_v11  ;;  %v514_v52 = vrot.slane %v513_v38, 2 }
 0x184   : > { %v614_v10 = vsel %vm612_vm1, %v613_v1, %v611_v9  ;;  %v618_v42 = vsel %vm617_vm2, %v463_v56, %v616_v8  ;;  %v630_v54 = vmul.f32 %v3444_v40, %v475_v16  ;;  %v523_v8 = vadd.f32 %v522_v2, %v521_v61 }
 0x185   : > { %v704_v14 = vmul.f32 0.35355338, %v614_v10  ;;  %v621_v15 = vsel %vm619_vm3, %v620_v7, %v618_v42  ;;  %v625_v58 = vsel %vm624_vm4, %v469_v11, %v623_v51  ;;  %v515_v60 = vadd.f32 %v514_v52, %v513_v38 }
 0x186   : > { %v705_v18 = vmul.f32 0.35355338, %v621_v15  ;;  %v628_v3 = vsel %vm626_vm7, %v627_v57, %v625_v58  ;;  %vm687_vm11 = vcmp.eq.f32.partialorder %v523_v8, inf  ;;  %vm689_vm12 = vcmp.eq.f32.partialorder %v523_v8, 0.0 }
 0x187   : > { %v728_v24 = vadd.f32 0.0001, %v704_v14  ;;  %v516_v1 = vrot.slane %v515_v60, 1 }
 0x188   : > { %v729_v28 = vadd.f32 0.0001, %v705_v18 }
 0x189   : > { %3445 = vrcp.f32 %v728_v24  ;;  %v517_v7 = vadd.f32 %v516_v1, %v515_v60 }
 0x18a   : > { %3447 = vrcp.f32 %v729_v28 }
 0x18b   : > { %3449 = vrsqrt.f32 %v517_v7  ;;  %vm680_vm9 = vcmp.eq.f32.partialorder %v517_v7, inf  ;;  %vm682_vm10 = vcmp.eq.f32.partialorder %v517_v7, 0.0 }
 0x18c   : > { %3451 = vrsqrt.f32 %v523_v8 }
 0x193   : > { %v3446_v47 = vpop.eup %3445 }
 0x194   : > { %v3448_v49 = vpop.eup %3447 }
 0x195   : > { %v793_v56 = vmul.f32 %v3448_v49, %v4112_v22  ;;  %v3450_v11 = vpop.eup %3449  ;;  %v820_v49 = vlaneseq }
 0x196   : > { %v3452_v14 = vpop.eup %3451  ;;  %v679_v15 = vmul.f32 %v3450_v11, %v517_v7 }
 0x197   : > { %v686_v24 = vmul.f32 %v3452_v14, %v523_v8  ;;  %vm822_vm13 = vcmp.lt.s32.totalorder %v820_v49, 256 }
 0x198   : > { %v681_v28 = vsel %vm680_vm9, %v517_v7, %v679_v15 }
 0x1c2   : > { %v1070_v32 = vpop.trf.xlu0 }
 0x1c3   : > { %3264 = vmatmul.mubr.msk.bf16.vlgmr.msra.gmra.mrb[24].mxu0 %vm853_vm14, %v1070_v32 }
 0x1c4   : > { %1144 = vmatprep.mubr.bf16.mxu0 %v3882_v0 }
 0x1c6   : > { %v1071_v46 = vpop.trf.xlu0 }
 0x1ca   : > { %v1072_v55 = vpop.trf.xlu0 }
 0x1cb   : > { %3265 = vmatmul.mubr.msk.bf16.gmra.mrb[28].mxu0 %vm853_vm14, %v1071_v46 }
 0x1cc   : > { %1154 = vmatprep.mubr.bf16.mxu0 %v3882_v0 }
 0x1ce   : > { %v1073_v59 = vpop.trf.xlu0 }
 0x1d2   : > { %v1074_v62 = vpop.trf.xlu0 }
 0x1d3   : > { %3266 = vmatmul.mubr.msk.bf16.gmra.mrb[32].mxu0 %vm853_vm14, %v1072_v55  ;;  %v792_v55 = vmul.f32 %v3446_v47, %v4108_v44  ;;  %v706_v44 = vmul.f32 0.35355338, %v628_v3 }
 0x1d4   : > { %1164 = vmatprep.mubr.bf16.mxu0 %v3882_v0 }
 0x1d5   : > { %v808_v4 = vpack.c.bf16 %v792_v55, %v792_v55  ;;  %v730_v10 = vadd.f32 0.0001, %v706_v44 }
 0x1d6   : > { %v1075_v5 = vpop.trf.xlu0 }
 0x1d7   : > { %1939 = vxpose.xlu0.c.b16.start.end [1/1] (short) %v808_v4, 128  ;;  %3453 = vrcp.f32 %v730_v10 }
 0x1da   : > { %v4140_v13 = vpop.trf.xlu0 }
 0x1db   : > { %3267 = vmatmul.mubr.msk.bf16.gmra.mrb[36].mxu0 %vm853_vm14, %v1073_v59  ;;  %v634_v59 = vand.u32 2147483648, %v475_v16 }
 0x1dc   : > { %1174 = vmatprep.mubr.bf16.mxu0 %v3882_v0 }
 0x1de   : > { %v4150_v43 = vpop.trf.xlu0 }
 0x1e1   : > { %v3454_v38 = vpop.eup %3453 }
 0x1e2   : > { %v845_v32 = vpop.trf.xlu0 }
 0x1e3   : > { %3255 = vmatmul.mubr.msk.bf16.vlgmr.msra.gmra.mrb[0].mxu1 %vm853_vm14, %v845_v32  ;;  %3268 = vmatmul.mubr.msk.bf16.gmra.mrb[40].mxu0 %vm853_vm14, %v1074_v62  ;;  %v632_v62 = vsel %vm631_vm6, %v475_v16, %v630_v54  ;;  %v690_v16 = vand.u32 2147483648, %v523_v8  ;;  %v3883_v54 = vmov 1.0  }
 0x1e4   : > { %927 = vmatprep.mubr.bf16.mxu1 %v3882_v0  ;;  %1184 = vmatprep.mubr.bf16.mxu0 %v3882_v0  ;;  %v635_v6 = vsel %vm633_vm8, %v634_v59, %v632_v62  ;;  %825 = vst.msk [vmem:[#allocation3 + $0x10] ss:$8 sm:$0x3] %vm822_vm13, %v3883_v54  ;;  %v359_v62 = vmul.f32 %v4073_v25, %v4073_v25 }
 0x1e5   : > { %v707_v22 = vmul.f32 0.35355338, %v635_v6 }
 0x1e6   : > { %v846_v46 = vpop.trf.xlu0  ;;  %v398_v1 = vrot.slane %v359_v62, 4 }
 0x1e7   : > { %v731_v42 = vadd.f32 0.0001, %v707_v22 }
 0x1e8   : > { %v399_v6 = vadd.f32 %v398_v1, %v359_v62 }
 0x1e9   : > { %3455 = vrcp.f32 %v731_v42 }
 0x1ea   : > { %v847_v63 = vpop.trf.xlu0  ;;  %v400_v11 = vrot.slane %v399_v6, 2 }
 0x1eb   : > { %3256 = vmatmul.mubr.msk.bf16.gmra.mrb[4].mxu1 %vm853_vm14, %v846_v46  ;;  %3269 = vmatmul.mubr.msk.bf16.gmra.mrb[44].mxu0 %vm853_vm14, %v1075_v5  ;;  %v809_v5 = vpack.c.bf16 %v793_v56, %v793_v56  ;;  %v794_v46 = vmul.f32 %v3454_v38, %v4116_v26 }
 0x1ec   : > { %937 = vmatprep.mubr.bf16.mxu1 %v3882_v0  ;;  %1194 = vmatprep.mubr.bf16.mxu0 %v3882_v0 }
 0x1ed   : > { %2162 = vxpose.xlu1.c.b16.start.end [1/1] (short) %v809_v5, 128  ;;  %v810_v51 = vpack.c.bf16 %v794_v46, %v794_v46 }
 0x1ee   : > { %v848_v9 = vpop.trf.xlu0 }
 0x1f2   : > { %v849_v18 = vpop.trf.xlu0 }
 0x1f3   : > { %3257 = vmatmul.mubr.msk.bf16.gmra.mrb[8].mxu1 %vm853_vm14, %v847_v63  ;;  %3270 = vmatmul.mubr.msk.bf16.gmra.mrb[48].mxu0 %vm853_vm14, %v4140_v13  ;;  %v683_v13 = vand.u32 2147483648, %v517_v7  ;;  %v3456_v39 = vpop.eup %3455 }
 0x1f4   : > { %947 = vmatprep.mubr.bf16.mxu1 %v3882_v0  ;;  %1204 = vmatprep.mubr.bf16.mxu0 %v3882_v0  ;;  %v795_v47 = vmul.f32 %v3456_v39, %v4118_v27 }
 0x1f5   : > { %v684_v29 = vsel %vm682_vm10, %v683_v13, %v681_v28 }
 0x1f6   : > { %v714_v30 = vmul.f32 0.35355338, %v684_v29  ;;  %v850_v40 = vpop.trf.xlu0  ;;  %v811_v52 = vpack.c.bf16 %v795_v47, %v795_v47 }
 0x1f8   : > { %v738_v36 = vadd.f32 0.0001, %v714_v30  ;;  %2712 = vxpose.xlu0.c.b16.start.end [1/1] (short) %v811_v52, 128 }
 0x1fa   : > { %3457 = vrcp.f32 %v738_v36  ;;  %v851_v53 = vpop.trf.xlu0 }
 0x1fb   : > { %3258 = vmatmul.mubr.msk.bf16.gmra.mrb[12].mxu1 %vm853_vm14, %v848_v9  ;;  %3271 = vmatmul.mubr.msk.bf16.gmra.mrb[52].mxu0 %vm853_vm14, %v4150_v43  ;;  %v688_v43 = vsel %vm687_vm11, %v523_v8, %v686_v24  ;;  %v401_v24 = vadd.f32 %v400_v11, %v399_v6 }
 0x1fc   : > { %957 = vmatprep.mubr.bf16.mxu1 %v3882_v0  ;;  %1311 = vmatprep.mubr.bf16.mxu0 %v3882_v0  ;;  %v691_v32 = vsel %vm689_vm12, %v690_v16, %v688_v43 }
 0x1fd   : > { %v715_v34 = vmul.f32 0.35355338, %v691_v32  ;;  %v402_v38 = vrot.slane %v401_v24, 1 }
 0x1fe   : > { %v852_v61 = vpop.trf.xlu0 }
 0x1ff   : > { %v739_v21 = vadd.f32 0.0001, %v715_v34 }
 0x201   : > { %3459 = vrcp.f32 %v739_v21 }
 0x203   : > { %3259 = vmatmul.mubr.msk.bf16.gmra.mrb[16].mxu1 %vm853_vm14, %v849_v18 }
 0x204   : > { %967 = vmatprep.mubr.bf16.mxu1 %v3882_v0  ;;  %v3458_v55 = vpop.eup %3457 }
 0x205   : > { %v802_v57 = vmul.f32 %v3458_v55, %v4145_v20  ;;  %v358_v20 = vmul.f32 %v4071_v23, %v4071_v23 }
 0x207   : > { %v818_v27 = vpack.c.bf16 %v802_v57, %v802_v57  ;;  %v392_v63 = vrot.slane %v358_v20, 4 }
 0x209   : > { %v2479_v59 = vunpack.c.l.bf16 %v818_v27  ;;  %v393_v3 = vadd.f32 %v392_v63, %v358_v20 }
 0x20a   : > { %2489 = vxpose.xlu1.c.b16.start.end [1/1] (short) %v810_v51, 128  ;;  %v4197_v51 = vadd.f32 %v402_v38, %v401_v24 }
 0x20b   : > { %3260 = vmatmul.mubr.msk.bf16.gmra.mrb[20].mxu1 %vm853_vm14, %v850_v40  ;;  %v3460_v56 = vpop.eup %3459  ;;  %2481 = vst [vmem:[#allocation3] sm:$0xff] %v2479_v59  ;;  %v394_v9 = vrot.slane %v393_v3, 2 }
 0x20c   : > { %977 = vmatprep.mubr.bf16.mxu1 %v3882_v0  ;;  %v803_v26 = vmul.f32 %v3460_v56, %v4148_v41  ;;  %v373_v41 = vmul.f32 %v4128_v45, %v4128_v45  ;;  %vm547_vm1 = vcmp.eq.f32.partialorder %v4197_v51, inf  ;;  %vm549_vm4 = vcmp.eq.f32.partialorder %v4197_v51, 0.0 }
 0x20d   : > { %v395_v15 = vadd.f32 %v394_v9, %v393_v3 }
 0x20e   : > { %v819_v58 = vpack.c.bf16 %v803_v26, %v803_v26  ;;  %v482_v2 = vrot.slane %v373_v41, 4 }
 0x20f   : > { %v396_v32 = vrot.slane %v395_v15, 1 }
 0x210   : > { %v2480_v60 = vunpack.c.l.bf16 %v819_v58  ;;  %v483_v8 = vadd.f32 %v482_v2, %v373_v41 }
 0x211   : > { %v4195_v40 = vadd.f32 %v396_v32, %v395_v15 }
 0x212   : > { %2482 = vst [vmem:[#allocation3 + $0x8] sm:$0xff] %v2480_v60  ;;  %v484_v14 = vrot.slane %v483_v8, 2 }
 0x213   : > { %3261 = vmatmul.mubr.msk.bf16.gmra.mrb[24].mxu1 %vm853_vm14, %v851_v53  ;;  %vm540_vm15 = vcmp.eq.f32.partialorder %v4195_v40, inf  ;;  %vm542_vm3 = vcmp.eq.f32.partialorder %v4195_v40, 0.0 }
 0x214   : > { %987 = vmatprep.mubr.bf16.mxu1 %v3882_v0  ;;  %v485_v29 = vadd.f32 %v484_v14, %v483_v8 }
 0x216   : > { %v486_v39 = vrot.slane %v485_v29, 1 }
 0x218   : > { %v4199_v54 = vadd.f32 %v486_v39, %v485_v29 }
 0x21a   : > { %vm645_vm2 = vcmp.eq.f32.partialorder %v4199_v54, inf  ;;  %vm647_vm6 = vcmp.eq.f32.partialorder %v4199_v54, 0.0 }
 0x21b   : > { %3262 = vmatmul.mubr.msk.bf16.gmra.mrb[28].mxu1 %vm853_vm14, %v852_v61  ;;  %v372_v61 = vmul.f32 %v4126_v19, %v4126_v19 }
 0x21c   : > { %1354 = vmatprep.mubr.bf16.mxu1 %v3882_v0 }
 0x296   : > { %v1136_v4 = vpop.f32.mrb[24].mxu0 }
 0x297   : > { %v1138_v5 = vpop.f32.mrb[25].mxu0 }
 0x298   : > { %v1140_v7 = vpop.f32.mrb[26].mxu0 }
 0x299   : > { %v1215_v44 = vpack.c.bf16 %v1140_v7, %v1136_v4  ;;  %v1142_v22 = vpop.f32.mrb[27].mxu0 }
 0x29a   : > { %v1216_v10 = vpack.c.bf16 %v1142_v22, %v1138_v5  ;;  %v476_v5 = vrot.slane %v372_v61, 4 }
 0x29b   : > { %v1232_v42 = vmul.bf16 1069105081, %v1215_v44 }
 0x29c   : > { %v1235_v13 = vmul.bf16 1069105081, %v1216_v10  ;;  %v477_v11 = vadd.f32 %v476_v5, %v372_v61 }
 0x29e   : > { %3461 = vpow.bf16 %v1235_v13  ;;  %v1146_v16 = vpop.f32.mrb[28].mxu0 }
 0x29f   : > { %3463 = vpow.bf16 %v1232_v42  ;;  %v1148_v18 = vpop.f32.mrb[29].mxu0 }
 0x2a0   : > { %v1150_v28 = vpop.f32.mrb[30].mxu0 }
 0x2a1   : > { %v1217_v43 = vpack.c.bf16 %v1150_v28, %v1146_v16  ;;  %v1152_v30 = vpop.f32.mrb[31].mxu0 }
 0x2a2   : > { %v1218_v34 = vpack.c.bf16 %v1152_v30, %v1148_v18 }
 0x2a3   : > { %v1238_v36 = vmul.bf16 1069105081, %v1217_v43 }
 0x2a4   : > { %v1241_v21 = vmul.bf16 1069105081, %v1218_v34 }
 0x2a6   : > { %3465 = vpow.bf16 %v1241_v21  ;;  %v1156_v46 = vpop.f32.mrb[32].mxu0  ;;  %v478_v21 = vrot.slane %v477_v11, 2 }
 0x2a7   : > { %3467 = vpow.bf16 %v1238_v36  ;;  %v1158_v47 = vpop.f32.mrb[33].mxu0 }
 0x2a8   : > { %v1160_v52 = vpop.f32.mrb[34].mxu0  ;;  %3469 = vrsqrt.f32 %v4195_v40  ;;  %v479_v61 = vadd.f32 %v478_v21, %v477_v11 }
 0x2a9   : > { %v3462_v53 = vpop.eup %3461  ;;  %v1219_v55 = vpack.c.bf16 %v1160_v52, %v1156_v46  ;;  %v1162_v56 = vpop.f32.mrb[35].mxu0  ;;  %3471 = vrsqrt.f32 %v4197_v51 }
 0x2aa   : > { %v3464_v57 = vpop.eup %3463  ;;  %v1220_v26 = vpack.c.bf16 %v1162_v56, %v1158_v47  ;;  %1279 = vmatprep.subr.bf16.mxu0 %v3462_v53  ;;  %3473 = vrsqrt.f32 %v4199_v54  ;;  %v543_v47 = vand.u32 2147483648, %v4195_v40  ;;  %v648_v56 = vand.u32 2147483648, %v4199_v54 }
 0x2ab   : > { %v1244_v27 = vmul.bf16 1069105081, %v1219_v55  ;;  %1280 = vmatpush1.bf16.msra.mxu0 %v3464_v57  ;;  %v550_v55 = vand.u32 2147483648, %v4197_v51 }
 0x2ac   : > { %v1247_v58 = vmul.bf16 1069105081, %v1220_v26 }
 0x2ae   : > { %3475 = vpow.bf16 %v1247_v58  ;;  %v1166_v59 = vpop.f32.mrb[36].mxu0 }
 0x2af   : > { %3477 = vpow.bf16 %v1244_v27  ;;  %v1168_v60 = vpop.f32.mrb[37].mxu0 }
 0x2b0   : > { %v1170_v20 = vpop.f32.mrb[38].mxu0 }
 0x2b1   : > { %v3466_v62 = vpop.eup %3465  ;;  %v1221_v41 = vpack.c.bf16 %v1170_v20, %v1166_v59  ;;  %v1172_v63 = vpop.f32.mrb[39].mxu0 }
 0x2b2   : > { %v3468_v1 = vpop.eup %3467  ;;  %v1222_v2 = vpack.c.bf16 %v1172_v63, %v1168_v60  ;;  %1281 = vmatprep.subr.bf16.mxu0 %v3466_v62 }
 0x2b3   : > { %v1250_v3 = vmul.bf16 1069105081, %v1221_v41  ;;  %1282 = vmatpush1.bf16.msra.mxu0 %v3468_v1  ;;  %v3470_v4 = vpop.eup %3469 }
 0x2b4   : > { %v1253_v6 = vmul.bf16 1069105081, %v1222_v2  ;;  %v3472_v7 = vpop.eup %3471  ;;  %v539_v9 = vmul.f32 %v3470_v4, %v4195_v40 }
 0x2b5   : > { %v3474_v22 = vpop.eup %3473  ;;  %v546_v16 = vmul.f32 %v3472_v7, %v4197_v51 }
 0x2b6   : > { %3479 = vpow.bf16 %v1253_v6  ;;  %v919_v8 = vpop.f32.mrb[0].mxu1  ;;  %v1176_v44 = vpop.f32.mrb[40].mxu0  ;;  %v541_v34 = vsel %vm540_vm15, %v4195_v40, %v539_v9  ;;  %v644_v36 = vmul.f32 %v3474_v22, %v4199_v54  ;;  %v480_v22 = vrot.slane %v479_v61, 1 }
 0x2b7   : > { %3481 = vpow.bf16 %v1250_v3  ;;  %v921_v10 = vpop.f32.mrb[1].mxu1  ;;  %v1178_v42 = vpop.f32.mrb[41].mxu0  ;;  %v548_v52 = vsel %vm547_vm1, %v4197_v51, %v546_v16  ;;  %v544_v27 = vsel %vm542_vm3, %v543_v47, %v541_v34 }
 0x2b8   : > { %v923_v13 = vpop.f32.mrb[2].mxu1  ;;  %v1180_v14 = vpop.f32.mrb[42].mxu0  ;;  %v646_v58 = vsel %vm645_vm2, %v4199_v54, %v644_v36  ;;  %v551_v60 = vsel %vm549_vm4, %v550_v55, %v548_v52  ;;  %v694_v4 = vmul.f32 0.35355338, %v544_v27 }
 0x2b9   : > { %v3476_v15 = vpop.eup %3475  ;;  %v998_v18 = vpack.c.bf16 %v923_v13, %v919_v8  ;;  %v1223_v24 = vpack.c.bf16 %v1180_v14, %v1176_v44  ;;  %v925_v28 = vpop.f32.mrb[3].mxu1  ;;  %v649_v5 = vsel %vm647_vm6, %v648_v56, %v646_v58  ;;  %v695_v8 = vmul.f32 0.35355338, %v551_v60 }
 0x2ba   : > { %v1182_v29 = vpop.f32.mrb[43].mxu0  ;;  %v3478_v43 = vpop.eup %3477  ;;  %v999_v30 = vpack.c.bf16 %v925_v28, %v921_v10  ;;  %1283 = vmatprep.subr.bf16.mxu0 %v3476_v15  ;;  %v718_v13 = vadd.f32 0.0001, %v694_v4 }
 0x2bb   : > { %v1224_v32 = vpack.c.bf16 %v1182_v29, %v1178_v42  ;;  %v1015_v38 = vmul.bf16 1069105081, %v998_v18  ;;  %1284 = vmatpush1.bf16.msra.mxu0 %v3478_v43  ;;  %v1256_v53 = vmul.bf16 1069105081, %v1223_v24  ;;  %v709_v42 = vmul.f32 0.35355338, %v649_v5 }
 0x2bc   : > { %v1018_v39 = vmul.bf16 1069105081, %v999_v30  ;;  %v719_v16 = vadd.f32 0.0001, %v695_v8  ;;  %v4223_v24 = vadd.f32 %v480_v22, %v479_v61 }
 0x2bd   : > { %v1259_v46 = vmul.bf16 1069105081, %v1224_v32  ;;  %3483 = vpow.bf16 %v1015_v38  ;;  %v733_v30 = vadd.f32 0.0001, %v709_v42 }
 0x2be   : > { %v929_v57 = vpop.f32.mrb[4].mxu1  ;;  %v1186_v26 = vpop.f32.mrb[44].mxu0  ;;  %3485 = vpow.bf16 %v1018_v39  ;;  %vm638_vm7 = vcmp.eq.f32.partialorder %v4223_v24, inf  ;;  %vm640_vm8 = vcmp.eq.f32.partialorder %v4223_v24, 0.0 }
 0x2bf   : > { %v931_v59 = vpop.f32.mrb[5].mxu1  ;;  %v1188_v40 = vpop.f32.mrb[45].mxu0  ;;  %3487 = vpow.bf16 %v1259_v46 }
 0x2c0   : > { %v933_v20 = vpop.f32.mrb[6].mxu1  ;;  %v1190_v62 = vpop.f32.mrb[46].mxu0  ;;  %3489 = vpow.bf16 %v1256_v53 }
 0x2c1   : > { %v3480_v41 = vpop.eup %3479  ;;  %v1000_v51 = vpack.c.bf16 %v933_v20, %v929_v57  ;;  %v1225_v63 = vpack.c.bf16 %v1190_v62, %v1186_v26  ;;  %v935_v1 = vpop.f32.mrb[7].mxu1 }
 0x2c2   : > { %v1192_v2 = vpop.f32.mrb[47].mxu0  ;;  %v3482_v3 = vpop.eup %3481  ;;  %v1001_v6 = vpack.c.bf16 %v935_v1, %v931_v59  ;;  %1285 = vmatprep.subr.bf16.mxu0 %v3480_v41 }
 0x2c3   : > { %v1226_v7 = vpack.c.bf16 %v1192_v2, %v1188_v40  ;;  %v1021_v44 = vmul.bf16 1069105081, %v1000_v51  ;;  %1286 = vmatpush1.bf16.msra.mxu0 %v3482_v3  ;;  %v1262_v11 = vmul.bf16 1069105081, %v1225_v63 }
 0x2c4   : > { %v1024_v9 = vmul.bf16 1069105081, %v1001_v6 }
 0x2c5   : > { %v1265_v10 = vmul.bf16 1069105081, %v1226_v7  ;;  %3491 = vpow.bf16 %v1021_v44 }
 0x2c6   : > { %v939_v14 = vpop.f32.mrb[8].mxu1  ;;  %v1196_v15 = vpop.f32.mrb[48].mxu0  ;;  %3493 = vpow.bf16 %v1024_v9 }
 0x2c7   : > { %v941_v18 = vpop.f32.mrb[9].mxu1  ;;  %v1198_v54 = vpop.f32.mrb[49].mxu0  ;;  %3495 = vpow.bf16 %v1265_v10 }
 0x2c8   : > { %v943_v28 = vpop.f32.mrb[10].mxu1  ;;  %v1200_v29 = vpop.f32.mrb[50].mxu0  ;;  %3497 = vpow.bf16 %v1262_v11 }
 0x2c9   : > { %v3484_v43 = vpop.eup %3483  ;;  %v1002_v32 = vpack.c.bf16 %v943_v28, %v939_v14  ;;  %v1227_v34 = vpack.c.bf16 %v1200_v29, %v1196_v15  ;;  %v945_v36 = vpop.f32.mrb[11].mxu1  ;;  %3499 = vrcp.f32 %v718_v13 }
 0x2ca   : > { %v1202_v38 = vpop.f32.mrb[51].mxu0  ;;  %v3486_v21 = vpop.eup %3485  ;;  %v1003_v39 = vpack.c.bf16 %v945_v36, %v941_v18  ;;  %3501 = vrcp.f32 %v719_v16 }
 0x2cb   : > { %v1228_v46 = vpack.c.bf16 %v1202_v38, %v1198_v54  ;;  %v3488_v47 = vpop.eup %3487  ;;  %v1027_v52 = vmul.bf16 1069105081, %v1002_v32  ;;  %1322 = vmatprep.subr.bf16.mxu1 %v3486_v21  ;;  %3503 = vrsqrt.f32 %v4223_v24  ;;  %v1268_v57 = vmul.bf16 1069105081, %v1227_v34  ;;  %v4229_v34 = vpop.trf.xlu1 }
 0x2cc   : > { %v3490_v53 = vpop.eup %3489  ;;  %v1030_v55 = vmul.bf16 1069105081, %v1003_v39  ;;  %1287 = vmatprep.subr.bf16.mxu0 %v3488_v47  ;;  %1323 = vmatpush1.bf16.msra.mxu1 %v3484_v43  ;;  %3505 = vrcp.f32 %v733_v30  ;;  %v641_v21 = vand.u32 2147483648, %v4223_v24 }
 0x2cd   : > { %v1271_v56 = vmul.bf16 1069105081, %v1228_v46  ;;  %1288 = vmatpush1.bf16.msra.mxu0 %v3490_v53  ;;  %3507 = vpow.bf16 %v1027_v52 }
 0x2ce   : > { %v949_v26 = vpop.f32.mrb[12].mxu1  ;;  %v1206_v27 = vpop.f32.mrb[52].mxu0  ;;  %3509 = vpow.bf16 %v1030_v55 }
 0x2cf   : > { %v951_v58 = vpop.f32.mrb[13].mxu1  ;;  %v1208_v59 = vpop.f32.mrb[53].mxu0  ;;  %3511 = vpow.bf16 %v1271_v56 }
 0x2d0   : > { %v953_v40 = vpop.f32.mrb[14].mxu1  ;;  %v1210_v60 = vpop.f32.mrb[54].mxu0  ;;  %3513 = vpow.bf16 %v1268_v57 }
 0x2d1   : > { %v3492_v61 = vpop.eup %3491  ;;  %v1004_v20 = vpack.c.bf16 %v953_v40, %v949_v26  ;;  %v1229_v62 = vpack.c.bf16 %v1210_v60, %v1206_v27  ;;  %v955_v41 = vpop.f32.mrb[15].mxu1 }
 0x2d2   : > { %v1212_v51 = vpop.f32.mrb[55].mxu0  ;;  %v3494_v63 = vpop.eup %3493  ;;  %v1005_v1 = vpack.c.bf16 %v955_v41, %v951_v58 }
 0x2d3   : > { %v1230_v2 = vpack.c.bf16 %v1212_v51, %v1208_v59  ;;  %v3496_v3 = vpop.eup %3495  ;;  %v1033_v4 = vmul.bf16 1069105081, %v1004_v20  ;;  %1324 = vmatprep.subr.bf16.mxu1 %v3494_v63  ;;  %v1274_v22 = vmul.bf16 1069105081, %v1229_v62  ;;  %v1621_v58 = vpop.trf.xlu1  ;;  %v834_v20 = vld [vmem:[#allocation3 + $0x18] sm:$0x1] }
 0x2d4   : > { %v3498_v5 = vpop.eup %3497  ;;  %v1036_v7 = vmul.bf16 1069105081, %v1005_v1  ;;  %1289 = vmatprep.subr.bf16.mxu0 %v3496_v3  ;;  %1325 = vmatpush1.bf16.msra.mxu1 %v3492_v61 }
 0x2d5   : > { %v3500_v6 = vpop.eup %3499  ;;  %v1277_v8 = vmul.bf16 1069105081, %v1230_v2  ;;  %1290 = vmatpush1.bf16.msra.mxu0 %v3498_v5  ;;  %3515 = vpow.bf16 %v1033_v4 }
 0x2d6   : > { %v3502_v44 = vpop.eup %3501  ;;  %v959_v10 = vpop.f32.mrb[16].mxu1  ;;  %3517 = vpow.bf16 %v1036_v7  ;;  %v766_v30 = vmul.f32 0.35355338, %v3500_v6 }
 0x2d7   : > { %v3504_v9 = vpop.eup %3503  ;;  %v961_v11 = vpop.f32.mrb[17].mxu1  ;;  %3519 = vpow.bf16 %v1277_v8  ;;  %v767_v38 = vmul.f32 0.35355338, %v3502_v44 }
 0x2d8   : > { %v3506_v42 = vpop.eup %3505  ;;  %v963_v13 = vpop.f32.mrb[18].mxu1  ;;  %v637_v15 = vmul.f32 %v3504_v9, %v4223_v24  ;;  %3521 = vpow.bf16 %v1274_v22  ;;  %v774_v52 = vmul.f32 %v766_v30, %v4071_v23 }
 0x2d9   : > { %v3508_v14 = vpop.eup %3507  ;;  %v1006_v16 = vpack.c.bf16 %v963_v13, %v959_v10  ;;  %v965_v18 = vpop.f32.mrb[19].mxu1  ;;  %v797_v28 = vmul.f32 %v3506_v42, %v4128_v45  ;;  %v775_v53 = vmul.f32 %v767_v38, %v4073_v25 }
 0x2da   : > { %v3510_v54 = vpop.eup %3509  ;;  %v1007_v29 = vpack.c.bf16 %v965_v18, %v961_v11  ;;  %v639_v46 = vsel %vm638_vm7, %v4223_v24, %v637_v15  ;;  %v782_v41 = vpack.c.bf16 %v774_v52, %v774_v52  ;;  %v1622_v3 = vpop.trf.xlu1 }
 0x2db   : > { %v3512_v43 = vpop.eup %3511  ;;  %v1039_v32 = vmul.bf16 1069105081, %v1006_v16  ;;  %1326 = vmatprep.subr.bf16.mxu1 %v3510_v54  ;;  %v642_v55 = vsel %vm640_vm8, %v641_v21, %v639_v46  ;;  %v4236_v51 = vpack.c.bf16 %v775_v53, %v775_v53  ;;  %v836_v63 = vpack.c.bf16 %v834_v20, %v797_v28 }
 0x2dc   : > { %v3514_v36 = vpop.eup %3513  ;;  %v1042_v39 = vmul.bf16 1069105081, %v1007_v29  ;;  %1291 = vmatprep.subr.bf16.mxu0 %v3512_v43  ;;  %1327 = vmatpush1.bf16.msra.mxu1 %v3508_v14  ;;  %v708_v61 = vmul.f32 0.35355338, %v642_v55  ;;  %v1430_v4 = vsel %vm878_vm5, %v782_v41, 0 }
 0x2dd   : > { %1292 = vmatpush1.bf16.msra.mxu0 %v3514_v36 }
 0x2de   : > { %3523 = vpow.bf16 %v1042_v39  ;;  %v969_v45 = vpop.f32.mrb[20].mxu1  ;;  %v732_v1 = vadd.f32 0.0001, %v708_v61  ;;  %v1623_v42 = vpop.trf.xlu1  ;;  %v361_v61 = vmul.f32 %v4077_v33, %v4077_v33 }
 0x2df   : > { %3525 = vpow.bf16 %v1039_v32  ;;  %v971_v47 = vpop.f32.mrb[21].mxu1 }
 0x2e0   : > { %v973_v56 = vpop.f32.mrb[22].mxu1  ;;  %v3516_v57 = vpop.eup %3515 }
 0x2e1   : > { %v1008_v26 = vpack.c.bf16 %v973_v56, %v969_v45  ;;  %v975_v27 = vpop.f32.mrb[23].mxu1  ;;  %v3518_v59 = vpop.eup %3517  ;;  %v833_v45 = vld [vmem:[#allocation3 + $0x10] sm:$0x1] }
 0x2e2   : > { %v1009_v40 = vpack.c.bf16 %v975_v27, %v971_v47  ;;  %v3520_v60 = vpop.eup %3519  ;;  %1328 = vmatprep.subr.bf16.mxu1 %v3518_v59  ;;  %v1624_v43 = vpop.trf.xlu1 }
 0x2e3   : > { %v1045_v24 = vmul.bf16 1069105081, %v1008_v26  ;;  %v3522_v62 = vpop.eup %3521  ;;  %1293 = vmatprep.subr.bf16.mxu0 %v3520_v60  ;;  %1329 = vmatpush1.bf16.msra.mxu1 %v3516_v57 }
 0x2e4   : > { %v1048_v23 = vmul.bf16 1069105081, %v1009_v40  ;;  %1294 = vmatpush1.bf16.msra.mxu0 %v3522_v62  ;;  %v360_v40 = vmul.f32 %v4075_v31, %v4075_v31  ;;  %v375_v62 = vmul.f32 %v4132_v50, %v4132_v50 }
 0x2e5   : > { %3281 = vmatprep.subr.msk.bf16.mxu0 %vm878_vm5, %v4236_v51 }
 0x2e6   : > { %3527 = vpow.bf16 %v1048_v23  ;;  %v979_v25 = vpop.f32.mrb[24].mxu1  ;;  %v1625_v38 = vpop.trf.xlu1  ;;  %v404_v60 = vrot.slane %v360_v40, 4 }
 0x2e7   : > { %3529 = vpow.bf16 %v1045_v24  ;;  %v981_v2 = vpop.f32.mrb[25].mxu1  ;;  %1312 = vmatmul.mubr.bf16.vlgmr.msra.gmra.mrb[56].mxu0 %v836_v63  ;;  %v494_v63 = vrot.slane %v375_v62, 4 }
 0x2e8   : > { %v983_v5 = vpop.f32.mrb[26].mxu1  ;;  %1653 = vmatpush1.bf16.msra.mxu0 %v1430_v4  ;;  %1684 = vmatprep.mubr.bf16.mxu0 %v3882_v0  ;;  %3531 = vrcp.f32 %v732_v1 }
 0x2e9   : > { %v3524_v6 = vpop.eup %3523  ;;  %v1010_v7 = vpack.c.bf16 %v983_v5, %v979_v25  ;;  %v985_v8 = vpop.f32.mrb[27].mxu1  ;;  %v410_v25 = vrot.slane %v361_v61, 4  ;;  %v495_v5 = vadd.f32 %v494_v63, %v375_v62 }
 0x2ea   : > { %v3526_v44 = vpop.eup %3525  ;;  %v1011_v22 = vpack.c.bf16 %v985_v8, %v981_v2  ;;  %1330 = vmatprep.subr.bf16.mxu1 %v3524_v6  ;;  %v1626_v39 = vpop.trf.xlu1 }
 0x2eb   : > { %v1051_v9 = vmul.bf16 1069105081, %v1010_v7  ;;  %1331 = vmatpush1.bf16.msra.mxu1 %v3526_v44  ;;  %v411_v2 = vadd.f32 %v410_v25, %v361_v61 }
 0x2ec   : > { %v1054_v10 = vmul.bf16 1069105081, %v1011_v22 }
 0x2ed   : > { %v412_v22 = vrot.slane %v411_v2, 2 }
 0x2ee   : > { %3533 = vpow.bf16 %v1054_v10  ;;  %v989_v11 = vpop.f32.mrb[28].mxu1  ;;  %v1627_v52 = vpop.trf.xlu1 }
 0x2ef   : > { %3535 = vpow.bf16 %v1051_v9  ;;  %v991_v13 = vpop.f32.mrb[29].mxu1  ;;  %3282 = vmatmul.mubr.msk.bf16.vlgmr.msra.gmra.mrb[60].mxu0 %vm853_vm14, %v4229_v34 }
 0x2f0   : > { %v993_v14 = vpop.f32.mrb[30].mxu1  ;;  %1694 = vmatprep.mubr.bf16.mxu0 %v3882_v0 }
 0x2f1   : > { %v3528_v15 = vpop.eup %3527  ;;  %v1012_v16 = vpack.c.bf16 %v993_v14, %v989_v11  ;;  %v995_v18 = vpop.f32.mrb[31].mxu1  ;;  %v413_v14 = vadd.f32 %v412_v22, %v411_v2 }
 0x2f2   : > { %v3530_v54 = vpop.eup %3529  ;;  %v1013_v28 = vpack.c.bf16 %v995_v18, %v991_v13  ;;  %1332 = vmatprep.subr.bf16.mxu1 %v3528_v15  ;;  %v1397_v53 = vpop.trf.xlu1 }
 0x2f3   : > { %v1057_v29 = vmul.bf16 1069105081, %v1012_v16  ;;  %1333 = vmatpush1.bf16.msra.mxu1 %v3530_v54  ;;  %v3532_v32 = vpop.eup %3531 }
 0x2f4   : > { %v1060_v30 = vmul.bf16 1069105081, %v1013_v28  ;;  %v796_v36 = vmul.f32 %v3532_v32, %v4126_v19 }
 0x2f6   : > { %3537 = vpow.bf16 %v1060_v30  ;;  %v835_v19 = vpack.c.bf16 %v833_v45, %v796_v36  ;;  %v1398_v55 = vpop.trf.xlu1  ;;  %v414_v30 = vrot.slane %v413_v14, 1 }
 0x2f7   : > { %3539 = vpow.bf16 %v1057_v29  ;;  %3283 = vmatmul.mubr.msk.bf16.gmra.mrb[64].mxu0 %vm853_vm14, %v1621_v58 }
 0x2f8   : > { %1704 = vmatprep.mubr.bf16.mxu0 %v3882_v0 }
 0x2f9   : > { %v3534_v34 = vpop.eup %3533 }
 0x2fa   : > { %v3536_v21 = vpop.eup %3535  ;;  %1334 = vmatprep.subr.bf16.mxu1 %v3534_v34  ;;  %v1399_v56 = vpop.trf.xlu1 }
 0x2fb   : > { %1335 = vmatpush1.bf16.msra.mxu1 %v3536_v21  ;;  %v4292_v21 = vadd.f32 %v414_v30, %v413_v14 }
 0x2fd   : > { %vm561_vm11 = vcmp.eq.f32.partialorder %v4292_v21, inf  ;;  %vm563_vm12 = vcmp.eq.f32.partialorder %v4292_v21, 0.0 }
 0x2fe   : > { %v1400_v57 = vpop.trf.xlu1 }
 0x2ff   : > { %3284 = vmatmul.mubr.msk.bf16.gmra.mrb[68].mxu0 %vm853_vm14, %v1622_v3 }
 0x300   : > { %1714 = vmatprep.mubr.bf16.mxu0 %v3882_v0 }
 0x301   : > { %v3538_v46 = vpop.eup %3537 }
 0x302   : > { %v3540_v47 = vpop.eup %3539  ;;  %1336 = vmatprep.subr.bf16.mxu1 %v3538_v46  ;;  %v1401_v26 = vpop.trf.xlu1 }
 0x303   : > { %1337 = vmatpush1.bf16.msra.mxu1 %v3540_v47 }
 0x304   : > { %3272 = vmatprep.subr.msk.bf16.mxu1 %vm878_vm5, %v4236_v51  ;;  %v405_v51 = vadd.f32 %v404_v60, %v360_v40  ;;  %v374_v40 = vmul.f32 %v4130_v48, %v4130_v48 }
 0x306   : > { %1355 = vmatmul.mubr.bf16.vlgmr.msra.gmra.mrb[32].mxu1 %v835_v19  ;;  %v1402_v27 = vpop.trf.xlu1  ;;  %v406_v1 = vrot.slane %v405_v51, 2 }
 0x307   : > { %1436 = vmatpush1.bf16.msra.mxu1 %v1430_v4  ;;  %1467 = vmatprep.mubr.bf16.mxu1 %v3882_v0 }
 0x308   : > { %3285 = vmatmul.mubr.msk.bf16.gmra.mrb[72].mxu0 %vm853_vm14, %v1623_v42  ;;  %v407_v7 = vadd.f32 %v406_v1, %v405_v51  ;;  %v496_v42 = vrot.slane %v495_v5, 2 }
 0x309   : > { %1724 = vmatprep.mubr.bf16.mxu0 %v3882_v0 }
 0x30a   : > { %v1403_v58 = vpop.trf.xlu1  ;;  %v408_v13 = vrot.slane %v407_v7, 1  ;;  %v497_v18 = vadd.f32 %v496_v42, %v495_v5 }
 0x30c   : > { %v4289_v28 = vadd.f32 %v408_v13, %v407_v7  ;;  %v498_v34 = vrot.slane %v497_v18, 1  ;;  %v488_v7 = vrot.slane %v374_v40, 4 }
 0x30e   : > { %3273 = vmatmul.mubr.msk.bf16.vlgmr.msra.gmra.mrb[36].mxu1 %vm853_vm14, %v1397_v53  ;;  %v1404_v59 = vpop.trf.xlu1  ;;  %v4294_v45 = vadd.f32 %v498_v34, %v497_v18  ;;  %vm554_vm9 = vcmp.eq.f32.partialorder %v4289_v28, inf  ;;  %vm556_vm10 = vcmp.eq.f32.partialorder %v4289_v28, 0.0 }
 0x30f   : > { %1477 = vmatprep.mubr.bf16.mxu1 %v3882_v0 }
 0x310   : > { %3286 = vmatmul.mubr.msk.bf16.gmra.mrb[76].mxu0 %vm853_vm14, %v1624_v43  ;;  %vm659_vm13 = vcmp.eq.f32.partialorder %v4294_v45, inf  ;;  %vm661_vm15 = vcmp.eq.f32.partialorder %v4294_v45, 0.0 }
 0x311   : > { %1734 = vmatprep.mubr.bf16.mxu0 %v3882_v0 }
 0x316   : > { %3274 = vmatmul.mubr.msk.bf16.gmra.mrb[40].mxu1 %vm853_vm14, %v1398_v55 }
 0x317   : > { %1487 = vmatprep.mubr.bf16.mxu1 %v3882_v0 }
 0x318   : > { %3287 = vmatmul.mubr.msk.bf16.gmra.mrb[80].mxu0 %vm853_vm14, %v1625_v38 }
 0x319   : > { %1744 = vmatprep.mubr.bf16.mxu0 %v3882_v0 }
 0x31e   : > { %3275 = vmatmul.mubr.msk.bf16.gmra.mrb[44].mxu1 %vm853_vm14, %v1399_v56 }
 0x31f   : > { %1497 = vmatprep.mubr.bf16.mxu1 %v3882_v0 }
 0x320   : > { %3288 = vmatmul.mubr.msk.bf16.gmra.mrb[84].mxu0 %vm853_vm14, %v1626_v39 }
 0x321   : > { %1754 = vmatprep.mubr.bf16.mxu0 %v3882_v0 }
 0x326   : > { %3276 = vmatmul.mubr.msk.bf16.gmra.mrb[48].mxu1 %vm853_vm14, %v1400_v57 }
 0x327   : > { %1507 = vmatprep.mubr.bf16.mxu1 %v3882_v0 }
 0x328   : > { %3289 = vmatmul.mubr.msk.bf16.gmra.mrb[88].mxu0 %vm853_vm14, %v1627_v52 }
 0x329   : > { %1861 = vmatprep.mubr.bf16.mxu0 %v3882_v0 }
 0x32e   : > { %3277 = vmatmul.mubr.msk.bf16.gmra.mrb[52].mxu1 %vm853_vm14, %v1401_v26 }
 0x32f   : > { %1517 = vmatprep.mubr.bf16.mxu1 %v3882_v0 }
 0x336   : > { %3278 = vmatmul.mubr.msk.bf16.gmra.mrb[56].mxu1 %vm853_vm14, %v1402_v27 }
 0x337   : > { %1527 = vmatprep.mubr.bf16.mxu1 %v3882_v0 }
 0x33e   : > { %3279 = vmatmul.mubr.msk.bf16.gmra.mrb[60].mxu1 %vm853_vm14, %v1403_v58 }
 0x33f   : > { %1537 = vmatprep.mubr.bf16.mxu1 %v3882_v0 }
 0x346   : > { %3280 = vmatmul.mubr.msk.bf16.gmra.mrb[64].mxu1 %vm853_vm14, %v1404_v59 }
 0x347   : > { %1904 = vmatprep.mubr.bf16.mxu1 %v3882_v0 }
 0x3ba   : > { %v1313_v24 = vpop.f32.mrb[56].mxu0 }
 0x3bb   : > { %v1315_v20 = vpop.f32.mrb[57].mxu0 }
 0x3bc   : > { %v4285_v41 = vpop.f32.mrb[58].mxu0 }
 0x3bd   : > { %v4287_v23 = vpop.f32.mrb[59].mxu0 }
 0x3c2   : > { %v1686_v3 = vpop.f32.mrb[60].mxu0 }
 0x3c3   : > { %v1688_v4 = vpop.f32.mrb[61].mxu0 }
 0x3c4   : > { %v1690_v6 = vpop.f32.mrb[62].mxu0 }
 0x3c5   : > { %v1765_v8 = vpack.c.bf16 %v1690_v6, %v1686_v3  ;;  %v1692_v44 = vpop.f32.mrb[63].mxu0 }
 0x3c6   : > { %v1766_v9 = vpack.c.bf16 %v1692_v44, %v1688_v4 }
 0x3c7   : > { %v1782_v10 = vmul.bf16 1069105081, %v1765_v8 }
 0x3c8   : > { %v1785_v11 = vmul.bf16 1069105081, %v1766_v9 }
 0x3ca   : > { %3541 = vpow.bf16 %v1785_v11  ;;  %v1696_v15 = vpop.f32.mrb[64].mxu0  ;;  %v489_v11 = vadd.f32 %v488_v7, %v374_v40  ;;  %v662_v40 = vand.u32 2147483648, %v4294_v45 }
 0x3cb   : > { %3543 = vpow.bf16 %v1782_v10  ;;  %v1698_v16 = vpop.f32.mrb[65].mxu0  ;;  %v1368_v10 = vshrl.u32 %v820_v49, 7 }
 0x3cc   : > { %v1700_v54 = vpop.f32.mrb[66].mxu0  ;;  %3545 = vrsqrt.f32 %v4289_v28 }
 0x3cd   : > { %v1767_v29 = vpack.c.bf16 %v1700_v54, %v1696_v15  ;;  %v1702_v43 = vpop.f32.mrb[67].mxu0  ;;  %v557_v15 = vand.u32 2147483648, %v4289_v28 }
 0x3ce   : > { %v1768_v32 = vpack.c.bf16 %v1702_v43, %v1698_v16 }
 0x3cf   : > { %v1788_v36 = vmul.bf16 1069105081, %v1767_v29 }
 0x3d0   : > { %v1791_v38 = vmul.bf16 1069105081, %v1768_v32  ;;  %v4314_v32 = vsub.s32 0, %v1368_v10 }
 0x3d2   : > { %3547 = vpow.bf16 %v1791_v38  ;;  %v1706_v39 = vpop.f32.mrb[68].mxu0 }
 0x3d3   : > { %3549 = vpow.bf16 %v1788_v36  ;;  %v1708_v46 = vpop.f32.mrb[69].mxu0 }
 0x3d4   : > { %v1710_v47 = vpop.f32.mrb[70].mxu0  ;;  %3551 = vrsqrt.f32 %v4292_v21 }
 0x3d5   : > { %v3542_v19 = vpop.eup %3541  ;;  %v1769_v52 = vpack.c.bf16 %v1710_v47, %v1706_v39  ;;  %v1712_v53 = vpop.f32.mrb[71].mxu0  ;;  %3553 = vrsqrt.f32 %v4294_v45 }
 0x3d6   : > { %v3544_v55 = vpop.eup %3543  ;;  %v1770_v56 = vpack.c.bf16 %v1712_v53, %v1708_v46  ;;  %1829 = vmatprep.subr.bf16.mxu0 %v3542_v19  ;;  %v490_v19 = vrot.slane %v489_v11, 2 }
 0x3d7   : > { %v1794_v57 = vmul.bf16 1069105081, %v1769_v52  ;;  %1830 = vmatpush1.bf16.msra.mxu0 %v3544_v55  ;;  %v3546_v51 = vpop.eup %3545 }
 0x3d8   : > { %v1797_v26 = vmul.bf16 1069105081, %v1770_v56  ;;  %v553_v22 = vmul.f32 %v3546_v51, %v4289_v28 }
 0x3d9   : > { %v1356_v27 = vpop.f32.mrb[32].mxu1 }
 0x3da   : > { %v4298_v58 = vadd.f32 %v1356_v27, %v1313_v24  ;;  %v1358_v59 = vpop.f32.mrb[33].mxu1  ;;  %3555 = vpow.bf16 %v1797_v26  ;;  %v555_v49 = vsel %vm554_vm9, %v4289_v28, %v553_v22  ;;  %v564_v26 = vand.u32 2147483648, %v4292_v21 }
 0x3db   : > { %v1716_v60 = vpop.f32.mrb[72].mxu0  ;;  %v4302_v61 = vadd.f32 %v1358_v59, %v1315_v20  ;;  %v1360_v62 = vpop.f32.mrb[34].mxu1  ;;  %3557 = vpow.bf16 %v1794_v57  ;;  %v558_v56 = vsel %vm556_vm10, %v557_v15, %v555_v49 }
 0x3dc   : > { %v1718_v25 = vpop.f32.mrb[73].mxu0  ;;  %v1361_v63 = vadd.f32 %v1360_v62, %v4285_v41  ;;  %v1362_v1 = vpop.f32.mrb[35].mxu1 }
 0x3dd   : > { %v1720_v2 = vpop.f32.mrb[74].mxu0  ;;  %v1363_v3 = vadd.f32 %v1362_v1, %v4287_v23  ;;  %v3548_v24 = vpop.eup %3547 }
 0x3de   : > { %3559 = vrcp.f32 %v1361_v63  ;;  %v1771_v4 = vpack.c.bf16 %v1720_v2, %v1716_v60  ;;  %v1722_v5 = vpop.f32.mrb[75].mxu0  ;;  %v3550_v6 = vpop.eup %3549  ;;  %1831 = vmatprep.subr.bf16.mxu0 %v3548_v24  ;;  %v491_v2 = vadd.f32 %v490_v19, %v489_v11 }
 0x3df   : > { %3561 = vrcp.f32 %v1363_v3  ;;  %v1772_v8 = vpack.c.bf16 %v1722_v5, %v1718_v25  ;;  %1832 = vmatpush1.bf16.msra.mxu0 %v3550_v6  ;;  %v3552_v44 = vpop.eup %3551 }
 0x3e0   : > { %v1800_v20 = vmul.bf16 1069105081, %v1771_v4  ;;  %v3554_v23 = vpop.eup %3553  ;;  %v560_v16 = vmul.f32 %v3552_v44, %v4292_v21  ;;  %v492_v11 = vrot.slane %v491_v2, 1 }
 0x3e1   : > { %v1803_v9 = vmul.bf16 1069105081, %v1772_v8  ;;  %v1469_v41 = vpop.f32.mrb[36].mxu1  ;;  %v658_v34 = vmul.f32 %v3554_v23, %v4294_v45 }
 0x3e2   : > { %v1471_v42 = vpop.f32.mrb[37].mxu1  ;;  %v562_v57 = vsel %vm561_vm11, %v4292_v21, %v560_v16  ;;  %v4342_v49 = vadd.f32 %v492_v11, %v491_v2 }
 0x3e3   : > { %3563 = vpow.bf16 %v1803_v9  ;;  %v1726_v13 = vpop.f32.mrb[76].mxu0  ;;  %v1473_v14 = vpop.f32.mrb[38].mxu1  ;;  %v660_v28 = vsel %vm659_vm13, %v4294_v45, %v658_v34  ;;  %v565_v1 = vsel %vm563_vm12, %v564_v26, %v562_v57 }
 0x3e4   : > { %3565 = vpow.bf16 %v1800_v20  ;;  %v1728_v18 = vpop.f32.mrb[77].mxu0  ;;  %v1548_v54 = vpack.c.bf16 %v1473_v14, %v1469_v41  ;;  %v1475_v29 = vpop.f32.mrb[39].mxu1  ;;  %v696_v20 = vmul.f32 0.35355338, %v558_v56  ;;  %v663_v44 = vsel %vm661_vm15, %v662_v40, %v660_v28 }
 0x3e5   : > { %v1730_v43 = vpop.f32.mrb[78].mxu0  ;;  %v1549_v30 = vpack.c.bf16 %v1475_v29, %v1471_v42  ;;  %v3556_v36 = vpop.eup %3555  ;;  %v697_v41 = vmul.f32 0.35355338, %v565_v1  ;;  %v711_v15 = vmul.f32 0.35355338, %v663_v44  ;;  %vm652_vm1 = vcmp.eq.f32.partialorder %v4342_v49, inf }
 0x3e6   : > { %v1565_v38 = vmul.bf16 1069105081, %v1548_v54  ;;  %v1773_v39 = vpack.c.bf16 %v1730_v43, %v1726_v13  ;;  %v1732_v46 = vpop.f32.mrb[79].mxu0  ;;  %v3558_v47 = vpop.eup %3557  ;;  %1833 = vmatprep.subr.bf16.mxu0 %v3556_v36  ;;  %vm654_vm2 = vcmp.eq.f32.partialorder %v4342_v49, 0.0 }
 0x3e7   : > { %v1568_v52 = vmul.bf16 1069105081, %v1549_v30  ;;  %v1774_v53 = vpack.c.bf16 %v1732_v46, %v1728_v18  ;;  %1834 = vmatpush1.bf16.msra.mxu0 %v3558_v47  ;;  %v721_v54 = vadd.f32 0.0001, %v697_v41  ;;  %v735_v34 = vadd.f32 0.0001, %v711_v15 }
 0x3e8   : > { %v3560_v55 = vpop.eup %3559  ;;  %v1806_v27 = vmul.bf16 1069105081, %v1773_v39 }
 0x3e9   : > { %v3562_v59 = vpop.eup %3561  ;;  %3567 = vpow.bf16 %v1568_v52  ;;  %v1809_v60 = vmul.bf16 1069105081, %v1774_v53  ;;  %v1479_v62 = vpop.f32.mrb[40].mxu1  ;;  %v1370_v51 = vrot.slane %v3560_v55, %v4314_v32 }
 0x3ea   : > { %3569 = vpow.bf16 %v1565_v38  ;;  %v1481_v25 = vpop.f32.mrb[41].mxu1  ;;  %v1374_v63 = vrot.slane %v3562_v59, %v4314_v32 }
 0x3eb   : > { %3571 = vpow.bf16 %v1809_v60  ;;  %v1736_v3 = vpop.f32.mrb[80].mxu0  ;;  %v1483_v24 = vpop.f32.mrb[42].mxu1  ;;  %v4335_v4 = vmul.f32 %v1370_v51, %v4298_v58 }
 0x3ec   : > { %3573 = vpow.bf16 %v1806_v27  ;;  %v1738_v5 = vpop.f32.mrb[81].mxu0  ;;  %v1550_v6 = vpack.c.bf16 %v1483_v24, %v1479_v62  ;;  %v1485_v7 = vpop.f32.mrb[43].mxu1  ;;  %v4338_v8 = vmul.f32 %v1374_v63, %v4302_v61  ;;  %v720_v61 = vadd.f32 0.0001, %v696_v20 }
 0x3ed   : > { %v1740_v21 = vpop.f32.mrb[82].mxu0  ;;  %v1551_v22 = vpack.c.bf16 %v1485_v7, %v1481_v25 }
 0x3ee   : > { %v3564_v9 = vpop.eup %3563  ;;  %v1571_v10 = vmul.bf16 1069105081, %v1550_v6  ;;  %v1775_v42 = vpack.c.bf16 %v1740_v21, %v1736_v3  ;;  %v1742_v23 = vpop.f32.mrb[83].mxu0 }
 0x3ef   : > { %v3566_v58 = vpop.eup %3565  ;;  %v1574_v13 = vmul.bf16 1069105081, %v1551_v22  ;;  %v1776_v14 = vpack.c.bf16 %v1742_v23, %v1738_v5  ;;  %1835 = vmatprep.subr.bf16.mxu0 %v3564_v9 }
 0x3f0   : > { %v1812_v16 = vmul.bf16 1069105081, %v1775_v42  ;;  %1836 = vmatpush1.bf16.msra.mxu0 %v3566_v58 }
 0x3f1   : > { %3575 = vpow.bf16 %v1574_v13  ;;  %v1815_v18 = vmul.bf16 1069105081, %v1776_v14  ;;  %v1489_v45 = vpop.f32.mrb[44].mxu1 }
 0x3f2   : > { %3577 = vpow.bf16 %v1571_v10  ;;  %v1491_v29 = vpop.f32.mrb[45].mxu1 }
 0x3f3   : > { %3579 = vpow.bf16 %v1815_v18  ;;  %v1746_v43 = vpop.f32.mrb[84].mxu0  ;;  %v1493_v30 = vpop.f32.mrb[46].mxu1 }
 0x3f4   : > { %v3568_v36 = vpop.eup %3567  ;;  %3581 = vpow.bf16 %v1812_v16  ;;  %v1748_v38 = vpop.f32.mrb[85].mxu0  ;;  %v1552_v39 = vpack.c.bf16 %v1493_v30, %v1489_v45 }
 0x3f5   : > { %v1495_v46 = vpop.f32.mrb[47].mxu1  ;;  %v3570_v47 = vpop.eup %3569  ;;  %3583 = vrcp.f32 %v720_v61  ;;  %1872 = vmatprep.subr.bf16.mxu1 %v3568_v36 }
 0x3f6   : > { %v1750_v19 = vpop.f32.mrb[86].mxu0  ;;  %v1553_v52 = vpack.c.bf16 %v1495_v46, %v1491_v29  ;;  %v3572_v53 = vpop.eup %3571  ;;  %3585 = vrcp.f32 %v721_v54  ;;  %v1577_v55 = vmul.bf16 1069105081, %v1552_v39  ;;  %1873 = vmatpush1.bf16.msra.mxu1 %v3570_v47  ;;  %v655_v47 = vand.u32 2147483648, %v4342_v49 }
 0x3f7   : > { %v1777_v56 = vpack.c.bf16 %v1750_v19, %v1746_v43  ;;  %v1752_v57 = vpop.f32.mrb[87].mxu0  ;;  %v3574_v26 = vpop.eup %3573  ;;  %3587 = vrsqrt.f32 %v4342_v49  ;;  %1837 = vmatprep.subr.bf16.mxu0 %v3572_v53 }
 0x3f8   : > { %v1580_v27 = vmul.bf16 1069105081, %v1553_v52  ;;  %v1778_v59 = vpack.c.bf16 %v1752_v57, %v1748_v38  ;;  %3589 = vrcp.f32 %v735_v34  ;;  %1838 = vmatpush1.bf16.msra.mxu0 %v3574_v26 }
 0x3f9   : > { %v1818_v40 = vmul.bf16 1069105081, %v1777_v56  ;;  %v1499_v62 = vpop.f32.mrb[48].mxu1 }
 0x3fa   : > { %3591 = vpow.bf16 %v1580_v27  ;;  %v1821_v60 = vmul.bf16 1069105081, %v1778_v59  ;;  %v1501_v51 = vpop.f32.mrb[49].mxu1 }
 0x3fb   : > { %3593 = vpow.bf16 %v1577_v55  ;;  %v1756_v28 = vpop.f32.mrb[88].mxu0  ;;  %v1503_v25 = vpop.f32.mrb[50].mxu1 }
 0x3fc   : > { %3595 = vpow.bf16 %v1821_v60  ;;  %v3576_v63 = vpop.eup %3575  ;;  %v1758_v1 = vpop.f32.mrb[89].mxu0  ;;  %v1554_v2 = vpack.c.bf16 %v1503_v25, %v1499_v62  ;;  %v1386_v25 = vld [vmem:[#allocation3 + $0x18] sm:$0x1] }
 0x3fd   : > { %3597 = vpow.bf16 %v1818_v40  ;;  %v1505_v3 = vpop.f32.mrb[51].mxu1  ;;  %v3578_v24 = vpop.eup %3577  ;;  %1874 = vmatprep.subr.bf16.mxu1 %v3576_v63 }
 0x3fe   : > { %v1760_v5 = vpop.f32.mrb[90].mxu0  ;;  %v1555_v6 = vpack.c.bf16 %v1505_v3, %v1501_v51  ;;  %v3580_v7 = vpop.eup %3579  ;;  %v1583_v20 = vmul.bf16 1069105081, %v1554_v2  ;;  %1875 = vmatpush1.bf16.msra.mxu1 %v3578_v24 }
 0x3ff   : > { %v1779_v44 = vpack.c.bf16 %v1760_v5, %v1756_v28  ;;  %v1762_v21 = vpop.f32.mrb[91].mxu0  ;;  %v3582_v22 = vpop.eup %3581  ;;  %1839 = vmatprep.subr.bf16.mxu0 %v3580_v7 }
 0x400   : > { %v3584_v9 = vpop.eup %3583  ;;  %v1586_v41 = vmul.bf16 1069105081, %v1555_v6  ;;  %v1780_v10 = vpack.c.bf16 %v1762_v21, %v1758_v1  ;;  %1840 = vmatpush1.bf16.msra.mxu0 %v3582_v22 }
 0x401   : > { %v3586_v42 = vpop.eup %3585  ;;  %v1824_v23 = vmul.bf16 1069105081, %v1779_v44  ;;  %v1509_v13 = vpop.f32.mrb[52].mxu1  ;;  %v768_v34 = vmul.f32 0.35355338, %v3584_v9 }
 0x402   : > { %v3588_v58 = vpop.eup %3587  ;;  %3599 = vpow.bf16 %v1586_v41  ;;  %v1827_v11 = vmul.bf16 1069105081, %v1780_v10  ;;  %v1511_v15 = vpop.f32.mrb[53].mxu1  ;;  %v769_v46 = vmul.f32 0.35355338, %v3586_v42 }
 0x403   : > { %v3590_v14 = vpop.eup %3589  ;;  %3601 = vpow.bf16 %v1583_v20  ;;  %v1513_v16 = vpop.f32.mrb[54].mxu1  ;;  %v651_v18 = vmul.f32 %v3588_v58, %v4342_v49  ;;  %v776_v55 = vmul.f32 %v768_v34, %v4075_v31 }
 0x404   : > { %3603 = vpow.bf16 %v1827_v11  ;;  %v1556_v45 = vpack.c.bf16 %v1513_v16, %v1509_v13  ;;  %v1515_v54 = vpop.f32.mrb[55].mxu1  ;;  %v799_v43 = vmul.f32 %v3590_v14, %v4132_v50  ;;  %v777_v56 = vmul.f32 %v769_v46, %v4077_v33  ;;  %v1947_v42 = vpop.trf.xlu0 }
 0x405   : > { %v3592_v61 = vpop.eup %3591  ;;  %3605 = vpow.bf16 %v1824_v23  ;;  %v1557_v30 = vpack.c.bf16 %v1515_v54, %v1511_v15  ;;  %v653_v52 = vsel %vm652_vm1, %v4342_v49, %v651_v18  ;;  %v784_v1 = vpack.c.bf16 %v776_v55, %v776_v55 }
 0x406   : > { %v3594_v29 = vpop.eup %3593  ;;  %1876 = vmatprep.subr.bf16.mxu1 %v3592_v61  ;;  %v1589_v38 = vmul.bf16 1069105081, %v1556_v45  ;;  %v656_v57 = vsel %vm654_vm2, %v655_v47, %v653_v52  ;;  %v785_v2 = vpack.c.bf16 %v777_v56, %v777_v56  ;;  %v1388_v33 = vpack.c.bf16 %v1386_v25, %v799_v43 }
 0x407   : > { %v3596_v36 = vpop.eup %3595  ;;  %1877 = vmatpush1.bf16.msra.mxu1 %v3594_v29  ;;  %v1592_v19 = vmul.bf16 1069105081, %v1557_v30  ;;  %v710_v28 = vmul.f32 0.35355338, %v656_v57  ;;  %v1980_v6 = vsel %vm878_vm5, %v784_v1, 0 }
 0x408   : > { %v3598_v39 = vpop.eup %3597  ;;  %1841 = vmatprep.subr.bf16.mxu0 %v3596_v36  ;;  %v1948_v29 = vpop.trf.xlu0 }
 0x409   : > { %1842 = vmatpush1.bf16.msra.mxu0 %v3598_v39  ;;  %3607 = vpow.bf16 %v1592_v19  ;;  %v1519_v53 = vpop.f32.mrb[56].mxu1  ;;  %v734_v24 = vadd.f32 0.0001, %v710_v28  ;;  %v1385_v39 = vld [vmem:[#allocation3 + $0x10] sm:$0x1]  ;;  %v2170_v19 = vpop.trf.xlu1  ;;  %v363_v28 = vmul.f32 %v4081_v37, %v4081_v37 }
 0x40a   : > { %3609 = vpow.bf16 %v1589_v38  ;;  %v1521_v50 = vpop.f32.mrb[57].mxu1 }
 0x40b   : > { %v1523_v26 = vpop.f32.mrb[58].mxu1 }
 0x40c   : > { %v1558_v59 = vpack.c.bf16 %v1523_v26, %v1519_v53  ;;  %v1525_v40 = vpop.f32.mrb[59].mxu1  ;;  %v1949_v34 = vpop.trf.xlu0 }
 0x40d   : > { %v3600_v27 = vpop.eup %3599  ;;  %v1559_v62 = vpack.c.bf16 %v1525_v40, %v1521_v50  ;;  %v2171_v53 = vpop.trf.xlu1 }
 0x40e   : > { %v3602_v60 = vpop.eup %3601  ;;  %1878 = vmatprep.subr.bf16.mxu1 %v3600_v27  ;;  %v1595_v49 = vmul.bf16 1069105081, %v1558_v59 }
 0x40f   : > { %v3604_v51 = vpop.eup %3603  ;;  %1879 = vmatpush1.bf16.msra.mxu1 %v3602_v60  ;;  %v1598_v3 = vmul.bf16 1069105081, %v1559_v62  ;;  %v362_v62 = vmul.f32 %v4079_v35, %v4079_v35 }
 0x410   : > { %v3606_v63 = vpop.eup %3605  ;;  %1843 = vmatprep.subr.bf16.mxu0 %v3604_v51  ;;  %v1950_v47 = vpop.trf.xlu0 }
 0x411   : > { %1844 = vmatpush1.bf16.msra.mxu0 %v3606_v63  ;;  %3611 = vpow.bf16 %v1598_v3  ;;  %v1529_v31 = vpop.f32.mrb[60].mxu1  ;;  %v2172_v55 = vpop.trf.xlu1  ;;  %v416_v51 = vrot.slane %v362_v62, 4  ;;  %v376_v63 = vmul.f32 %v4138_v12, %v4138_v12 }
 0x412   : > { %3290 = vmatprep.subr.msk.bf16.mxu0 %vm878_vm5, %v785_v2  ;;  %3613 = vpow.bf16 %v1595_v49  ;;  %v1531_v5 = vpop.f32.mrb[61].mxu1 }
 0x413   : > { %v1533_v7 = vpop.f32.mrb[62].mxu1  ;;  %3615 = vrcp.f32 %v734_v24 }
 0x414   : > { %1862 = vmatmul.mubr.bf16.vlgmr.msra.gmra.mrb[92].mxu0 %v1388_v33  ;;  %v3608_v20 = vpop.eup %3607  ;;  %v1560_v44 = vpack.c.bf16 %v1533_v7, %v1529_v31  ;;  %v1535_v21 = vpop.f32.mrb[63].mxu1  ;;  %v422_v31 = vrot.slane %v363_v28, 4  ;;  %v500_v33 = vrot.slane %v376_v63, 4 }
 0x415   : > { %1986 = vmatpush1.bf16.msra.mxu0 %v1980_v6  ;;  %2017 = vmatprep.mubr.bf16.mxu0 %v3882_v0  ;;  %v3610_v22 = vpop.eup %3609  ;;  %v1561_v9 = vpack.c.bf16 %v1535_v21, %v1531_v5  ;;  %v1951_v52 = vpop.trf.xlu0 }
 0x416   : > { %1880 = vmatprep.subr.bf16.mxu1 %v3608_v20  ;;  %v1601_v41 = vmul.bf16 1069105081, %v1560_v44  ;;  %v2173_v57 = vpop.trf.xlu1  ;;  %v423_v5 = vadd.f32 %v422_v31, %v363_v28  ;;  %v501_v20 = vadd.f32 %v500_v33, %v376_v63 }
 0x417   : > { %1881 = vmatpush1.bf16.msra.mxu1 %v3610_v22  ;;  %v1604_v10 = vmul.bf16 1069105081, %v1561_v9 }
 0x419   : > { %3617 = vpow.bf16 %v1604_v10  ;;  %v1539_v23 = vpop.f32.mrb[64].mxu1  ;;  %v1952_v50 = vpop.trf.xlu0 }
 0x41a   : > { %3619 = vpow.bf16 %v1601_v41  ;;  %v1541_v58 = vpop.f32.mrb[65].mxu1  ;;  %v2174_v27 = vpop.trf.xlu1  ;;  %v424_v41 = vrot.slane %v423_v5, 2 }
 0x41b   : > { %v1543_v11 = vpop.f32.mrb[66].mxu1 }
 0x41c   : > { %3291 = vmatmul.mubr.msk.bf16.vlgmr.msra.gmra.mrb[96].mxu0 %vm853_vm14, %v1947_v42  ;;  %v3612_v13 = vpop.eup %3611  ;;  %v1562_v14 = vpack.c.bf16 %v1543_v11, %v1539_v23  ;;  %v1545_v15 = vpop.f32.mrb[67].mxu1  ;;  %v502_v23 = vrot.slane %v501_v20, 2 }
 0x41d   : > { %2027 = vmatprep.mubr.bf16.mxu0 %v3882_v0  ;;  %v3614_v16 = vpop.eup %3613  ;;  %v1563_v61 = vpack.c.bf16 %v1545_v15, %v1541_v58  ;;  %1882 = vmatprep.subr.bf16.mxu1 %v3612_v13  ;;  %v1953_v56 = vpop.trf.xlu0  ;;  %v425_v13 = vadd.f32 %v424_v41, %v423_v5 }
 0x41e   : > { %v1607_v18 = vmul.bf16 1069105081, %v1562_v14  ;;  %1883 = vmatpush1.bf16.msra.mxu1 %v3614_v16  ;;  %v3616_v54 = vpop.eup %3615  ;;  %v2175_v59 = vpop.trf.xlu1  ;;  %v503_v16 = vadd.f32 %v502_v23, %v501_v20 }
 0x41f   : > { %v1610_v45 = vmul.bf16 1069105081, %v1563_v61  ;;  %v798_v43 = vmul.f32 %v3616_v54, %v4130_v48 }
 0x421   : > { %3621 = vpow.bf16 %v1610_v45  ;;  %v1387_v48 = vpack.c.bf16 %v1385_v39, %v798_v43  ;;  %v1954_v26 = vpop.trf.xlu0 }
 0x422   : > { %3623 = vpow.bf16 %v1607_v18  ;;  %v2176_v40 = vpop.trf.xlu1 }
 0x424   : > { %3292 = vmatmul.mubr.msk.bf16.gmra.mrb[100].mxu0 %vm853_vm14, %v1948_v29  ;;  %v3618_v30 = vpop.eup %3617  ;;  %v426_v29 = vrot.slane %v425_v13, 1 }
 0x425   : > { %2037 = vmatprep.mubr.bf16.mxu0 %v3882_v0  ;;  %v3620_v36 = vpop.eup %3619  ;;  %1884 = vmatprep.subr.bf16.mxu1 %v3618_v30 }
 0x426   : > { %1885 = vmatpush1.bf16.msra.mxu1 %v3620_v36  ;;  %v2177_v60 = vpop.trf.xlu1  ;;  %v504_v36 = vrot.slane %v503_v16, 1 }
 0x42c   : > { %3293 = vmatmul.mubr.msk.bf16.gmra.mrb[104].mxu0 %vm853_vm14, %v1949_v34  ;;  %v3622_v38 = vpop.eup %3621 }
 0x42d   : > { %2047 = vmatprep.mubr.bf16.mxu0 %v3882_v0  ;;  %v3624_v46 = vpop.eup %3623  ;;  %1886 = vmatprep.subr.bf16.mxu1 %v3622_v38  ;;  %v4404_v38 = vadd.f32 %v426_v29, %v425_v13 }
 0x42e   : > { %1887 = vmatpush1.bf16.msra.mxu1 %v3624_v46 }
 0x42f   : > { %3299 = vmatprep.subr.msk.bf16.mxu1 %vm878_vm5, %v785_v2  ;;  %v417_v2 = vadd.f32 %v416_v51, %v362_v62  ;;  %vm575_vm6 = vcmp.eq.f32.partialorder %v4404_v38, inf  ;;  %vm577_vm7 = vcmp.eq.f32.partialorder %v4404_v38, 0.0 }
 0x431   : > { %1905 = vmatmul.mubr.bf16.vlgmr.msra.gmra.mrb[68].mxu1 %v1387_v48  ;;  %v418_v24 = vrot.slane %v417_v2, 2  ;;  %v4406_v48 = vadd.f32 %v504_v36, %v503_v16 }
 0x432   : > { %2203 = vmatpush1.bf16.msra.mxu1 %v1980_v6  ;;  %2234 = vmatprep.mubr.bf16.mxu1 %v3882_v0 }
 0x433   : > { %v419_v21 = vadd.f32 %v418_v24, %v417_v2  ;;  %vm666_vm8 = vcmp.eq.f32.partialorder %v4406_v48, inf  ;;  %vm668_vm9 = vcmp.eq.f32.partialorder %v4406_v48, 0.0 }
 0x434   : > { %3294 = vmatmul.mubr.msk.bf16.gmra.mrb[108].mxu0 %vm853_vm14, %v1950_v47 }
 0x435   : > { %2057 = vmatprep.mubr.bf16.mxu0 %v3882_v0  ;;  %v420_v11 = vrot.slane %v419_v21, 1 }
 0x437   : > { %v4401_v18 = vadd.f32 %v420_v11, %v419_v21 }
 0x439   : > { %3300 = vmatmul.mubr.msk.bf16.vlgmr.msra.gmra.mrb[72].mxu1 %vm853_vm14, %v2170_v19  ;;  %vm568_vm3 = vcmp.eq.f32.partialorder %v4401_v18, inf  ;;  %vm570_vm4 = vcmp.eq.f32.partialorder %v4401_v18, 0.0  ;;  %v571_v16 = vand.u32 2147483648, %v4401_v18 }
 0x43a   : > { %2244 = vmatprep.mubr.bf16.mxu1 %v3882_v0 }
 0x43c   : > { %3295 = vmatmul.mubr.msk.bf16.gmra.mrb[112].mxu0 %vm853_vm14, %v1951_v52 }
 0x43d   : > { %2067 = vmatprep.mubr.bf16.mxu0 %v3882_v0 }
 0x441   : > { %3301 = vmatmul.mubr.msk.bf16.gmra.mrb[76].mxu1 %vm853_vm14, %v2171_v53 }
 0x442   : > { %2254 = vmatprep.mubr.bf16.mxu1 %v3882_v0 }
 0x444   : > { %3296 = vmatmul.mubr.msk.bf16.gmra.mrb[116].mxu0 %vm853_vm14, %v1952_v50 }
 0x445   : > { %2077 = vmatprep.mubr.bf16.mxu0 %v3882_v0 }
 0x449   : > { %3302 = vmatmul.mubr.msk.bf16.gmra.mrb[80].mxu1 %vm853_vm14, %v2172_v55 }
 0x44a   : > { %2264 = vmatprep.mubr.bf16.mxu1 %v3882_v0 }
 0x44c   : > { %3297 = vmatmul.mubr.msk.bf16.gmra.mrb[120].mxu0 %vm853_vm14, %v1953_v56 }
 0x44d   : > { %2087 = vmatprep.mubr.bf16.mxu0 %v3882_v0 }
 0x451   : > { %3303 = vmatmul.mubr.msk.bf16.gmra.mrb[84].mxu1 %vm853_vm14, %v2173_v57 }
 0x452   : > { %2274 = vmatprep.mubr.bf16.mxu1 %v3882_v0 }
 0x454   : > { %3298 = vmatmul.mubr.msk.bf16.gmra.mrb[124].mxu0 %vm853_vm14, %v1954_v26 }
 0x455   : > { %2454 = vmatprep.mubr.bf16.mxu0 %v3882_v0 }
 0x459   : > { %3304 = vmatmul.mubr.msk.bf16.gmra.mrb[88].mxu1 %vm853_vm14, %v2174_v27 }
 0x45a   : > { %2284 = vmatprep.mubr.bf16.mxu1 %v3882_v0 }
 0x461   : > { %3305 = vmatmul.mubr.msk.bf16.gmra.mrb[92].mxu1 %vm853_vm14, %v2175_v59 }
 0x462   : > { %2294 = vmatprep.mubr.bf16.mxu1 %v3882_v0 }
 0x469   : > { %3306 = vmatmul.mubr.msk.bf16.gmra.mrb[96].mxu1 %vm853_vm14, %v2176_v40  ;;  %v377_v40 = vmul.f32 %v4142_v17, %v4142_v17 }
 0x46a   : > { %2304 = vmatprep.mubr.bf16.mxu1 %v3882_v0 }
 0x46b   : > { %v506_v20 = vrot.slane %v377_v40, 4 }
 0x471   : > { %3307 = vmatmul.mubr.msk.bf16.gmra.mrb[100].mxu1 %vm853_vm14, %v2177_v60 }
 0x472   : > { %2411 = vmatprep.mubr.bf16.mxu1 %v3882_v0 }
 0x4e7   : > { %v1863_v49 = vpop.f32.mrb[92].mxu0 }
 0x4e8   : > { %v1865_v25 = vpop.f32.mrb[93].mxu0 }
 0x4e9   : > { %v4397_v1 = vpop.f32.mrb[94].mxu0 }
 0x4ea   : > { %v4399_v3 = vpop.f32.mrb[95].mxu0 }
 0x4ef   : > { %v2019_v6 = vpop.f32.mrb[96].mxu0 }
 0x4f0   : > { %v2021_v7 = vpop.f32.mrb[97].mxu0 }
 0x4f1   : > { %v2023_v44 = vpop.f32.mrb[98].mxu0 }
 0x4f2   : > { %v2098_v22 = vpack.c.bf16 %v2023_v44, %v2019_v6  ;;  %v2025_v9 = vpop.f32.mrb[99].mxu0 }
 0x4f3   : > { %v2099_v10 = vpack.c.bf16 %v2025_v9, %v2021_v7 }
 0x4f4   : > { %v2115_v42 = vmul.bf16 1069105081, %v2098_v22 }
 0x4f5   : > { %v2118_v58 = vmul.bf16 1069105081, %v2099_v10 }
 0x4f7   : > { %3625 = vpow.bf16 %v2118_v58  ;;  %v2029_v14 = vpop.f32.mrb[100].mxu0 }
 0x4f8   : > { %3627 = vpow.bf16 %v2115_v42  ;;  %v2031_v15 = vpop.f32.mrb[101].mxu0 }
 0x4f9   : > { %v2033_v61 = vpop.f32.mrb[102].mxu0  ;;  %3629 = vrsqrt.f32 %v4401_v18 }
 0x4fa   : > { %v2100_v45 = vpack.c.bf16 %v2033_v61, %v2029_v14  ;;  %v2035_v54 = vpop.f32.mrb[103].mxu0 }
 0x4fb   : > { %v2101_v43 = vpack.c.bf16 %v2035_v54, %v2031_v15 }
 0x4fc   : > { %v2121_v30 = vmul.bf16 1069105081, %v2100_v45 }
 0x4fd   : > { %v2124_v34 = vmul.bf16 1069105081, %v2101_v43 }
 0x4ff   : > { %3631 = vpow.bf16 %v2124_v34  ;;  %v2039_v39 = vpop.f32.mrb[104].mxu0 }
 0x500   : > { %3633 = vpow.bf16 %v2121_v30  ;;  %v2041_v46 = vpop.f32.mrb[105].mxu0 }
 0x501   : > { %v2043_v47 = vpop.f32.mrb[106].mxu0  ;;  %3635 = vrsqrt.f32 %v4404_v38 }
 0x502   : > { %v3626_v19 = vpop.eup %3625  ;;  %v2102_v52 = vpack.c.bf16 %v2043_v47, %v2039_v39  ;;  %v2045_v53 = vpop.f32.mrb[107].mxu0  ;;  %3637 = vrsqrt.f32 %v4406_v48 }
 0x503   : > { %v3628_v50 = vpop.eup %3627  ;;  %v2103_v55 = vpack.c.bf16 %v2045_v53, %v2041_v46  ;;  %2422 = vmatprep.subr.bf16.mxu0 %v3626_v19 }
 0x504   : > { %v2127_v56 = vmul.bf16 1069105081, %v2102_v52  ;;  %2423 = vmatpush1.bf16.msra.mxu0 %v3628_v50  ;;  %v1906_v26 = vpop.f32.mrb[68].mxu1  ;;  %v3630_v28 = vpop.eup %3629  ;;  %v578_v50 = vand.u32 2147483648, %v4404_v38 }
 0x505   : > { %v2130_v57 = vmul.bf16 1069105081, %v2103_v55  ;;  %v4410_v27 = vadd.f32 %v1906_v26, %v1863_v49  ;;  %v1908_v59 = vpop.f32.mrb[69].mxu1  ;;  %v567_v22 = vmul.f32 %v3630_v28, %v4401_v18 }
 0x506   : > { %v4414_v62 = vadd.f32 %v1908_v59, %v1865_v25  ;;  %v1910_v51 = vpop.f32.mrb[70].mxu1 }
 0x507   : > { %3639 = vpow.bf16 %v2130_v57  ;;  %v2049_v60 = vpop.f32.mrb[108].mxu0  ;;  %v1911_v2 = vadd.f32 %v1910_v51, %v4397_v1  ;;  %v1912_v31 = vpop.f32.mrb[71].mxu1  ;;  %v569_v15 = vsel %vm568_vm3, %v4401_v18, %v567_v22  ;;  %v669_v57 = vand.u32 2147483648, %v4406_v48 }
 0x508   : > { %3641 = vpow.bf16 %v2127_v56  ;;  %v2051_v63 = vpop.f32.mrb[109].mxu0  ;;  %v1913_v24 = vadd.f32 %v1912_v31, %v4399_v3  ;;  %v507_v3 = vadd.f32 %v506_v20, %v377_v40  ;;  %v572_v52 = vsel %vm570_vm4, %v571_v16, %v569_v15 }
 0x509   : > { %v2053_v33 = vpop.f32.mrb[110].mxu0  ;;  %3643 = vrcp.f32 %v1911_v2 }
 0x50a   : > { %v3632_v49 = vpop.eup %3631  ;;  %v2104_v5 = vpack.c.bf16 %v2053_v33, %v2049_v60  ;;  %v2055_v6 = vpop.f32.mrb[111].mxu0  ;;  %3645 = vrcp.f32 %v1913_v24  ;;  %v508_v39 = vrot.slane %v507_v3, 2 }
 0x50b   : > { %v3634_v7 = vpop.eup %3633  ;;  %v2105_v44 = vpack.c.bf16 %v2055_v6, %v2051_v63  ;;  %2424 = vmatprep.subr.bf16.mxu0 %v3632_v49 }
 0x50c   : > { %v2133_v25 = vmul.bf16 1069105081, %v2104_v5  ;;  %2425 = vmatpush1.bf16.msra.mxu0 %v3634_v7  ;;  %v3636_v21 = vpop.eup %3635  ;;  %v2236_v1 = vpop.f32.mrb[72].mxu1  ;;  %v509_v63 = vadd.f32 %v508_v39, %v507_v3  ;;  %v698_v7 = vmul.f32 0.35355338, %v572_v52 }
 0x50d   : > { %v2136_v9 = vmul.bf16 1069105081, %v2105_v44  ;;  %v2238_v41 = vpop.f32.mrb[73].mxu1  ;;  %v3638_v10 = vpop.eup %3637  ;;  %v574_v58 = vmul.f32 %v3636_v21, %v4404_v38 }
 0x50e   : > { %v2240_v23 = vpop.f32.mrb[74].mxu1  ;;  %v665_v29 = vmul.f32 %v3638_v10, %v4406_v48 }
 0x50f   : > { %3647 = vpow.bf16 %v2136_v9  ;;  %v2059_v42 = vpop.f32.mrb[112].mxu0  ;;  %v2315_v13 = vpack.c.bf16 %v2240_v23, %v2236_v1  ;;  %v2242_v14 = vpop.f32.mrb[75].mxu1  ;;  %v576_v53 = vsel %vm575_vm6, %v4404_v38, %v574_v58  ;;  %v722_v58 = vadd.f32 0.0001, %v698_v7 }
 0x510   : > { %3649 = vpow.bf16 %v2133_v25  ;;  %v2061_v11 = vpop.f32.mrb[113].mxu0  ;;  %v2316_v45 = vpack.c.bf16 %v2242_v14, %v2238_v41  ;;  %v667_v18 = vsel %vm666_vm8, %v4406_v48, %v665_v29  ;;  %v579_v28 = vsel %vm577_vm7, %v578_v50, %v576_v53 }
 0x511   : > { %v2063_v61 = vpop.f32.mrb[114].mxu0  ;;  %v2332_v30 = vmul.bf16 1069105081, %v2315_v13  ;;  %v670_v20 = vsel %vm668_vm9, %v669_v57, %v667_v18  ;;  %v699_v22 = vmul.f32 0.35355338, %v579_v28 }
 0x512   : > { %v3640_v54 = vpop.eup %3639  ;;  %v2106_v43 = vpack.c.bf16 %v2063_v61, %v2059_v42  ;;  %v2065_v36 = vpop.f32.mrb[115].mxu0  ;;  %v2335_v47 = vmul.bf16 1069105081, %v2316_v45  ;;  %v712_v48 = vmul.f32 0.35355338, %v670_v20 }
 0x513   : > { %v3642_v34 = vpop.eup %3641  ;;  %v2107_v46 = vpack.c.bf16 %v2065_v36, %v2061_v11  ;;  %2426 = vmatprep.subr.bf16.mxu0 %v3640_v54  ;;  %v723_v14 = vadd.f32 0.0001, %v699_v22 }
 0x514   : > { %v3644_v19 = vpop.eup %3643  ;;  %v2139_v55 = vmul.bf16 1069105081, %v2106_v43  ;;  %2427 = vmatpush1.bf16.msra.mxu0 %v3642_v34  ;;  %3651 = vpow.bf16 %v2335_v47  ;;  %v2246_v59 = vpop.f32.mrb[76].mxu1  ;;  %v736_v29 = vadd.f32 0.0001, %v712_v48 }
 0x515   : > { %v3646_v56 = vpop.eup %3645  ;;  %v2142_v26 = vmul.bf16 1069105081, %v2107_v46  ;;  %v1920_v40 = vrot.slane %v3644_v19, %v4314_v32  ;;  %3653 = vpow.bf16 %v2332_v30  ;;  %v2248_v60 = vpop.f32.mrb[77].mxu1 }
 0x516   : > { %v1924_v51 = vrot.slane %v3646_v56, %v4314_v32  ;;  %v2250_v31 = vpop.f32.mrb[78].mxu1 }
 0x517   : > { %3655 = vpow.bf16 %v2142_v26  ;;  %v2069_v2 = vpop.f32.mrb[116].mxu0  ;;  %v4444_v33 = vmul.f32 %v1920_v40, %v4410_v27  ;;  %v2317_v49 = vpack.c.bf16 %v2250_v31, %v2246_v59  ;;  %v2252_v5 = vpop.f32.mrb[79].mxu1 }
 0x518   : > { %3657 = vpow.bf16 %v2139_v55  ;;  %v2071_v24 = vpop.f32.mrb[117].mxu0  ;;  %v4447_v6 = vmul.f32 %v1924_v51, %v4414_v62  ;;  %v2318_v44 = vpack.c.bf16 %v2252_v5, %v2248_v60  ;;  %v510_v62 = vrot.slane %v509_v63, 1 }
 0x519   : > { %v2073_v38 = vpop.f32.mrb[118].mxu0  ;;  %v3041_v25 = vpack.c.bf16 %v4444_v33, %v4335_v4  ;;  %v2338_v9 = vmul.bf16 1069105081, %v2317_v49 }
 0x51a   : > { %v3648_v21 = vpop.eup %3647  ;;  %v2108_v27 = vpack.c.bf16 %v2073_v38, %v2069_v2  ;;  %v2075_v1 = vpop.f32.mrb[119].mxu0  ;;  %v3042_v41 = vpack.c.bf16 %v4447_v6, %v4338_v8  ;;  %v2341_v42 = vmul.bf16 1069105081, %v2318_v44  ;;  %v4455_v16 = vadd.f32 %v510_v62, %v509_v63 }
 0x51b   : > { %v3650_v10 = vpop.eup %3649  ;;  %v2109_v3 = vpack.c.bf16 %v2075_v1, %v2071_v24  ;;  %2428 = vmatprep.subr.bf16.mxu0 %v3648_v21 }
 0x51c   : > { %v2145_v23 = vmul.bf16 1069105081, %v2108_v27  ;;  %2429 = vmatpush1.bf16.msra.mxu0 %v3650_v10  ;;  %3659 = vpow.bf16 %v2341_v42  ;;  %v2256_v13 = vpop.f32.mrb[80].mxu1  ;;  %vm673_vm10 = vcmp.eq.f32.partialorder %v4455_v16, inf  ;;  %vm675_vm11 = vcmp.eq.f32.partialorder %v4455_v16, 0.0 }
 0x51d   : > { %v2148_v11 = vmul.bf16 1069105081, %v2109_v3  ;;  %3661 = vpow.bf16 %v2338_v9  ;;  %v2258_v15 = vpop.f32.mrb[81].mxu1 }
 0x51e   : > { %v2260_v45 = vpop.f32.mrb[82].mxu1 }
 0x51f   : > { %3663 = vpow.bf16 %v2148_v11  ;;  %v2079_v61 = vpop.f32.mrb[120].mxu0  ;;  %v3652_v54 = vpop.eup %3651  ;;  %v2319_v30 = vpack.c.bf16 %v2260_v45, %v2256_v13 }
 0x520   : > { %3665 = vpow.bf16 %v2145_v23  ;;  %v2081_v43 = vpop.f32.mrb[121].mxu0  ;;  %v2262_v36 = vpop.f32.mrb[83].mxu1  ;;  %2379 = vmatprep.subr.bf16.mxu1 %v3652_v54 }
 0x521   : > { %v3654_v34 = vpop.eup %3653  ;;  %3667 = vrcp.f32 %v722_v58  ;;  %v2083_v39 = vpop.f32.mrb[122].mxu0  ;;  %v2320_v46 = vpack.c.bf16 %v2262_v36, %v2258_v15  ;;  %v2344_v52 = vmul.bf16 1069105081, %v2319_v30 }
 0x522   : > { %v3656_v47 = vpop.eup %3655  ;;  %3669 = vrcp.f32 %v723_v14  ;;  %v2110_v19 = vpack.c.bf16 %v2083_v39, %v2079_v61  ;;  %v2085_v53 = vpop.f32.mrb[123].mxu0  ;;  %2380 = vmatpush1.bf16.msra.mxu1 %v3654_v34  ;;  %v676_v34 = vand.u32 2147483648, %v4455_v16 }
 0x523   : > { %v3658_v50 = vpop.eup %3657  ;;  %3671 = vrsqrt.f32 %v4455_v16  ;;  %v2111_v55 = vpack.c.bf16 %v2085_v53, %v2081_v43  ;;  %v2347_v56 = vmul.bf16 1069105081, %v2320_v46  ;;  %2430 = vmatprep.subr.bf16.mxu0 %v3656_v47 }
 0x524   : > { %3673 = vrcp.f32 %v736_v29  ;;  %v2151_v57 = vmul.bf16 1069105081, %v2110_v19  ;;  %2431 = vmatpush1.bf16.msra.mxu0 %v3658_v50  ;;  %v2266_v59 = vpop.f32.mrb[84].mxu1 }
 0x525   : > { %v2154_v26 = vmul.bf16 1069105081, %v2111_v55  ;;  %3675 = vpow.bf16 %v2347_v56  ;;  %v2268_v40 = vpop.f32.mrb[85].mxu1 }
 0x526   : > { %3677 = vpow.bf16 %v2344_v52  ;;  %v2270_v60 = vpop.f32.mrb[86].mxu1 }
 0x527   : > { %3679 = vpow.bf16 %v2154_v26  ;;  %v2089_v18 = vpop.f32.mrb[124].mxu0  ;;  %v3660_v51 = vpop.eup %3659  ;;  %v2321_v63 = vpack.c.bf16 %v2270_v60, %v2266_v59  ;;  %v1935_v60 = vld [vmem:[#allocation3 + $0x10] sm:$0x1] }
 0x528   : > { %3681 = vpow.bf16 %v2151_v57  ;;  %v2091_v28 = vpop.f32.mrb[125].mxu0  ;;  %v2272_v2 = vpop.f32.mrb[87].mxu1  ;;  %2381 = vmatprep.subr.bf16.mxu1 %v3660_v51 }
 0x529   : > { %v3662_v31 = vpop.eup %3661  ;;  %v2093_v24 = vpop.f32.mrb[126].mxu0  ;;  %v2322_v49 = vpack.c.bf16 %v2272_v2, %v2268_v40  ;;  %v2350_v20 = vmul.bf16 1069105081, %v2321_v63 }
 0x52a   : > { %v3664_v5 = vpop.eup %3663  ;;  %v2112_v7 = vpack.c.bf16 %v2093_v24, %v2089_v18  ;;  %v2095_v38 = vpop.f32.mrb[127].mxu0  ;;  %2382 = vmatpush1.bf16.msra.mxu1 %v3662_v31 }
 0x52b   : > { %v3666_v44 = vpop.eup %3665  ;;  %v2113_v22 = vpack.c.bf16 %v2095_v38, %v2091_v28  ;;  %v2353_v27 = vmul.bf16 1069105081, %v2322_v49  ;;  %2432 = vmatprep.subr.bf16.mxu0 %v3664_v5 }
 0x52c   : > { %v3668_v21 = vpop.eup %3667  ;;  %v2157_v1 = vmul.bf16 1069105081, %v2112_v7  ;;  %2433 = vmatpush1.bf16.msra.mxu0 %v3666_v44  ;;  %v2276_v3 = vpop.f32.mrb[88].mxu1 }
 0x52d   : > { %v3670_v9 = vpop.eup %3669  ;;  %v2160_v62 = vmul.bf16 1069105081, %v2113_v22  ;;  %3683 = vpow.bf16 %v2353_v27  ;;  %v2278_v48 = vpop.f32.mrb[89].mxu1  ;;  %v770_v29 = vmul.f32 0.35355338, %v3668_v21 }
 0x52e   : > { %v3672_v10 = vpop.eup %3671  ;;  %3685 = vpow.bf16 %v2350_v20  ;;  %v2280_v23 = vpop.f32.mrb[90].mxu1  ;;  %v771_v36 = vmul.f32 0.35355338, %v3670_v9 }
 0x52f   : > { %v3674_v42 = vpop.eup %3673  ;;  %3687 = vpow.bf16 %v2160_v62  ;;  %v672_v11 = vmul.f32 %v3672_v10, %v4455_v16  ;;  %v2323_v13 = vpack.c.bf16 %v2280_v23, %v2276_v3  ;;  %v2282_v14 = vpop.f32.mrb[91].mxu1  ;;  %v778_v19 = vmul.f32 %v770_v29, %v4079_v35 }
 0x530   : > { %v3676_v58 = vpop.eup %3675  ;;  %3689 = vpow.bf16 %v2157_v1  ;;  %v800_v61 = vmul.f32 %v3674_v42, %v4138_v12  ;;  %v2324_v45 = vpack.c.bf16 %v2282_v14, %v2278_v48  ;;  %v779_v52 = vmul.f32 %v771_v36, %v4081_v37  ;;  %v2720_v9 = vpop.trf.xlu0 }
 0x531   : > { %v3678_v15 = vpop.eup %3677  ;;  %2383 = vmatprep.subr.bf16.mxu1 %v3676_v58  ;;  %v2356_v43 = vmul.bf16 1069105081, %v2323_v13  ;;  %v674_v46 = vsel %vm673_vm10, %v4455_v16, %v672_v11  ;;  %v786_v28 = vpack.c.bf16 %v778_v19, %v778_v19 }
 0x532   : > { %v3680_v54 = vpop.eup %3679  ;;  %2384 = vmatpush1.bf16.msra.mxu1 %v3678_v15  ;;  %v2359_v39 = vmul.bf16 1069105081, %v2324_v45  ;;  %v677_v53 = vsel %vm675_vm11, %v676_v34, %v674_v46  ;;  %v787_v63 = vpack.c.bf16 %v779_v52, %v779_v52  ;;  %v1937_v37 = vpack.c.bf16 %v1935_v60, %v800_v61 }
 0x533   : > { %v3682_v30 = vpop.eup %3681  ;;  %2434 = vmatprep.subr.bf16.mxu0 %v3680_v54  ;;  %v713_v18 = vmul.f32 0.35355338, %v677_v53  ;;  %v2530_v49 = vsel %vm878_vm5, %v786_v28, 0 }
 0x534   : > { %2435 = vmatpush1.bf16.msra.mxu0 %v3682_v30  ;;  %3691 = vpow.bf16 %v2359_v39  ;;  %v2286_v12 = vpop.f32.mrb[92].mxu1  ;;  %v2721_v15 = vpop.trf.xlu0  ;;  %v1936_v30 = vld [vmem:[#allocation3 + $0x18] sm:$0x1] }
 0x535   : > { %3693 = vpow.bf16 %v2356_v43  ;;  %v2288_v47 = vpop.f32.mrb[93].mxu1  ;;  %v737_v31 = vadd.f32 0.0001, %v713_v18  ;;  %v2497_v39 = vpop.trf.xlu1 }
 0x536   : > { %v2290_v50 = vpop.f32.mrb[94].mxu1 }
 0x537   : > { %v2325_v56 = vpack.c.bf16 %v2290_v50, %v2286_v12  ;;  %v2292_v57 = vpop.f32.mrb[95].mxu1 }
 0x538   : > { %v3684_v55 = vpop.eup %3683  ;;  %v2326_v59 = vpack.c.bf16 %v2292_v57, %v2288_v47  ;;  %v2722_v29 = vpop.trf.xlu0 }
 0x539   : > { %v3686_v26 = vpop.eup %3685  ;;  %2385 = vmatprep.subr.bf16.mxu1 %v3684_v55  ;;  %v2362_v16 = vmul.bf16 1069105081, %v2325_v56  ;;  %v2498_v12 = vpop.trf.xlu1 }
 0x53a   : > { %v3688_v40 = vpop.eup %3687  ;;  %2386 = vmatpush1.bf16.msra.mxu1 %v3686_v26  ;;  %v2365_v2 = vmul.bf16 1069105081, %v2326_v59 }
 0x53b   : > { %v3690_v51 = vpop.eup %3689  ;;  %2436 = vmatprep.subr.bf16.mxu0 %v3688_v40 }
 0x53c   : > { %2437 = vmatpush1.bf16.msra.mxu0 %v3690_v51  ;;  %3695 = vpow.bf16 %v2365_v2  ;;  %v2296_v35 = vpop.f32.mrb[96].mxu1  ;;  %v2723_v34 = vpop.trf.xlu0 }
 0x53d   : > { %3317 = vmatprep.subr.msk.bf16.mxu0 %vm878_vm5, %v787_v63  ;;  %3697 = vpow.bf16 %v2362_v16  ;;  %v2298_v24 = vpop.f32.mrb[97].mxu1  ;;  %v2499_v19 = vpop.trf.xlu1 }
 0x53e   : > { %v2300_v5 = vpop.f32.mrb[98].mxu1  ;;  %3699 = vrcp.f32 %v737_v31 }
 0x53f   : > { %2455 = vmatmul.mubr.bf16.vlgmr.msra.gmra.mrb[128].mxu0 %v1937_v37  ;;  %v3692_v7 = vpop.eup %3691  ;;  %v2327_v20 = vpack.c.bf16 %v2300_v5, %v2296_v35  ;;  %v2302_v38 = vpop.f32.mrb[99].mxu1 }
 0x540   : > { %2753 = vmatpush1.bf16.msra.mxu0 %v2530_v49  ;;  %2784 = vmatprep.mubr.bf16.mxu0 %v3882_v0  ;;  %v3694_v44 = vpop.eup %3693  ;;  %v2328_v21 = vpack.c.bf16 %v2302_v38, %v2298_v24  ;;  %v2724_v46 = vpop.trf.xlu0 }
 0x541   : > { %2387 = vmatprep.subr.bf16.mxu1 %v3692_v7  ;;  %v2368_v22 = vmul.bf16 1069105081, %v2327_v20  ;;  %v2500_v53 = vpop.trf.xlu1 }
 0x542   : > { %2388 = vmatpush1.bf16.msra.mxu1 %v3694_v44  ;;  %v2371_v27 = vmul.bf16 1069105081, %v2328_v21 }
 0x544   : > { %3701 = vpow.bf16 %v2371_v27  ;;  %v2306_v1 = vpop.f32.mrb[100].mxu1  ;;  %v2725_v47 = vpop.trf.xlu0 }
 0x545   : > { %3703 = vpow.bf16 %v2368_v22  ;;  %v2308_v10 = vpop.f32.mrb[101].mxu1  ;;  %v2501_v55 = vpop.trf.xlu1 }
 0x546   : > { %v2310_v62 = vpop.f32.mrb[102].mxu1 }
 0x547   : > { %3318 = vmatmul.mubr.msk.bf16.vlgmr.msra.gmra.mrb[132].mxu0 %vm853_vm14, %v2720_v9  ;;  %v3696_v3 = vpop.eup %3695  ;;  %v2329_v42 = vpack.c.bf16 %v2310_v62, %v2306_v1  ;;  %v2312_v48 = vpop.f32.mrb[103].mxu1 }
 0x548   : > { %2794 = vmatprep.mubr.bf16.mxu0 %v3882_v0  ;;  %v3698_v23 = vpop.eup %3697  ;;  %v2330_v58 = vpack.c.bf16 %v2312_v48, %v2308_v10  ;;  %2389 = vmatprep.subr.bf16.mxu1 %v3696_v3  ;;  %v2726_v52 = vpop.trf.xlu0 }
 0x549   : > { %v2374_v11 = vmul.bf16 1069105081, %v2329_v42  ;;  %2390 = vmatpush1.bf16.msra.mxu1 %v3698_v23  ;;  %v3700_v14 = vpop.eup %3699  ;;  %v2502_v56 = vpop.trf.xlu1 }
 0x54a   : > { %v2377_v13 = vmul.bf16 1069105081, %v2330_v58  ;;  %v801_v61 = vmul.f32 %v3700_v14, %v4142_v17 }
 0x54c   : > { %3705 = vpow.bf16 %v2377_v13  ;;  %v1938_v17 = vpack.c.bf16 %v1936_v30, %v801_v61  ;;  %v2727_v50 = vpop.trf.xlu0 }
 0x54d   : > { %3707 = vpow.bf16 %v2374_v11  ;;  %v2503_v57 = vpop.trf.xlu1 }
 0x54f   : > { %3319 = vmatmul.mubr.msk.bf16.gmra.mrb[136].mxu0 %vm853_vm14, %v2721_v15  ;;  %v3702_v45 = vpop.eup %3701 }
 0x550   : > { %2804 = vmatprep.mubr.bf16.mxu0 %v3882_v0  ;;  %v3704_v54 = vpop.eup %3703  ;;  %2391 = vmatprep.subr.bf16.mxu1 %v3702_v45 }
 0x551   : > { %2392 = vmatpush1.bf16.msra.mxu1 %v3704_v54  ;;  %v2504_v26 = vpop.trf.xlu1 }
 0x557   : > { %3320 = vmatmul.mubr.msk.bf16.gmra.mrb[140].mxu0 %vm853_vm14, %v2722_v29  ;;  %v3706_v43 = vpop.eup %3705 }
 0x558   : > { %2814 = vmatprep.mubr.bf16.mxu0 %v3882_v0  ;;  %v3708_v36 = vpop.eup %3707  ;;  %2393 = vmatprep.subr.bf16.mxu1 %v3706_v43 }
 0x559   : > { %2394 = vmatpush1.bf16.msra.mxu1 %v3708_v36 }
 0x55a   : > { %3308 = vmatprep.subr.msk.bf16.mxu1 %vm878_vm5, %v787_v63 }
 0x55c   : > { %2412 = vmatmul.mubr.bf16.vlgmr.msra.gmra.mrb[104].mxu1 %v1938_v17 }
 0x55d   : > { %2536 = vmatpush1.bf16.msra.mxu1 %v2530_v49  ;;  %2567 = vmatprep.mubr.bf16.mxu1 %v3882_v0 }
 0x55f   : > { %3321 = vmatmul.mubr.msk.bf16.gmra.mrb[144].mxu0 %vm853_vm14, %v2723_v34 }
 0x560   : > { %2824 = vmatprep.mubr.bf16.mxu0 %v3882_v0 }
 0x564   : > { %3309 = vmatmul.mubr.msk.bf16.vlgmr.msra.gmra.mrb[108].mxu1 %vm853_vm14, %v2497_v39 }
 0x565   : > { %2577 = vmatprep.mubr.bf16.mxu1 %v3882_v0 }
 0x567   : > { %3322 = vmatmul.mubr.msk.bf16.gmra.mrb[148].mxu0 %vm853_vm14, %v2724_v46 }
 0x568   : > { %2834 = vmatprep.mubr.bf16.mxu0 %v3882_v0 }
 0x56c   : > { %3310 = vmatmul.mubr.msk.bf16.gmra.mrb[112].mxu1 %vm853_vm14, %v2498_v12 }
 0x56d   : > { %2587 = vmatprep.mubr.bf16.mxu1 %v3882_v0 }
 0x56f   : > { %3323 = vmatmul.mubr.msk.bf16.gmra.mrb[152].mxu0 %vm853_vm14, %v2725_v47 }
 0x570   : > { %2844 = vmatprep.mubr.bf16.mxu0 %v3882_v0 }
 0x574   : > { %3311 = vmatmul.mubr.msk.bf16.gmra.mrb[116].mxu1 %vm853_vm14, %v2499_v19 }
 0x575   : > { %2597 = vmatprep.mubr.bf16.mxu1 %v3882_v0 }
 0x577   : > { %3324 = vmatmul.mubr.msk.bf16.gmra.mrb[156].mxu0 %vm853_vm14, %v2726_v52 }
 0x578   : > { %2854 = vmatprep.mubr.bf16.mxu0 %v3882_v0 }
 0x57c   : > { %3312 = vmatmul.mubr.msk.bf16.gmra.mrb[120].mxu1 %vm853_vm14, %v2500_v53 }
 0x57d   : > { %2607 = vmatprep.mubr.bf16.mxu1 %v3882_v0 }
 0x57f   : > { %3325 = vmatmul.mubr.msk.bf16.gmra.mrb[160].mxu0 %vm853_vm14, %v2727_v50 }
 0x584   : > { %3313 = vmatmul.mubr.msk.bf16.gmra.mrb[124].mxu1 %vm853_vm14, %v2501_v55 }
 0x585   : > { %2617 = vmatprep.mubr.bf16.mxu1 %v3882_v0 }
 0x58c   : > { %3314 = vmatmul.mubr.msk.bf16.gmra.mrb[128].mxu1 %vm853_vm14, %v2502_v56 }
 0x58d   : > { %2627 = vmatprep.mubr.bf16.mxu1 %v3882_v0 }
 0x594   : > { %3315 = vmatmul.mubr.msk.bf16.gmra.mrb[132].mxu1 %vm853_vm14, %v2503_v57 }
 0x595   : > { %2637 = vmatprep.mubr.bf16.mxu1 %v3882_v0 }
 0x59c   : > { %3316 = vmatmul.mubr.msk.bf16.gmra.mrb[136].mxu1 %vm853_vm14, %v2504_v26 }
 0x59d   : > { %2961 = vmatprep.mubr.bf16.mxu1 %v3882_v0 }
 0x612   : > { %v2456_v59 = vpop.f32.mrb[128].mxu0 }
 0x613   : > { %v2458_v40 = vpop.f32.mrb[129].mxu0 }
 0x614   : > { %v2460_v18 = vpop.f32.mrb[130].mxu0 }
 0x615   : > { %v2462_v16 = vpop.f32.mrb[131].mxu0 }
 0x61a   : > { %v2786_v60 = vpop.f32.mrb[132].mxu0 }
 0x61b   : > { %v2788_v51 = vpop.f32.mrb[133].mxu0 }
 0x61c   : > { %v2790_v28 = vpop.f32.mrb[134].mxu0 }
 0x61d   : > { %v2865_v63 = vpack.c.bf16 %v2790_v28, %v2786_v60  ;;  %v2792_v2 = vpop.f32.mrb[135].mxu0 }
 0x61e   : > { %v2866_v35 = vpack.c.bf16 %v2792_v2, %v2788_v51 }
 0x61f   : > { %v2882_v37 = vmul.bf16 1069105081, %v2865_v63 }
 0x620   : > { %v2885_v31 = vmul.bf16 1069105081, %v2866_v35 }
 0x622   : > { %3709 = vpow.bf16 %v2885_v31  ;;  %v2796_v24 = vpop.f32.mrb[136].mxu0 }
 0x623   : > { %3711 = vpow.bf16 %v2882_v37  ;;  %v2798_v49 = vpop.f32.mrb[137].mxu0 }
 0x624   : > { %v2800_v5 = vpop.f32.mrb[138].mxu0 }
 0x625   : > { %v2867_v7 = vpack.c.bf16 %v2800_v5, %v2796_v24  ;;  %v2802_v20 = vpop.f32.mrb[139].mxu0 }
 0x626   : > { %v2868_v38 = vpack.c.bf16 %v2802_v20, %v2798_v49 }
 0x627   : > { %v2888_v44 = vmul.bf16 1069105081, %v2867_v7 }
 0x628   : > { %v2891_v21 = vmul.bf16 1069105081, %v2868_v38 }
 0x62a   : > { %3713 = vpow.bf16 %v2891_v21  ;;  %v2806_v22 = vpop.f32.mrb[140].mxu0 }
 0x62b   : > { %3715 = vpow.bf16 %v2888_v44  ;;  %v2808_v27 = vpop.f32.mrb[141].mxu0 }
 0x62c   : > { %v2810_v9 = vpop.f32.mrb[142].mxu0 }
 0x62d   : > { %v3710_v1 = vpop.eup %3709  ;;  %v2869_v10 = vpack.c.bf16 %v2810_v9, %v2806_v22  ;;  %v2812_v62 = vpop.f32.mrb[143].mxu0 }
 0x62e   : > { %v3712_v3 = vpop.eup %3711  ;;  %v2870_v42 = vpack.c.bf16 %v2812_v62, %v2808_v27  ;;  %2929 = vmatprep.subr.bf16.mxu1 %v3710_v1 }
 0x62f   : > { %v2894_v48 = vmul.bf16 1069105081, %v2869_v10  ;;  %2930 = vmatpush1.bf16.msra.mxu1 %v3712_v3  ;;  %v2413_v58 = vpop.f32.mrb[104].mxu1 }
 0x630   : > { %v2897_v23 = vmul.bf16 1069105081, %v2870_v42  ;;  %v2457_v11 = vadd.f32 %v2456_v59, %v2413_v58  ;;  %v2415_v13 = vpop.f32.mrb[105].mxu1 }
 0x631   : > { %v2459_v15 = vadd.f32 %v2458_v40, %v2415_v13  ;;  %v2417_v61 = vpop.f32.mrb[106].mxu1 }
 0x632   : > { %3717 = vpow.bf16 %v2897_v23  ;;  %v2816_v14 = vpop.f32.mrb[144].mxu0  ;;  %v2461_v54 = vadd.f32 %v2460_v18, %v2417_v61  ;;  %v2419_v29 = vpop.f32.mrb[107].mxu1 }
 0x633   : > { %3719 = vpow.bf16 %v2894_v48  ;;  %v2818_v45 = vpop.f32.mrb[145].mxu0  ;;  %v2463_v30 = vadd.f32 %v2462_v16, %v2419_v29 }
 0x634   : > { %v2820_v43 = vpop.f32.mrb[146].mxu0  ;;  %3721 = vrcp.f32 %v2461_v54 }
 0x635   : > { %v3714_v36 = vpop.eup %3713  ;;  %v2871_v17 = vpack.c.bf16 %v2820_v43, %v2816_v14  ;;  %v2822_v34 = vpop.f32.mrb[147].mxu0  ;;  %3723 = vrcp.f32 %v2463_v30 }
 0x636   : > { %v3716_v39 = vpop.eup %3715  ;;  %v2872_v46 = vpack.c.bf16 %v2822_v34, %v2818_v45  ;;  %2931 = vmatprep.subr.bf16.mxu1 %v3714_v36 }
 0x637   : > { %v2900_v12 = vmul.bf16 1069105081, %v2871_v17  ;;  %2932 = vmatpush1.bf16.msra.mxu1 %v3716_v39  ;;  %v4503_v19 = vpop.f32.mrb[108].mxu1 }
 0x638   : > { %v2903_v47 = vmul.bf16 1069105081, %v2872_v46  ;;  %v4505_v52 = vpop.f32.mrb[109].mxu1 }
 0x639   : > { %v4507_v50 = vpop.f32.mrb[110].mxu1 }
 0x63a   : > { %3725 = vpow.bf16 %v2903_v47  ;;  %v2826_v53 = vpop.f32.mrb[148].mxu0  ;;  %v2648_v56 = vpack.c.bf16 %v4507_v50, %v4503_v19  ;;  %v4511_v57 = vpop.f32.mrb[111].mxu1 }
 0x63b   : > { %3727 = vpow.bf16 %v2900_v12  ;;  %v2828_v55 = vpop.f32.mrb[149].mxu0  ;;  %v2649_v59 = vpack.c.bf16 %v4511_v57, %v4505_v52 }
 0x63c   : > { %v2830_v26 = vpop.f32.mrb[150].mxu0 }
 0x63d   : > { %v3718_v40 = vpop.eup %3717  ;;  %v2873_v18 = vpack.c.bf16 %v2830_v26, %v2826_v53  ;;  %v2832_v16 = vpop.f32.mrb[151].mxu0 }
 0x63e   : > { %v3720_v60 = vpop.eup %3719  ;;  %v2874_v51 = vpack.c.bf16 %v2832_v16, %v2828_v55  ;;  %2933 = vmatprep.subr.bf16.mxu1 %v3718_v40 }
 0x63f   : > { %v3722_v28 = vpop.eup %3721  ;;  %v2906_v63 = vmul.bf16 1069105081, %v2873_v18  ;;  %2934 = vmatpush1.bf16.msra.mxu1 %v3720_v60  ;;  %v4515_v37 = vpop.f32.mrb[112].mxu1 }
 0x640   : > { %v3724_v2 = vpop.eup %3723  ;;  %v2909_v35 = vmul.bf16 1069105081, %v2874_v51  ;;  %v2470_v31 = vrot.slane %v3722_v28, %v4314_v32  ;;  %v4518_v24 = vpop.f32.mrb[113].mxu1 }
 0x641   : > { %v2474_v49 = vrot.slane %v3724_v2, %v4314_v32  ;;  %v4521_v7 = vpop.f32.mrb[114].mxu1 }
 0x642   : > { %3729 = vpow.bf16 %v2909_v35  ;;  %v2836_v5 = vpop.f32.mrb[152].mxu0  ;;  %v4523_v20 = vmul.f32 %v2470_v31, %v2457_v11  ;;  %v2650_v44 = vpack.c.bf16 %v4521_v7, %v4515_v37  ;;  %v4527_v21 = vpop.f32.mrb[115].mxu1 }
 0x643   : > { %3731 = vpow.bf16 %v2906_v63  ;;  %v2838_v38 = vpop.f32.mrb[153].mxu0  ;;  %v4529_v22 = vmul.f32 %v2474_v49, %v2459_v15  ;;  %v2651_v9 = vpack.c.bf16 %v4527_v21, %v4518_v24  ;;  %v2668_v24 = vmul.bf16 1069105081, %v2649_v59 }
 0x644   : > { %v2840_v27 = vpop.f32.mrb[154].mxu0  ;;  %v2671_v52 = vmul.bf16 1069105081, %v2650_v44 }
 0x645   : > { %v3726_v1 = vpop.eup %3725  ;;  %v2875_v10 = vpack.c.bf16 %v2840_v27, %v2836_v5  ;;  %v2842_v62 = vpop.f32.mrb[155].mxu0  ;;  %v2665_v27 = vmul.bf16 1069105081, %v2648_v56 }
 0x646   : > { %v3728_v3 = vpop.eup %3727  ;;  %v2876_v42 = vpack.c.bf16 %v2842_v62, %v2838_v38  ;;  %2935 = vmatprep.subr.bf16.mxu1 %v3726_v1  ;;  %v2674_v62 = vmul.bf16 1069105081, %v2651_v9 }
 0x647   : > { %v2912_v48 = vmul.bf16 1069105081, %v2875_v10  ;;  %2936 = vmatpush1.bf16.msra.mxu1 %v3728_v3  ;;  %v4533_v58 = vpop.f32.mrb[116].mxu1 }
 0x648   : > { %v2915_v23 = vmul.bf16 1069105081, %v2876_v42  ;;  %v2591_v11 = vpop.f32.mrb[117].mxu1 }
 0x649   : > { %v2593_v14 = vpop.f32.mrb[118].mxu1 }
 0x64a   : > { %3733 = vpow.bf16 %v2915_v23  ;;  %v2846_v13 = vpop.f32.mrb[156].mxu0  ;;  %v2652_v61 = vpack.c.bf16 %v2593_v14, %v4533_v58  ;;  %v2595_v45 = vpop.f32.mrb[119].mxu1  ;;  %v2484_v14 = vld [vmem:[#allocation3 + $0x8] sm:$0xff] }
 0x64b   : > { %3735 = vpow.bf16 %v2912_v48  ;;  %v2848_v15 = vpop.f32.mrb[157].mxu0  ;;  %v2653_v29 = vpack.c.bf16 %v2595_v45, %v2591_v11 }
 0x64c   : > { %v2850_v54 = vpop.f32.mrb[158].mxu0  ;;  %v2677_v56 = vmul.bf16 1069105081, %v2652_v61 }
 0x64d   : > { %v3730_v43 = vpop.eup %3729  ;;  %v2877_v30 = vpack.c.bf16 %v2850_v54, %v2846_v13  ;;  %v2852_v36 = vpop.f32.mrb[159].mxu0  ;;  %v2680_v57 = vmul.bf16 1069105081, %v2653_v29 }
 0x64e   : > { %v3732_v17 = vpop.eup %3731  ;;  %v2878_v34 = vpack.c.bf16 %v2852_v36, %v2848_v15  ;;  %2937 = vmatprep.subr.bf16.mxu1 %v3730_v43  ;;  %v2486_v15 = vld [vmem:[#allocation3 + $0x18] sm:$0x1] }
 0x64f   : > { %v2918_v39 = vmul.bf16 1069105081, %v2877_v30  ;;  %2938 = vmatpush1.bf16.msra.mxu1 %v3732_v17  ;;  %v2599_v12 = vpop.f32.mrb[120].mxu1  ;;  %v2488_v54 = vpack.c.bf16 %v2486_v15, %v2484_v14  ;;  %v3117_v15 = vld [vmem:[%s4017_s11 + $0x18] sm:$0xff] }
 0x650   : > { %v2921_v46 = vmul.bf16 1069105081, %v2878_v34  ;;  %v2601_v47 = vpop.f32.mrb[121].mxu1 }
 0x651   : > { %v2603_v55 = vpop.f32.mrb[122].mxu1 }
 0x652   : > { %3737 = vpow.bf16 %v2921_v46  ;;  %v2856_v53 = vpop.f32.mrb[160].mxu0  ;;  %v2654_v40 = vpack.c.bf16 %v2603_v55, %v2599_v12  ;;  %v2605_v18 = vpop.f32.mrb[123].mxu1 }
 0x653   : > { %3739 = vpow.bf16 %v2918_v39  ;;  %v2858_v26 = vpop.f32.mrb[161].mxu0  ;;  %v2655_v60 = vpack.c.bf16 %v2605_v18, %v2601_v47 }
 0x654   : > { %v2860_v16 = vpop.f32.mrb[162].mxu0  ;;  %v2683_v7 = vmul.bf16 1069105081, %v2654_v40 }
 0x655   : > { %v3734_v51 = vpop.eup %3733  ;;  %v2879_v28 = vpack.c.bf16 %v2860_v16, %v2856_v53  ;;  %v2862_v63 = vpop.f32.mrb[163].mxu0  ;;  %v2686_v9 = vmul.bf16 1069105081, %v2655_v60 }
 0x656   : > { %v3736_v2 = vpop.eup %3735  ;;  %v2880_v35 = vpack.c.bf16 %v2862_v63, %v2858_v26  ;;  %2939 = vmatprep.subr.bf16.mxu1 %v3734_v51 }
 0x657   : > { %v2924_v31 = vmul.bf16 1069105081, %v2879_v28  ;;  %2940 = vmatpush1.bf16.msra.mxu1 %v3736_v2  ;;  %v2609_v5 = vpop.f32.mrb[124].mxu1 }
 0x658   : > { %v2927_v49 = vmul.bf16 1069105081, %v2880_v35  ;;  %v2611_v38 = vpop.f32.mrb[125].mxu1 }
 0x659   : > { %v2613_v21 = vpop.f32.mrb[126].mxu1 }
 0x65a   : > { %3741 = vpow.bf16 %v2927_v49  ;;  %v2656_v1 = vpack.c.bf16 %v2613_v21, %v2609_v5  ;;  %v2615_v10 = vpop.f32.mrb[127].mxu1 }
 0x65b   : > { %3743 = vpow.bf16 %v2924_v31  ;;  %v2657_v3 = vpack.c.bf16 %v2615_v10, %v2611_v38 }
 0x65c   : > { %3745 = vpow.bf16 %v2668_v24  ;;  %v2689_v17 = vmul.bf16 1069105081, %v2656_v1 }
 0x65d   : > { %v3738_v42 = vpop.eup %3737  ;;  %3747 = vpow.bf16 %v2665_v27  ;;  %v2692_v44 = vmul.bf16 1069105081, %v2657_v3  ;;  %v2483_v3 = vld [vmem:[#allocation3] sm:$0xff] }
 0x65e   : > { %v3740_v48 = vpop.eup %3739  ;;  %2941 = vmatprep.subr.bf16.mxu1 %v3738_v42  ;;  %3749 = vpow.bf16 %v2674_v62  ;;  %v2485_v42 = vld [vmem:[#allocation3 + $0x10] sm:$0x1] }
 0x65f   : > { %2942 = vmatpush1.bf16.msra.mxu1 %v3740_v48  ;;  %v2619_v59 = vpop.f32.mrb[128].mxu1  ;;  %3751 = vpow.bf16 %v2671_v52  ;;  %v2487_v52 = vpack.c.bf16 %v2485_v42, %v2483_v3 }
 0x660   : > { %v2621_v19 = vpop.f32.mrb[129].mxu1  ;;  %3753 = vpow.bf16 %v2680_v57 }
 0x661   : > { %v2623_v50 = vpop.f32.mrb[130].mxu1  ;;  %3755 = vpow.bf16 %v2677_v56 }
 0x662   : > { %v2658_v23 = vpack.c.bf16 %v2623_v50, %v2619_v59  ;;  %v2625_v58 = vpop.f32.mrb[131].mxu1  ;;  %3757 = vpow.bf16 %v2686_v9  ;;  %v3115_v9 = vld [vmem:[%s4017_s11 + $0x8] sm:$0xff] }
 0x663   : > { %v2659_v11 = vpack.c.bf16 %v2625_v58, %v2621_v19  ;;  %3759 = vpow.bf16 %v2683_v7  ;;  %v3411_v58 = vld [vmem:[%s4628_s2] sm:$0xff]  }
 0x664   : > { %3761 = vpow.bf16 %v2692_v44  ;;  %v2695_v55 = vmul.bf16 1069105081, %v2658_v23 }
 0x665   : > { %v3742_v13 = vpop.eup %3741  ;;  %v2698_v46 = vmul.bf16 1069105081, %v2659_v11  ;;  %3763 = vpow.bf16 %v2689_v17  ;;  %v3116_v11 = vld [vmem:[%s4017_s11 + $0x10] sm:$0xff] }
 0x666   : > { %v3744_v45 = vpop.eup %3743  ;;  %2943 = vmatprep.subr.bf16.mxu1 %v3742_v13 }
 0x667   : > { %v3746_v37 = vpop.eup %3745  ;;  %2944 = vmatpush1.bf16.msra.mxu1 %v3744_v45  ;;  %v2629_v29 = vpop.f32.mrb[132].mxu1  ;;  %3765 = vpow.bf16 %v2698_v46 }
 0x668   : > { %2972 = vmatprep.subr.bf16.mxu1 %v3746_v37  ;;  %v2631_v61 = vpop.f32.mrb[133].mxu1  ;;  %v3748_v43 = vpop.eup %3747  ;;  %3767 = vpow.bf16 %v2695_v55 }
 0x669   : > { %v2633_v30 = vpop.f32.mrb[134].mxu1  ;;  %v3750_v36 = vpop.eup %3749 }
 0x66a   : > { %2962 = vmatmul.mubr.bf16.vlgmr.msra.gmra.mrb[140].mxu1 %v2488_v54  ;;  %v2660_v34 = vpack.c.bf16 %v2633_v30, %v2629_v29  ;;  %v2635_v39 = vpop.f32.mrb[135].mxu1  ;;  %v3752_v47 = vpop.eup %3751  ;;  %v3118_v30 = vld [vmem:[%s4017_s11 + $0x20] sm:$0xff] }
 0x66b   : > { %2973 = vmatpush1.bf16.msra.mxu1 %v3748_v43  ;;  %3004 = vmatprep.mubr.bf16.mxu1 %v3882_v0  ;;  %v2661_v12 = vpack.c.bf16 %v2635_v39, %v2631_v61  ;;  %v3754_v53 = vpop.eup %3753 }
 0x66c   : > { %2974 = vmatprep.subr.bf16.mxu1 %v3750_v36  ;;  %v3756_v16 = vpop.eup %3755  ;;  %v2701_v28 = vmul.bf16 1069105081, %v2660_v34  ;;  %v3119_v36 = vld [vmem:[%s4017_s11 + $0x28] sm:$0xff]  ;;  %v3120_v34 = vld [vmem:[%s4017_s11 + $0x30] sm:$0xff] }
 0x66d   : > { %v2704_v26 = vmul.bf16 1069105081, %v2661_v12  ;;  %v3758_v51 = vpop.eup %3757  ;;  %v3121_v12 = vld [vmem:[%s4017_s11 + $0x38] sm:$0xff] }
 0x66e   : > { %v3760_v31 = vpop.eup %3759 }
 0x66f   : > { %2975 = vmatpush1.bf16.msra.mxu1 %v3752_v47  ;;  %v2639_v40 = vpop.f32.mrb[136].mxu1  ;;  %3769 = vpow.bf16 %v2704_v26  ;;  %v3762_v49 = vpop.eup %3761 }
 0x670   : > { %2976 = vmatprep.subr.bf16.mxu1 %v3754_v53  ;;  %v2641_v18 = vpop.f32.mrb[137].mxu1  ;;  %3771 = vpow.bf16 %v2701_v28  ;;  %v3764_v38 = vpop.eup %3763 }
 0x671   : > { %v2643_v60 = vpop.f32.mrb[138].mxu1 }
 0x672   : > { %v2662_v63 = vpack.c.bf16 %v2643_v60, %v2639_v40  ;;  %v2645_v2 = vpop.f32.mrb[139].mxu1  ;;  %v3766_v21 = vpop.eup %3765 }
 0x673   : > { %2977 = vmatpush1.bf16.msra.mxu1 %v3756_v16  ;;  %v2663_v35 = vpack.c.bf16 %v2645_v2, %v2641_v18  ;;  %v3768_v27 = vpop.eup %3767 }
 0x674   : > { %2978 = vmatprep.subr.bf16.mxu1 %v3758_v51  ;;  %v2707_v5 = vmul.bf16 1069105081, %v2662_v63 }
 0x675   : > { %v2710_v24 = vmul.bf16 1069105081, %v2663_v35 }
 0x677   : > { %2979 = vmatpush1.bf16.msra.mxu1 %v3760_v31  ;;  %3773 = vpow.bf16 %v2710_v24 }
 0x678   : > { %2980 = vmatprep.subr.bf16.mxu1 %v3762_v49  ;;  %3775 = vpow.bf16 %v2707_v5 }
 0x67a   : > { %v3770_v1 = vpop.eup %3769 }
 0x67b   : > { %2981 = vmatpush1.bf16.msra.mxu1 %v3764_v38  ;;  %v3772_v10 = vpop.eup %3771 }
 0x67c   : > { %2982 = vmatprep.subr.bf16.mxu1 %v3766_v21 }
 0x67f   : > { %2983 = vmatpush1.bf16.msra.mxu1 %v3768_v27 }
 0x680   : > { %2984 = vmatprep.subr.bf16.mxu1 %v3770_v1 }
 0x682   : > { %v3774_v62 = vpop.eup %3773 }
 0x683   : > { %2985 = vmatpush1.bf16.msra.mxu1 %v3772_v10  ;;  %v3776_v48 = vpop.eup %3775 }
 0x684   : > { %2986 = vmatprep.subr.bf16.mxu1 %v3774_v62 }
 0x687   : > { %2987 = vmatpush1.bf16.msra.mxu1 %v3776_v48 }
 0x688   : > { %3061 = vmatprep.subr.bf16.mxu1 %v3042_v41 }
 0x68a   : > { %3005 = vmatmul.mubr.bf16.vlgmr.msra.gmra.mrb[140].mxu1 %v2487_v52 }
 0x68b   : > { %3062 = vmatpush1.bf16.msra.mxu1 %v3041_v25  ;;  %3093 = vmatprep.mubr.bf16.mxu1 %v3882_v0 }
 0x75d   : > { %v3006_v57 = vpop.f32.mrb[140].mxu1 }
 0x75e   : > { %v3008_v59 = vpop.f32.mrb[141].mxu1 }
 0x75f   : > { %v3010_v19 = vpop.f32.mrb[142].mxu1 }
 0x760   : > { %3777 = vrcp.f32 %v3010_v19  ;;  %v3012_v50 = vpop.f32.mrb[143].mxu1 }
 0x761   : > { %3779 = vrcp.f32 %v3012_v50 }
 0x76a   : > { %v3778_v56 = vpop.eup %3777 }
 0x76b   : > { %v3780_v23 = vpop.eup %3779  ;;  %v3020_v8 = vrot.slane %v3778_v56, %v4314_v32 }
 0x76c   : > { %v3024_v6 = vrot.slane %v3780_v23, %v4314_v32  ;;  %v3412_v32 = vld [vmem:[%s4628_s2 + $0x8] sm:$0xff]  }
 0x76d   : > { %v3025_v41 = vmul.f32 %v3020_v8, %v3006_v57 }
 0x76e   : > { %v3026_v4 = vmul.f32 %v3024_v6, %v3008_v59 }
 0x76f   : > { %v3043_v33 = vpack.c.bf16 %v3025_v41, %v4523_v20  ;;  %v3114_v20 = vld [vmem:[%s4017_s11] sm:$0xff]  ;;  %s4582_s11 = scalar_lea.hbm %s4629_s3, %s3336_s7 }
 0x770   : > { %v3044_v25 = vpack.c.bf16 %v3026_v4, %v4529_v22 }
 0x772   : > { %3063 = vmatprep.subr.bf16.mxu1 %v3044_v25 }
 0x773   : > { %3064 = vmatpush1.bf16.msra.mxu1 %v3043_v33 }
 0x776   : > { %3328 = vmatmul.mubr.msk.bf16.vlgmr.msra.gmra.mrb[144].mxu1 %vm244_vm0, %v3411_v58 }
 0x777   : > { %3103 = vmatprep.mubr.bf16.mxu1 %v3882_v0 }
 0x77e   : > { %3329 = vmatmul.mubr.msk.bf16.gmra.mrb[148].mxu1 %vm244_vm0, %v3412_v32 }
 0x849   : > { %v3095_v22 = vpop.f32.mrb[144].mxu1 }
 0x84a   : > { %v3122_v13 = vadd.f32 %v3114_v20, %v3095_v22  ;;  %v3097_v14 = vpop.f32.mrb[145].mxu1 }
 0x84b   : > { %v3123_v45 = vadd.f32 %v3115_v9, %v3097_v14  ;;  %v3099_v37 = vpop.f32.mrb[146].mxu1 }
 0x84c   : > { %v3130_v0 = vmul.f32 0.70710677, %v3122_v13  ;;  %v3124_v7 = vadd.f32 %v3116_v11, %v3099_v37  ;;  %v3101_v44 = vpop.f32.mrb[147].mxu1 }
 0x84d   : > { %v3131_v54 = vmul.f32 0.70710677, %v3123_v45  ;;  %v3125_v29 = vadd.f32 %v3117_v15, %v3101_v44 }
 0x84e   : > { %3138 = vst [vmem:[%s188_s4] sm:$0xff] %v3130_v0  ;;  %v3132_v61 = vmul.f32 0.70710677, %v3124_v7 }
 0x84f   : > { %3139 = vst [vmem:[%s188_s4 + $0x8] sm:$0xff] %v3131_v54  ;;  %v3133_v43 = vmul.f32 0.70710677, %v3125_v29 }
 0x850   : > { %3140 = vst [vmem:[%s188_s4 + $0x10] sm:$0xff] %v3132_v61 }
 0x851   : > { %3141 = vst [vmem:[%s188_s4 + $0x18] sm:$0xff] %v3133_v43  ;;  %v3105_v17 = vpop.f32.mrb[148].mxu1 }
 0x852   : > { %v3126_v39 = vadd.f32 %v3118_v30, %v3105_v17  ;;  %v3107_v46 = vpop.f32.mrb[149].mxu1 }
 0x853   : > { %v3127_v47 = vadd.f32 %v3119_v36, %v3107_v46  ;;  %v3109_v53 = vpop.f32.mrb[150].mxu1 }
 0x854   : > { %v3134_v55 = vmul.f32 0.70710677, %v3126_v39  ;;  %v3128_v26 = vadd.f32 %v3120_v34, %v3109_v53  ;;  %v3111_v40 = vpop.f32.mrb[151].mxu1 }
 0x855   : > { %v3135_v18 = vmul.f32 0.70710677, %v3127_v47  ;;  %v3129_v16 = vadd.f32 %v3121_v12, %v3111_v40 }
 0x856   : > { %3142 = vst [vmem:[%s188_s4 + $0x20] sm:$0xff] %v3134_v55  ;;  %v3136_v60 = vmul.f32 0.70710677, %v3128_v26 }
 0x857   : > { %3143 = vst [vmem:[%s188_s4 + $0x28] sm:$0xff] %v3135_v18  ;;  %v3137_v51 = vmul.f32 0.70710677, %v3129_v16 }
 0x858   : > { %3144 = vst [vmem:[%s188_s4 + $0x30] sm:$0xff] %v3136_v60 }
 0x859   : > { %3145 = vst [vmem:[%s188_s4 + $0x38] sm:$0xff] %v3137_v51 }
 0x85a   : > { %3824 = shalt.err (!%p3821_p2)
}
 0x85b   : > { %s3825_s26 = scalar_lea.hbm %s4582_s11, 1024  ;;  %s3829_s29 = scalar_lea.hbm %s4629_s3, 2048 }
 0x85c   : > { %p3826_p4 = scmp.ne.s32.totalorder %s4582_s11, %s3825_s26  ;;  %p3830_p9 = scmp.lt.u32.totalorder %s4582_s11, %s4629_s3 }
 0x85d   : > { %p3831_p1 = scmp.lt.u32.totalorder %s3829_s29, %s3825_s26  ;;  %p3833_p6 = scmp.lt.u32.totalorder %s3825_s26, %s4582_s11 }
 0x85e   : > { %p3827_p5 = pnand %p3826_p4, %p4636_p11 }
 0x85f   : > { %p3832_p3 = por %p3831_p1, %p3830_p9 }
 0x860   : > { %p3828_p7 = pneg %p3827_p5 }
 0x861   : > { %p3834_p12 = por %p3833_p6, %p3832_p3 }
 0x863   : > { %p3835_p13 = pnand %p3834_p12, %p3828_p7 }
 0x865   : > { %3838 = shalt.err (!%p3835_p13)
}
 0x866   : > { %s3885_s23 = smov 256   ;;  %s3886_s4 = smov 16  }
 0x867   : > { %3355 = dma.vmem_to_hbm [thread:$0]  (%p4636_p11), %s4577_s6, 1024, %s4582_s11, %s3147_s16, %s3885_s23, %s3885_s23, %s3886_s4  }
 0x868 PF: > { %s3175_s7 = sand.u32 1, %s3865_s12   ;;  %p4637_p8 = scmp.ne.s32.totalorder %s4634_s25, 0 }
 0x869   : > { %p4638_p10 = scmp.ge.s32.totalorder %s3877_s15, 2  ;;  %s3176_s9 = scalar_lea.sflag [#allocation6], %s3175_s7 }
 0x86b   : > { %p3362_p0 = pnand %p4638_p10, %p4637_p8 }
 0x86d   : > { %3860 = dma.done.wait (!%p3362_p0), %s3176_s9, 1024  }
 0x86e   : > { %3862 = vsyncadd (!%p3362_p0), %s3176_s9, 4294966272  ;;  %p16_p2 = scmp.ge.s32.totalorder %s3932_s18, 4   ;;  %s4639_s12 = smov %s3869_s13 }
 0x86f   : > { %s4640_s13 = smov %s3873_s14  ;;  %s4641_s14 = smov %s3944_s21 }
 0x870   : > { %s4642_s15 = smov %s3932_s18  ;;  %18 = sbr.rel (!%p16_p2) target bundleno = 5 (0x5), region = 78 }
 0x877   :  { %3181 = vsyncpa [#allocation5], 1 }
 0x878   :  { %3183 = vsyncpa [#allocation5 + $0x1], 1 }
 0x879   :  { %3184 = vsyncpa [#allocation6], 1 }
 0x87a   :  { %3186 = vsyncpa [#allocation6 + $0x1], 1 }

</bundles_post_ra>
